<compile_context>
chip_gen: v6e
topology: v6e:2x2x1
jax: 0.10.0
libtpu: 0.0.40
codegen_flags: <defaults>
</compile_context>

<pallas_src>
import jax
import jax.numpy as jnp
from jax.experimental import pallas as pl
from jax.experimental.pallas import tpu as pltpu

_LANE = 128


def _round_up(x, m):
    return (x + m - 1) // m * m


def _layer0_kernel(spec_cols_ref, spec_t_2d_ref, cond_ref, pvec_ref, w_c_ref,
                   ht_ref, hf_ref, hc_ref):
    # spec_cols_ref: (ROWS, 2)  lane0 = time-shifted scalar, lane1 = freq-shifted
    # spec_t_2d_ref: (TT, M)    cond_ref / ht_ref / hf_ref: (ROWS, H)
    # pvec_ref: (8, H) rows = [w_t, b_t, w_f, b_f, b_c, 0, 0, 0]
    # w_c_ref: (M, H)           hc_ref: (TT, H)
    cond = cond_ref[...]                     # (ROWS, H)  lane-dense
    cols = spec_cols_ref[...]                # (ROWS, 2)
    st = cols[:, 0:1]                        # (ROWS, 1) -> lane broadcast
    sf = cols[:, 1:2]

    p = pvec_ref[...]                        # (8, H), resident across the grid
    w_t, b_t = p[0:1, :], p[1:2, :]
    w_f, b_f = p[2:3, :], p[3:4, :]
    b_c = p[4:5, :]

    # Linear(1, H) on the per-(t, m) scalar plus conditioning: pure VPU work on
    # fully (8,128)-aligned, lane-dense tiles (unmasked lane-dense stores).
    ht_ref[...] = st * w_t + (cond + b_t)
    hf_ref[...] = sf * w_f + (cond + b_f)

    # Centralized stack init: Linear(M, H) over whole frames -> one coarse MXU
    # matmul per block (MXU slot is otherwise idle in this mem-bound kernel).
    hc_ref[...] = jnp.dot(spec_t_2d_ref[...], w_c_ref[...],
                          preferred_element_type=jnp.float32) + b_c


def _plan_tiles(BT, M, H):
    """Pick frames-per-block (TT), grid length, and the scoped-VMEM limit."""
    # Per-TensorCore VMEM capacity; safe fallback if the query is unavailable.
    try:
        vmem_cap = int(pltpu.get_tpu_info().vmem_capacity_bytes)
    except Exception:
        vmem_cap = 128 << 20

    # Per-frame VMEM bytes across BOTH pipeline buffers of every streamed block
    # (cond in, h_t/h_f out, lane-padded (ROWS,2) spec cols, (TT,M) frames,
    # (TT,H) h_c out).
    bytes_per_frame = 2 * 4 * (3 * M * H
                               + M * _LANE
                               + _round_up(M, _LANE)
                               + H)
    const_bytes = 2 * 4 * (8 * H + M * H)      # pvec + w_c (double-buffered)
    headroom = 2 << 20                         # compiler internal scratch etc.

    # Explicit scoped-VMEM limit: <= 3/4 of physical (48 MiB on v7x's 64 MiB,
    # 48 MiB is also plenty on v5e/v6e since the sublane target binds first),
    # but never below what the minimum 8-frame block needs.
    vmem_limit = min((vmem_cap * 3) // 4,
                     max(48 << 20, const_bytes + headroom + 8 * bytes_per_frame))

    budget = max(bytes_per_frame, vmem_limit - const_bytes - headroom)
    tt_budget = max(8, (budget // bytes_per_frame) // 8 * 8)

    # Sublane target per streamed block: ~1024 rows is the measured HBM-roofline
    # knee on v5e/v6e; v7x (64 MiB VMEM, ~3.2 TB/s HBM) wants bigger steps to
    # amortize the ~0.35 us per-grid-step overhead.
    target_rows = 2048 if vmem_cap <= (64 << 20) else 1024
    tt_target = max(8, (max(1, target_rows // M)) // 8 * 8)
    tt_max = min(tt_budget, tt_target)

    if BT <= tt_max:
        return BT, 1, vmem_limit          # single full-extent block

    # Round DOWN to a multiple-of-8 divisor of BT near tt_max; prefer an even
    # grid so the "parallel" axis load-balances across v7x's two TensorCores.
    best = best_even = None
    t = tt_max
    while t >= max(8, tt_max // 2):
        if BT % t == 0:
            if best is None:
                best = t
            if (BT // t) % 2 == 0:
                best_even = t
                break
        t -= 8
    tt = best_even if best_even is not None else best
    if tt is not None:
        return tt, BT // tt, vmem_limit

    # Awkward BT (no nearby multiple-of-8 divisor): keep full-size blocks and
    # rely on Pallas masking of the ragged final block. The math is per-row, so
    # garbage rows in the padded region never reach the real output.
    return tt_max, pl.cdiv(BT, tt_max), vmem_limit


def delayed_stack_layer0(dummy_arg, spectrogram, condition, params):
    """Pallas implementation of ModuleWrapperDelayedStackLayer0.forward."""
    assert dummy_arg is not None           # the only thing the wrapper checks
    B, T, M = spectrogram.shape
    H = condition.shape[-1]
    assert condition.shape == (B, T, M, H)
    assert M % 8 == 0, "mel-bin count must be sublane-aligned (multiple of 8)"
    assert H % _LANE == 0, "hidden size must be lane-aligned (multiple of 128)"

    # MelNet layer-0 "delays": prepend a zero time-frame / zero mel-bin.
    # TODO(synk): these shifts stay as XLA pads in the wrapper; they touch only
    # the tiny (B,T,M) spectrogram (~1/H of the conditioning traffic).
    spec_time = jnp.pad(spectrogram, ((0, 0), (1, 0), (0, 0)))[:, :-1, :]
    spec_freq = jnp.pad(spectrogram, ((0, 0), (0, 0), (1, 0)))[:, :, :-1]

    BT = B * T
    R = BT * M

    # Lane-dense 2-D views: rows = (b, t, m), lanes = H.
    cond2 = condition.reshape(R, H)
    # Single (R, 2) spec-scalar array (time-shifted, freq-shifted) -> one
    # padded VMEM block instead of two.
    spec_cols = jnp.stack([spec_time.reshape(R), spec_freq.reshape(R)], axis=1)
    spec_t_2d = spec_time.reshape(BT, M)

    # Pack the five H-vectors into one (8, H) lane-aligned, grid-resident tile.
    zeros = jnp.zeros((H,), jnp.float32)
    pvec = jnp.stack([params["w_t"], params["b_t"], params["w_f"],
                      params["b_f"], params["b_c"], zeros, zeros, zeros], axis=0)
    w_c = params["w_c"]                    # (M, H)

    TT, nsteps, vmem_limit = _plan_tiles(BT, M, H)
    ROWS = TT * M

    cost = pl.CostEstimate(
        flops=6 * R * H + 2 * BT * M * H,
        transcendentals=0,
        bytes_accessed=4 * (3 * R * H + 2 * R + BT * M + BT * H + (M + 8) * H),
    )

    ht2, hf2, hc2 = pl.pallas_call(
        _layer0_kernel,
        out_shape=(
            jax.ShapeDtypeStruct((R, H), jnp.float32),
            jax.ShapeDtypeStruct((R, H), jnp.float32),
            jax.ShapeDtypeStruct((BT, H), jnp.float32),
        ),
        grid_spec=pltpu.PrefetchScalarGridSpec(
            num_scalar_prefetch=0,
            grid=(nsteps,),
            in_specs=[
                pl.BlockSpec((ROWS, 2), lambda i: (i, 0)),   # spec scalar cols
                pl.BlockSpec((TT, M), lambda i: (i, 0)),     # time-shifted frames
                pl.BlockSpec((ROWS, H), lambda i: (i, 0)),   # condition
                pl.BlockSpec((8, H), lambda i: (0, 0)),      # packed vec params
                pl.BlockSpec((M, H), lambda i: (0, 0)),      # w_c (resident)
            ],
            out_specs=[
                pl.BlockSpec((ROWS, H), lambda i: (i, 0)),   # h_t
                pl.BlockSpec((ROWS, H), lambda i: (i, 0)),   # h_f
                pl.BlockSpec((TT, H), lambda i: (i, 0)),     # h_c
            ],
        ),
        compiler_params=pltpu.CompilerParams(
            dimension_semantics=("parallel",),
            vmem_limit_bytes=vmem_limit),
        cost_estimate=cost,
    )(spec_cols, spec_t_2d, cond2, pvec, w_c)

    h_t = ht2.reshape(B, T, M, H)
    h_f = hf2.reshape(B, T, M, H)
    h_c = hc2.reshape(B, T, H)
    return h_t, h_f, h_c


def _reference(spectrogram, condition, params):
    spec_time = jnp.pad(spectrogram, ((0, 0), (1, 0), (0, 0)))[:, :-1, :]
    spec_freq = jnp.pad(spectrogram, ((0, 0), (0, 0), (1, 0)))[:, :, :-1]
    h_t = spec_time[..., None] * params["w_t"] + params["b_t"] + condition
    h_f = spec_freq[..., None] * params["w_f"] + params["b_f"] + condition
    h_c = jnp.einsum("btm,mh->bth", spec_time, params["w_c"]) + params["b_c"]
    return h_t, h_f, h_c


if __name__ == "__main__":
    B, T, M, H = 2, 64, 16, 128   # small MelNet-ish shapes; grid has >1 step

    key = jax.random.PRNGKey(0)
    k1, k2, k3, k4, k5, k6, k7, k8 = jax.random.split(key, 8)

    spectrogram = jax.random.normal(k1, (B, T, M), dtype=jnp.float32)
    condition = jax.random.normal(k2, (B, T, M, H), dtype=jnp.float32)

    params = {
        "w_t": 0.1 * jax.random.normal(k3, (H,), dtype=jnp.float32),
        "b_t": 0.01 * jax.random.normal(k4, (H,), dtype=jnp.float32),
        "w_f": 0.1 * jax.random.normal(k5, (H,), dtype=jnp.float32),
        "b_f": 0.01 * jax.random.normal(k6, (H,), dtype=jnp.float32),
        "w_c": 0.1 * jax.random.normal(k7, (M, H), dtype=jnp.float32),
        "b_c": 0.01 * jax.random.normal(k8, (H,), dtype=jnp.float32),
    }

    dummy = jnp.ones((1,), dtype=jnp.float32)  # wrapper only checks not-None
    h_t, h_f, h_c = delayed_stack_layer0(dummy, spectrogram, condition, params)
    jax.block_until_ready((h_t, h_f, h_c))

    r_t, r_f, r_c = _reference(spectrogram, condition, params)
    assert jnp.allclose(h_t, r_t, atol=1e-5, rtol=1e-5)
    assert jnp.allclose(h_f, r_f, atol=1e-5, rtol=1e-5)
    assert jnp.allclose(h_c, r_c, atol=1e-5, rtol=1e-5)

    print("KERNEL_OK")
</pallas_src>

<mosaic_0001>
module attributes {stable_mosaic.version = 11 : i64} {
  func.func @_layer0_kernel(%arg0: i32, %arg1: memref<1024x2xf32, #tpu.memory_space<vmem>>, %arg2: memref<64x16xf32, #tpu.memory_space<vmem>>, %arg3: memref<1024x128xf32, #tpu.memory_space<vmem>>, %arg4: memref<8x128xf32, #tpu.memory_space<vmem>>, %arg5: memref<16x128xf32, #tpu.memory_space<vmem>>, %arg6: memref<1024x128xf32, #tpu.memory_space<vmem>>, %arg7: memref<1024x128xf32, #tpu.memory_space<vmem>>, %arg8: memref<64x128xf32, #tpu.memory_space<vmem>>) attributes {dimension_semantics = [#tpu.dimension_semantics<parallel>], iteration_bounds = array<i64: 2>, scalar_prefetch = 0 : i64, scratch_operands = 0 : i64, tpu.core_type = #tpu.core_type<tc>, window_params = [{transform_indices = @transform_0, window_bounds = array<i64: 1024, 2>}, {transform_indices = @transform_1, window_bounds = array<i64: 64, 16>}, {transform_indices = @transform_2, window_bounds = array<i64: 1024, 128>}, {pipeline_mode = #tpu.pipeline_mode<synchronous>, transform_indices = @transform_3, window_bounds = array<i64: 8, 128>}, {pipeline_mode = #tpu.pipeline_mode<synchronous>, transform_indices = @transform_4, window_bounds = array<i64: 16, 128>}, {transform_indices = @transform_5, window_bounds = array<i64: 1024, 128>}, {transform_indices = @transform_6, window_bounds = array<i64: 1024, 128>}, {transform_indices = @transform_7, window_bounds = array<i64: 64, 128>}]} {
    %c0 = arith.constant 0 : index
    %c0_0 = arith.constant 0 : index
    %0 = vector.load %arg3[%c0, %c0_0] : memref<1024x128xf32, #tpu.memory_space<vmem>>, vector<1024x128xf32>
    %c0_1 = arith.constant 0 : index
    %c0_2 = arith.constant 0 : index
    %1 = vector.load %arg1[%c0_1, %c0_2] : memref<1024x2xf32, #tpu.memory_space<vmem>>, vector<1024x2xf32>
    %2 = vector.extract_strided_slice %1 {offsets = [0, 0], sizes = [1024, 1], strides = [1, 1]} : vector<1024x2xf32> to vector<1024x1xf32>
    %3 = vector.extract_strided_slice %1 {offsets = [0, 1], sizes = [1024, 1], strides = [1, 1]} : vector<1024x2xf32> to vector<1024x1xf32>
    %c0_3 = arith.constant 0 : index
    %c0_4 = arith.constant 0 : index
    %4 = vector.load %arg4[%c0_3, %c0_4] : memref<8x128xf32, #tpu.memory_space<vmem>>, vector<8x128xf32>
    %5 = vector.extract_strided_slice %4 {offsets = [0, 0], sizes = [1, 128], strides = [1, 1]} : vector<8x128xf32> to vector<1x128xf32>
    %6 = vector.extract_strided_slice %4 {offsets = [1, 0], sizes = [1, 128], strides = [1, 1]} : vector<8x128xf32> to vector<1x128xf32>
    %7 = vector.extract_strided_slice %4 {offsets = [2, 0], sizes = [1, 128], strides = [1, 1]} : vector<8x128xf32> to vector<1x128xf32>
    %8 = vector.extract_strided_slice %4 {offsets = [3, 0], sizes = [1, 128], strides = [1, 1]} : vector<8x128xf32> to vector<1x128xf32>
    %9 = vector.extract_strided_slice %4 {offsets = [4, 0], sizes = [1, 128], strides = [1, 1]} : vector<8x128xf32> to vector<1x128xf32>
    %10 = vector.broadcast %2 : vector<1024x1xf32> to vector<1024x128xf32>
    %11 = vector.broadcast %5 : vector<1x128xf32> to vector<1024x128xf32>
    %12 = arith.mulf %10, %11 : vector<1024x128xf32>
    %13 = vector.broadcast %6 : vector<1x128xf32> to vector<1024x128xf32>
    %14 = arith.addf %0, %13 : vector<1024x128xf32>
    %15 = arith.addf %12, %14 : vector<1024x128xf32>
    %c0_5 = arith.constant 0 : index
    %c0_6 = arith.constant 0 : index
    %16 = vector.load %arg6[%c0_5, %c0_6] : memref<1024x128xf32, #tpu.memory_space<vmem>>, vector<1024x128xf32>
    tpu.vector_store %arg6[%c0_5, %c0_6], %15 {strides = array<i32>} : memref<1024x128xf32, #tpu.memory_space<vmem>>, vector<1024x128xf32>,
    %17 = vector.broadcast %3 : vector<1024x1xf32> to vector<1024x128xf32>
    %18 = vector.broadcast %7 : vector<1x128xf32> to vector<1024x128xf32>
    %19 = arith.mulf %17, %18 : vector<1024x128xf32>
    %20 = vector.broadcast %8 : vector<1x128xf32> to vector<1024x128xf32>
    %21 = arith.addf %0, %20 : vector<1024x128xf32>
    %22 = arith.addf %19, %21 : vector<1024x128xf32>
    %c0_7 = arith.constant 0 : index
    %c0_8 = arith.constant 0 : index
    %23 = vector.load %arg7[%c0_7, %c0_8] : memref<1024x128xf32, #tpu.memory_space<vmem>>, vector<1024x128xf32>
    tpu.vector_store %arg7[%c0_7, %c0_8], %22 {strides = array<i32>} : memref<1024x128xf32, #tpu.memory_space<vmem>>, vector<1024x128xf32>,
    %c0_9 = arith.constant 0 : index
    %c0_10 = arith.constant 0 : index
    %24 = vector.load %arg2[%c0_9, %c0_10] : memref<64x16xf32, #tpu.memory_space<vmem>>, vector<64x16xf32>
    %c0_11 = arith.constant 0 : index
    %c0_12 = arith.constant 0 : index
    %25 = vector.load %arg5[%c0_11, %c0_12] : memref<16x128xf32, #tpu.memory_space<vmem>>, vector<16x128xf32>
    %cst = arith.constant dense<0.000000e+00> : vector<64x128xf32>
    %26 = tpu.matmul %24, %25, %cst {dimension_numbers = #tpu.dot_dimension_numbers<[1], [0], [0], [1], [0, 0, 1, 1], [], []>} : vector<64x16xf32>, vector<16x128xf32>, vector<64x128xf32> -> vector<64x128xf32>
    %27 = vector.broadcast %9 : vector<1x128xf32> to vector<64x128xf32>
    %28 = arith.addf %26, %27 : vector<64x128xf32>
    %c0_13 = arith.constant 0 : index
    %c0_14 = arith.constant 0 : index
    %29 = vector.load %arg8[%c0_13, %c0_14] : memref<64x128xf32, #tpu.memory_space<vmem>>, vector<64x128xf32>
    tpu.vector_store %arg8[%c0_13, %c0_14], %28 {strides = array<i32>} : memref<64x128xf32, #tpu.memory_space<vmem>>, vector<64x128xf32>,
    return
  }
  func.func @transform_0(%arg0: i32) -> (i32, i32) {
    %c0_i32 = arith.constant 0 : i32
    %c0_i32_0 = arith.constant 0 : i32
    return %arg0, %c0_i32 : i32, i32
  }
  func.func @transform_1(%arg0: i32) -> (i32, i32) {
    %c0_i32 = arith.constant 0 : i32
    %c0_i32_0 = arith.constant 0 : i32
    return %arg0, %c0_i32 : i32, i32
  }
  func.func @transform_2(%arg0: i32) -> (i32, i32) {
    %c0_i32 = arith.constant 0 : i32
    %c0_i32_0 = arith.constant 0 : i32
    return %arg0, %c0_i32 : i32, i32
  }
  func.func @transform_3(%arg0: i32) -> (i32, i32) {
    %c0_i32 = arith.constant 0 : i32
    %c0_i32_0 = arith.constant 0 : i32
    %c0_i32_1 = arith.constant 0 : i32
    return %c0_i32, %c0_i32_0 : i32, i32
  }
  func.func @transform_4(%arg0: i32) -> (i32, i32) {
    %c0_i32 = arith.constant 0 : i32
    %c0_i32_0 = arith.constant 0 : i32
    %c0_i32_1 = arith.constant 0 : i32
    return %c0_i32, %c0_i32_0 : i32, i32
  }
  func.func @transform_5(%arg0: i32) -> (i32, i32) {
    %c0_i32 = arith.constant 0 : i32
    %c0_i32_0 = arith.constant 0 : i32
    return %arg0, %c0_i32 : i32, i32
  }
  func.func @transform_6(%arg0: i32) -> (i32, i32) {
    %c0_i32 = arith.constant 0 : i32
    %c0_i32_0 = arith.constant 0 : i32
    return %arg0, %c0_i32 : i32, i32
  }
  func.func @transform_7(%arg0: i32) -> (i32, i32) {
    %c0_i32 = arith.constant 0 : i32
    %c0_i32_0 = arith.constant 0 : i32
    return %arg0, %c0_i32 : i32, i32
  }
}

</mosaic_0001>

<bundles_post_ra>
// kernel: tpu_custom_call.1
= control target key start
LH: loop header
LB: loop body
LE: loop exit
PB: predicated region body
PF: predicated region fallthrough
CT: control target
= control target key end

     0   :  { %s5253_s0 = inlined_call_operand.vmem [shape: f32[2048,2], index: 0, kind: input, shape index: {}]   ;;  %s5254_s1 = inlined_call_operand.vmem [shape: f32[128,16], index: 1, kind: input, shape index: {}]   ;;  %s5255_s2 = inlined_call_operand.vmem [shape: f32[2048,128], index: 2, kind: input, shape index: {}]   ;;  %s5256_s3 = inlined_call_operand.vmem [shape: f32[8,128], index: 3, kind: input, shape index: {}]   ;;  %s5257_s4 = inlined_call_operand.vmem [shape: f32[16,128], index: 4, kind: input, shape index: {}]   ;;  %s5258_s5 = inlined_call_operand.hbm [shape: f32[2048,128], index: 5, kind: output, shape index: {0}]   ;;  %s5259_s6 = inlined_call_operand.hbm [shape: f32[2048,128], index: 6, kind: output, shape index: {1}]   ;;  %s5260_s7 = inlined_call_operand.hbm [shape: f32[128,128], index: 7, kind: output, shape index: {2}]  }
   0x1   :  { %5263 = sst [smem:[#allocation9_spill]] %s5253_s0 }
   0x2   :  { %13 = vsyncpa [#allocation3], 0 }
   0x3   :  { %15 = vsyncpa [#allocation3 + $0x1], 0 }
   0x4   :  { %16 = vsyncpa [#allocation5], 0 }
   0x5   :  { %18 = vsyncpa [#allocation5 + $0x1], 0  ;;  %s3692_s24 = smov 0   ;;  %s3694_s25 = smov 0  }
   0x6   :  { %s3696_s26 = smov 0   ;;  %s3698_s27 = smov 0  }
   0x7 LB: > { %s3713_s28 = sadd.s32 4294967295, %s3643_s27   ;;  %s5261_s29 = sadd.s32 4294967294, %s3643_s27   ;;  %s3643_s27 = sphi %s3698_s27, %s5273_s27   ;;  %s3639_s26 = sphi %s3696_s26, %s5272_s26   ;;  %s3635_s25 = sphi %s3694_s25, %s5271_s25   ;;  %s3631_s24 = sphi %s3692_s24, %s5270_s24  }
   0x8   : > { %s3717_s30 = sadd.s32 1, %s3643_s27   ;;  %s151_s8 = sadd.s32 1, %s3639_s26 }
   0x9   : > { %s148_s9 = ssub.s32 %s3643_s27, %s3717_s30  ;;  %p161_p0 = scmp.ne.s32.totalorder %s3639_s26, %s3635_s25 }
   0xa   : > { %p149_p1 = scmp.eq.s32.totalorder %s148_s9, 0  ;;  %p162_p2 = scmp.eq.s32.totalorder %s3713_s28, 1 }
   0xb   : > { %p167_p3 = scmp.ne.s32.totalorder %s3635_s25, %s3631_s24  ;;  %p168_p4 = scmp.eq.s32.totalorder %s5261_s29, 1 }
   0xc   : > { %s3730_s10 = scalar_select %p149_p1, %s3639_s26, %s151_s8  }
   0xd   : > { %p3732_p5 = por %p162_p2, %p161_p0  ;;  %p3736_p6 = por %p168_p4, %p167_p3 }
   0xe   : > { %p3151_p7 = scmp.ge.s32.totalorder %s3643_s27, 1  ;;  %p271_p8 = scmp.lt.s32.totalorder %s3643_s27, 3 }
  0x10   : > { %p272_p9 = pnand %p3151_p7, %p271_p8 }
  0x11   : > { %s3155_s13 = sshll.u32 (!%p272_p9), %s3713_s28, 7  ;;  %s5266_s0 = sld [smem:[#allocation9_spill]] (!%p272_p9) }
  0x12   : > { %275 = sbr.rel (%p272_p9) target bundleno = 707 (0x2c3), region = 40  ;;  %p324_p10 = scmp.lt.s32.totalorder (!%p272_p9), %s3155_s13, 255 }
  0x13   : > { %s3833_s23 = sand.u32 (!%p272_p9), 1, %s3635_s25   ;;  %s5262_s19 = sshll.u32 (!%p272_p9), %s3713_s28, 14 }
  0x14   : > { %s3152_s8 = sshll.u32 (!%p272_p9), %s3833_s23, 10  ;;  %s4885_s21 = scalar_lea.hbm (!%p272_p9), %s5258_s5, %s5262_s19 }
  0x15   : > { %s3855_s9 = scalar_lea.vmem (!%p272_p9), [#allocation2], %s3152_s8 }
  0x17   : > { %v3645_v0 = vmov 0   ;;  %s5275_s13 = smov (!%p324_p10, %s3155_s13), 255  ;;  %v1241_v57 = vlaneseq  ;;  %vm2807_vm0 = vcmask 130048  }
  0x18   : > { %3267 = vset.pattern.permute.xlu1 %v3645_v0  ;;  %3266 = vset.pattern.permute.xlu0 %v3645_v0  ;;  %s3156_s14 = sshll.u32 %s5275_s13, 3  ;;  %v600_v0 = vld [vmem:[%s5256_s3] sm:$0xff]  ;;  %s3157_s13 = sshll.u32 %s3713_s28, 3 }
  0x19   : > { %s3751_s17 = scalar_lea.vmem %s5266_s0, %s3156_s14  ;;  %v3811_v60 = vshrl.u32 %v1241_v57, 7  ;;  %s3824_s22 = scalar_lea.vmem %s5255_s2, %s3156_s14 }
  0x1a   : > { %v474_v1 = vld [vmem:[%s3751_s17 + $0x10] sm:$0xff]  ;;  %v472_v2 = vld [vmem:[%s3751_s17] sm:$0xff]  ;;  %v475_v3 = vld [vmem:[%s3751_s17 + $0x18] sm:$0xff]  ;;  %p330_p11 = scmp.lt.s32.totalorder %s3157_s13, 15 }
  0x1b   : > { %613 = vperm.xlu1 %3267, %v474_v1   ;;  %603 = vperm.xlu0 %3266, %v472_v2   ;;  %v473_v4 = vld [vmem:[%s3751_s17 + $0x8] sm:$0xff]  ;;  %v476_v6 = vld [vmem:[%s3751_s17 + $0x20] sm:$0xff]  ;;  %v479_v7 = vld [vmem:[%s3751_s17 + $0x38] sm:$0xff]  ;;  %v1375_v63 = vsub.s32 1, %v3811_v60  ;;  %v1243_v1 = vsub.s32 0, %v3811_v60 }
  0x1c   : > { %v477_v5 = vld [vmem:[%s3751_s17 + $0x28] sm:$0xff]  ;;  %v478_v8 = vld [vmem:[%s3751_s17 + $0x30] sm:$0xff]  ;;  %v480_v10 = vld [vmem:[%s3751_s17 + $0x40] sm:$0xff]  ;;  %s5277_s13 = smov (!%p330_p11, %s3157_s13), 15 }
  0x1d   : > { %v481_v9 = vld [vmem:[%s3751_s17 + $0x48] sm:$0xff]  ;;  %v483_v11 = vld [vmem:[%s3751_s17 + $0x58] sm:$0xff]  ;;  %v482_v12 = vld [vmem:[%s3751_s17 + $0x50] sm:$0xff]  ;;  %s3158_s16 = sshll.u32 %s5277_s13, 3 }
  0x1e   : > { %v485_v13 = vld [vmem:[%s3751_s17 + $0x68] sm:$0xff]  ;;  %v484_v14 = vld [vmem:[%s3751_s17 + $0x60] sm:$0xff]  ;;  %v487_v15 = vld [vmem:[%s3751_s17 + $0x78] sm:$0xff]  ;;  %s4309_s14 = scalar_lea.vmem %s5254_s1, %s3158_s16  ;;  %s4536_s16 = scalar_lea.vmem [#allocation4], %s3152_s8 }
  0x1f   : > { %618 = vperm.xlu1 %3267, %v475_v3   ;;  %608 = vperm.xlu0 %3266, %v473_v4   ;;  %v486_v16 = vld [vmem:[%s3751_s17 + $0x70] sm:$0xff]  ;;  %v489_v17 = vld [vmem:[%s3751_s17 + $0x88] sm:$0xff]  ;;  %v488_v18 = vld [vmem:[%s3751_s17 + $0x80] sm:$0xff]  ;;  %v3829_v4 = vrot.slane %v600_v0, %v1375_v63  ;;  %s3154_s8 = sshll.u32 %s3833_s23, 6 }
  0x20   : > { %v491_v19 = vld [vmem:[%s3751_s17 + $0x98] sm:$0xff]  ;;  %v490_v20 = vld [vmem:[%s3751_s17 + $0x90] sm:$0xff]  ;;  %v493_v21 = vld [vmem:[%s3751_s17 + $0xa8] sm:$0xff]  ;;  %s4851_s18 = scalar_lea.vmem [#allocation6], %s3154_s8  ;;  %s3647_s8 = smov [#allocation2]  }
  0x21   : > { %v492_v22 = vld [vmem:[%s3751_s17 + $0xa0] sm:$0xff]  ;;  %v495_v23 = vld [vmem:[%s3751_s17 + $0xb8] sm:$0xff]  ;;  %v494_v24 = vld [vmem:[%s3751_s17 + $0xb0] sm:$0xff] }
  0x22   : > { %v497_v25 = vld [vmem:[%s3751_s17 + $0xc8] sm:$0xff]  ;;  %v496_v26 = vld [vmem:[%s3751_s17 + $0xc0] sm:$0xff]  ;;  %v499_v27 = vld [vmem:[%s3751_s17 + $0xd8] sm:$0xff] }
  0x23   : > { %628 = vperm.xlu1 %3267, %v477_v5   ;;  %623 = vperm.xlu0 %3266, %v476_v6   ;;  %v498_v28 = vld [vmem:[%s3751_s17 + $0xd0] sm:$0xff]  ;;  %v501_v29 = vld [vmem:[%s3751_s17 + $0xe8] sm:$0xff]  ;;  %v500_v30 = vld [vmem:[%s3751_s17 + $0xe0] sm:$0xff] }
  0x24   : > { %v503_v31 = vld [vmem:[%s3751_s17 + $0xf8] sm:$0xff]  ;;  %v502_v32 = vld [vmem:[%s3751_s17 + $0xf0] sm:$0xff]  ;;  %v505_v33 = vld [vmem:[%s3751_s17 + $0x108] sm:$0xff] }
  0x25   : > { %v504_v34 = vld [vmem:[%s3751_s17 + $0x100] sm:$0xff]  ;;  %v507_v35 = vld [vmem:[%s3751_s17 + $0x118] sm:$0xff]  ;;  %v506_v36 = vld [vmem:[%s3751_s17 + $0x110] sm:$0xff] }
  0x26   : > { %v509_v37 = vld [vmem:[%s3751_s17 + $0x128] sm:$0xff]  ;;  %v508_v38 = vld [vmem:[%s3751_s17 + $0x120] sm:$0xff]  ;;  %v511_v39 = vld [vmem:[%s3751_s17 + $0x138] sm:$0xff] }
  0x27   : > { %638 = vperm.xlu1 %3267, %v479_v7   ;;  %633 = vperm.xlu0 %3266, %v478_v8   ;;  %v510_v40 = vld [vmem:[%s3751_s17 + $0x130] sm:$0xff]  ;;  %v513_v41 = vld [vmem:[%s3751_s17 + $0x148] sm:$0xff]  ;;  %v512_v42 = vld [vmem:[%s3751_s17 + $0x140] sm:$0xff]  ;;  %v3836_v7 = vrot.slane %v600_v0, %v1243_v1 }
  0x28   : > { %v515_v43 = vld [vmem:[%s3751_s17 + $0x158] sm:$0xff]  ;;  %v514_v44 = vld [vmem:[%s3751_s17 + $0x150] sm:$0xff]  ;;  %v517_v45 = vld [vmem:[%s3751_s17 + $0x168] sm:$0xff] }
  0x29   : > { %v516_v46 = vld [vmem:[%s3751_s17 + $0x160] sm:$0xff]  ;;  %v519_v47 = vld [vmem:[%s3751_s17 + $0x178] sm:$0xff]  ;;  %v518_v48 = vld [vmem:[%s3751_s17 + $0x170] sm:$0xff] }
  0x2a   : > { %v521_v49 = vld [vmem:[%s3751_s17 + $0x188] sm:$0xff]  ;;  %v520_v50 = vld [vmem:[%s3751_s17 + $0x180] sm:$0xff]  ;;  %v523_v51 = vld [vmem:[%s3751_s17 + $0x198] sm:$0xff] }
  0x2b   : > { %648 = vperm.xlu1 %3267, %v481_v9   ;;  %643 = vperm.xlu0 %3266, %v480_v10   ;;  %v522_v52 = vld [vmem:[%s3751_s17 + $0x190] sm:$0xff]  ;;  %v525_v53 = vld [vmem:[%s3751_s17 + $0x1a8] sm:$0xff]  ;;  %v524_v54 = vld [vmem:[%s3751_s17 + $0x1a0] sm:$0xff] }
  0x2c   : > { %v527_v55 = vld [vmem:[%s3751_s17 + $0x1b8] sm:$0xff]  ;;  %v526_v56 = vld [vmem:[%s3751_s17 + $0x1b0] sm:$0xff]  ;;  %v529_v58 = vld [vmem:[%s3751_s17 + $0x1c8] sm:$0xff] }
  0x2d   : > { %v528_v59 = vld [vmem:[%s3751_s17 + $0x1c0] sm:$0xff]  ;;  %v531_v61 = vld [vmem:[%s3751_s17 + $0x1d8] sm:$0xff]  ;;  %v530_v62 = vld [vmem:[%s3751_s17 + $0x1d0] sm:$0xff] }
  0x2e   : > { %v533_v2 = vld [vmem:[%s3751_s17 + $0x1e8] sm:$0xff]  ;;  %v532_v3 = vld [vmem:[%s3751_s17 + $0x1e0] sm:$0xff]  ;;  %v346_v5 = vld [vmem:[%s3824_s22 + $0x10] sm:$0xff] }
  0x2f   : > { %658 = vperm.xlu1 %3267, %v483_v11   ;;  %653 = vperm.xlu0 %3266, %v482_v12   ;;  %v344_v6 = vld [vmem:[%s3824_s22] sm:$0xff]  ;;  %v535_v8 = vld [vmem:[%s3751_s17 + $0x1f8] sm:$0xff]  ;;  %v534_v9 = vld [vmem:[%s3751_s17 + $0x1f0] sm:$0xff]  ;;  %v1379_v10 = vadd.f32 %v3829_v4, %v346_v5 }
  0x30   : > { %v1377_v11 = vadd.f32 %v3829_v4, %v344_v6  ;;  %v355_v63 = vld [vmem:[%s3824_s22 + $0x58] sm:$0xff]  ;;  %v354_v0 = vld [vmem:[%s3824_s22 + $0x50] sm:$0xff]  ;;  %v544_v5 = vld [vmem:[%s3751_s17 + $0x240] sm:$0xff] }
  0x33   : > { %668 = vperm.xlu1 %3267, %v485_v13   ;;  %663 = vperm.xlu0 %3266, %v484_v14   ;;  %v347_v14 = vld [vmem:[%s3824_s22 + $0x18] sm:$0xff] }
  0x37   : > { %678 = vperm.xlu1 %3267, %v487_v15   ;;  %673 = vperm.xlu0 %3266, %v486_v16   ;;  %v345_v15 = vld [vmem:[%s3824_s22 + $0x8] sm:$0xff] }
  0x3b   : > { %688 = vperm.xlu1 %3267, %v489_v17   ;;  %683 = vperm.xlu0 %3266, %v488_v18   ;;  %v537_v18 = vld [vmem:[%s3751_s17 + $0x208] sm:$0xff] }
  0x3f   : > { %698 = vperm.xlu1 %3267, %v491_v19   ;;  %693 = vperm.xlu0 %3266, %v490_v20   ;;  %v536_v19 = vld [vmem:[%s3751_s17 + $0x200] sm:$0xff] }
  0x43   : > { %708 = vperm.xlu1 %3267, %v493_v21   ;;  %703 = vperm.xlu0 %3266, %v492_v22   ;;  %v1380_v22 = vadd.f32 %v3829_v4, %v347_v14  ;;  %v356_v14 = vld [vmem:[%s3824_s22 + $0x60] sm:$0xff] }
  0x47   : > { %718 = vperm.xlu1 %3267, %v495_v23   ;;  %713 = vperm.xlu0 %3266, %v494_v24   ;;  %v1378_v23 = vadd.f32 %v3829_v4, %v345_v15 }
  0x4b   : > { %728 = vperm.xlu1 %3267, %v497_v25   ;;  %723 = vperm.xlu0 %3266, %v496_v26   ;;  %v349_v26 = vld [vmem:[%s3824_s22 + $0x28] sm:$0xff] }
  0x4f   : > { %738 = vperm.xlu1 %3267, %v499_v27   ;;  %733 = vperm.xlu0 %3266, %v498_v28   ;;  %v348_v27 = vld [vmem:[%s3824_s22 + $0x20] sm:$0xff] }
  0x53   : > { %748 = vperm.xlu1 %3267, %v501_v29   ;;  %743 = vperm.xlu0 %3266, %v500_v30   ;;  %v539_v30 = vld [vmem:[%s3751_s17 + $0x218] sm:$0xff] }
  0x57   : > { %758 = vperm.xlu1 %3267, %v503_v31   ;;  %753 = vperm.xlu0 %3266, %v502_v32   ;;  %v538_v31 = vld [vmem:[%s3751_s17 + $0x210] sm:$0xff] }
  0x5b   : > { %768 = vperm.xlu1 %3267, %v505_v33   ;;  %763 = vperm.xlu0 %3266, %v504_v34   ;;  %v1382_v34 = vadd.f32 %v3829_v4, %v349_v26  ;;  %v358_v26 = vld [vmem:[%s3824_s22 + $0x70] sm:$0xff] }
  0x5f   : > { %778 = vperm.xlu1 %3267, %v507_v35   ;;  %773 = vperm.xlu0 %3266, %v506_v36   ;;  %v1381_v35 = vadd.f32 %v3829_v4, %v348_v27 }
  0x63   : > { %788 = vperm.xlu1 %3267, %v509_v37   ;;  %783 = vperm.xlu0 %3266, %v508_v38   ;;  %v351_v38 = vld [vmem:[%s3824_s22 + $0x38] sm:$0xff] }
  0x67   : > { %798 = vperm.xlu1 %3267, %v511_v39   ;;  %793 = vperm.xlu0 %3266, %v510_v40   ;;  %v350_v39 = vld [vmem:[%s3824_s22 + $0x30] sm:$0xff] }
  0x6b   : > { %808 = vperm.xlu1 %3267, %v513_v41   ;;  %803 = vperm.xlu0 %3266, %v512_v42   ;;  %v541_v42 = vld [vmem:[%s3751_s17 + $0x228] sm:$0xff] }
  0x6f   : > { %818 = vperm.xlu1 %3267, %v515_v43   ;;  %813 = vperm.xlu0 %3266, %v514_v44   ;;  %v540_v43 = vld [vmem:[%s3751_s17 + $0x220] sm:$0xff] }
  0x73   : > { %828 = vperm.xlu1 %3267, %v517_v45   ;;  %823 = vperm.xlu0 %3266, %v516_v46   ;;  %v1384_v46 = vadd.f32 %v3829_v4, %v351_v38  ;;  %v360_v38 = vld [vmem:[%s3824_s22 + $0x80] sm:$0xff] }
  0x77   : > { %838 = vperm.xlu1 %3267, %v519_v47   ;;  %833 = vperm.xlu0 %3266, %v518_v48   ;;  %v1383_v47 = vadd.f32 %v3829_v4, %v350_v39 }
  0x7b   : > { %848 = vperm.xlu1 %3267, %v521_v49   ;;  %843 = vperm.xlu0 %3266, %v520_v50   ;;  %v353_v50 = vld [vmem:[%s3824_s22 + $0x48] sm:$0xff] }
  0x7f   : > { %858 = vperm.xlu1 %3267, %v523_v51   ;;  %853 = vperm.xlu0 %3266, %v522_v52   ;;  %v352_v51 = vld [vmem:[%s3824_s22 + $0x40] sm:$0xff] }
  0x83   : > { %868 = vperm.xlu1 %3267, %v525_v53   ;;  %863 = vperm.xlu0 %3266, %v524_v54   ;;  %v543_v54 = vld [vmem:[%s3751_s17 + $0x238] sm:$0xff] }
  0x87   : > { %878 = vperm.xlu1 %3267, %v527_v55   ;;  %873 = vperm.xlu0 %3266, %v526_v56   ;;  %v542_v55 = vld [vmem:[%s3751_s17 + $0x230] sm:$0xff] }
  0x8b   : > { %888 = vperm.xlu1 %3267, %v529_v58   ;;  %883 = vperm.xlu0 %3266, %v528_v59   ;;  %v1386_v58 = vadd.f32 %v3829_v4, %v353_v50  ;;  %v1385_v59 = vadd.f32 %v3829_v4, %v352_v51  ;;  %v362_v50 = vld [vmem:[%s3824_s22 + $0x90] sm:$0xff] }
  0x8f   : > { %898 = vperm.xlu1 %3267, %v531_v61   ;;  %893 = vperm.xlu0 %3266, %v530_v62  }
  0x93   : > { %908 = vperm.xlu1 %3267, %v533_v2   ;;  %903 = vperm.xlu0 %3266, %v532_v3   ;;  %v545_v3 = vld [vmem:[%s3751_s17 + $0x248] sm:$0xff] }
  0x96   : > { %v614_v12 = vpop.permute.xlu1 %613  ;;  %v604_v13 = vpop.permute.xlu0 %603 }
  0x97   : > { %v1247_v16 = vmul.f32 %v3836_v7, %v614_v12  ;;  %v1245_v17 = vmul.f32 %v3836_v7, %v604_v13  ;;  %918 = vperm.xlu1 %3267, %v535_v8   ;;  %913 = vperm.xlu0 %3266, %v534_v9   ;;  %v1388_v9 = vadd.f32 %v3829_v4, %v355_v63  ;;  %v357_v13 = vld [vmem:[%s3824_s22 + $0x68] sm:$0xff]  ;;  %v364_v63 = vld [vmem:[%s3824_s22 + $0xa0] sm:$0xff] }
  0x99   : > { %v1507_v20 = vadd.f32 %v1379_v10, %v1247_v16  ;;  %v1505_v21 = vadd.f32 %v1377_v11, %v1245_v17  ;;  %v1387_v10 = vadd.f32 %v3829_v4, %v354_v0  ;;  %v547_v17 = vld [vmem:[%s3751_s17 + $0x258] sm:$0xff] }
  0x9a   : > { %v619_v24 = vpop.permute.xlu1 %618  ;;  %v609_v25 = vpop.permute.xlu0 %608 }
  0x9b   : > { %1635 = vst [vmem:[%s3855_s9 + $0x10] sm:$0xff] %v1507_v20  ;;  %1633 = vst [vmem:[%s3855_s9] sm:$0xff] %v1505_v21  ;;  %v1248_v28 = vmul.f32 %v3836_v7, %v619_v24  ;;  %v1246_v29 = vmul.f32 %v3836_v7, %v609_v25  ;;  %928 = vperm.xlu1 %3267, %v537_v18   ;;  %923 = vperm.xlu0 %3266, %v536_v19   ;;  %v546_v18 = vld [vmem:[%s3751_s17 + $0x250] sm:$0xff]  ;;  %v359_v25 = vld [vmem:[%s3824_s22 + $0x78] sm:$0xff] }
  0x9c   : > { %v1390_v21 = vadd.f32 %v3829_v4, %v357_v13  ;;  %v366_v13 = vld [vmem:[%s3824_s22 + $0xb0] sm:$0xff] }
  0x9d   : > { %v1508_v32 = vadd.f32 %v1380_v22, %v1248_v28  ;;  %v1506_v33 = vadd.f32 %v1378_v23, %v1246_v29  ;;  %v1389_v22 = vadd.f32 %v3829_v4, %v356_v14  ;;  %v549_v29 = vld [vmem:[%s3751_s17 + $0x268] sm:$0xff] }
  0x9e   : > { %v629_v36 = vpop.permute.xlu1 %628  ;;  %v624_v37 = vpop.permute.xlu0 %623 }
  0x9f   : > { %1636 = vst [vmem:[%s3855_s9 + $0x18] sm:$0xff] %v1508_v32  ;;  %1634 = vst [vmem:[%s3855_s9 + $0x8] sm:$0xff] %v1506_v33  ;;  %v1250_v40 = vmul.f32 %v3836_v7, %v629_v36  ;;  %v1249_v41 = vmul.f32 %v3836_v7, %v624_v37  ;;  %938 = vperm.xlu1 %3267, %v539_v30   ;;  %933 = vperm.xlu0 %3266, %v538_v31   ;;  %v548_v30 = vld [vmem:[%s3751_s17 + $0x260] sm:$0xff]  ;;  %v361_v37 = vld [vmem:[%s3824_s22 + $0x88] sm:$0xff] }
  0xa0   : > { %v1392_v33 = vadd.f32 %v3829_v4, %v359_v25  ;;  %v368_v25 = vld [vmem:[%s3824_s22 + $0xc0] sm:$0xff] }
  0xa1   : > { %v1510_v44 = vadd.f32 %v1382_v34, %v1250_v40  ;;  %v1509_v45 = vadd.f32 %v1381_v35, %v1249_v41  ;;  %v1391_v34 = vadd.f32 %v3829_v4, %v358_v26  ;;  %v551_v41 = vld [vmem:[%s3751_s17 + $0x278] sm:$0xff] }
  0xa2   : > { %v639_v48 = vpop.permute.xlu1 %638  ;;  %v634_v49 = vpop.permute.xlu0 %633 }
  0xa3   : > { %1638 = vst [vmem:[%s3855_s9 + $0x28] sm:$0xff] %v1510_v44  ;;  %1637 = vst [vmem:[%s3855_s9 + $0x20] sm:$0xff] %v1509_v45  ;;  %v1252_v52 = vmul.f32 %v3836_v7, %v639_v48  ;;  %v1251_v53 = vmul.f32 %v3836_v7, %v634_v49  ;;  %948 = vperm.xlu1 %3267, %v541_v42   ;;  %943 = vperm.xlu0 %3266, %v540_v43   ;;  %v550_v42 = vld [vmem:[%s3751_s17 + $0x270] sm:$0xff]  ;;  %v363_v49 = vld [vmem:[%s3824_s22 + $0x98] sm:$0xff] }
  0xa4   : > { %v1394_v45 = vadd.f32 %v3829_v4, %v361_v37  ;;  %v370_v37 = vld [vmem:[%s3824_s22 + $0xd0] sm:$0xff] }
  0xa5   : > { %v1512_v56 = vadd.f32 %v1384_v46, %v1252_v52  ;;  %v1511_v57 = vadd.f32 %v1383_v47, %v1251_v53  ;;  %v1393_v46 = vadd.f32 %v3829_v4, %v360_v38  ;;  %v553_v53 = vld [vmem:[%s3751_s17 + $0x288] sm:$0xff] }
  0xa6   : > { %v649_v61 = vpop.permute.xlu1 %648  ;;  %v644_v62 = vpop.permute.xlu0 %643 }
  0xa7   : > { %1640 = vst [vmem:[%s3855_s9 + $0x38] sm:$0xff] %v1512_v56  ;;  %1639 = vst [vmem:[%s3855_s9 + $0x30] sm:$0xff] %v1511_v57  ;;  %v1254_v1 = vmul.f32 %v3836_v7, %v649_v61  ;;  %v1253_v2 = vmul.f32 %v3836_v7, %v644_v62  ;;  %958 = vperm.xlu1 %3267, %v543_v54   ;;  %953 = vperm.xlu0 %3266, %v542_v55   ;;  %v552_v54 = vld [vmem:[%s3751_s17 + $0x280] sm:$0xff]  ;;  %v365_v62 = vld [vmem:[%s3824_s22 + $0xa8] sm:$0xff] }
  0xa8   : > { %v1396_v57 = vadd.f32 %v3829_v4, %v363_v49  ;;  %v372_v49 = vld [vmem:[%s3824_s22 + $0xe0] sm:$0xff] }
  0xa9   : > { %v1514_v6 = vadd.f32 %v1386_v58, %v1254_v1  ;;  %v1513_v8 = vadd.f32 %v1385_v59, %v1253_v2  ;;  %v1395_v58 = vadd.f32 %v3829_v4, %v362_v50  ;;  %v555_v2 = vld [vmem:[%s3751_s17 + $0x298] sm:$0xff] }
  0xaa   : > { %v659_v11 = vpop.permute.xlu1 %658  ;;  %v654_v12 = vpop.permute.xlu0 %653 }
  0xab   : > { %1642 = vst [vmem:[%s3855_s9 + $0x48] sm:$0xff] %v1514_v6  ;;  %1641 = vst [vmem:[%s3855_s9 + $0x40] sm:$0xff] %v1513_v8  ;;  %v1256_v15 = vmul.f32 %v3836_v7, %v659_v11  ;;  %v1255_v16 = vmul.f32 %v3836_v7, %v654_v12  ;;  %968 = vperm.xlu1 %3267, %v545_v3   ;;  %963 = vperm.xlu0 %3266, %v544_v5   ;;  %v554_v3 = vld [vmem:[%s3751_s17 + $0x290] sm:$0xff]  ;;  %v367_v12 = vld [vmem:[%s3824_s22 + $0xb8] sm:$0xff] }
  0xac   : > { %v1398_v8 = vadd.f32 %v3829_v4, %v365_v62  ;;  %v374_v62 = vld [vmem:[%s3824_s22 + $0xf0] sm:$0xff] }
  0xad   : > { %v1516_v19 = vadd.f32 %v1388_v9, %v1256_v15  ;;  %v1515_v20 = vadd.f32 %v1387_v10, %v1255_v16  ;;  %v1397_v9 = vadd.f32 %v3829_v4, %v364_v63  ;;  %v557_v16 = vld [vmem:[%s3751_s17 + $0x2a8] sm:$0xff] }
  0xae   : > { %v669_v23 = vpop.permute.xlu1 %668  ;;  %v664_v24 = vpop.permute.xlu0 %663 }
  0xaf   : > { %1644 = vst [vmem:[%s3855_s9 + $0x58] sm:$0xff] %v1516_v19  ;;  %1643 = vst [vmem:[%s3855_s9 + $0x50] sm:$0xff] %v1515_v20  ;;  %v1258_v27 = vmul.f32 %v3836_v7, %v669_v23  ;;  %v1257_v28 = vmul.f32 %v3836_v7, %v664_v24  ;;  %978 = vperm.xlu1 %3267, %v547_v17   ;;  %973 = vperm.xlu0 %3266, %v546_v18   ;;  %v556_v17 = vld [vmem:[%s3751_s17 + $0x2a0] sm:$0xff]  ;;  %v369_v24 = vld [vmem:[%s3824_s22 + $0xc8] sm:$0xff] }
  0xb0   : > { %v1400_v20 = vadd.f32 %v3829_v4, %v367_v12  ;;  %v376_v12 = vld [vmem:[%s3824_s22 + $0x100] sm:$0xff] }
  0xb1   : > { %v1518_v31 = vadd.f32 %v1390_v21, %v1258_v27  ;;  %v1517_v32 = vadd.f32 %v1389_v22, %v1257_v28  ;;  %v1399_v21 = vadd.f32 %v3829_v4, %v366_v13  ;;  %v559_v28 = vld [vmem:[%s3751_s17 + $0x2b8] sm:$0xff] }
  0xb2   : > { %v679_v35 = vpop.permute.xlu1 %678  ;;  %v674_v36 = vpop.permute.xlu0 %673 }
  0xb3   : > { %1646 = vst [vmem:[%s3855_s9 + $0x68] sm:$0xff] %v1518_v31  ;;  %1645 = vst [vmem:[%s3855_s9 + $0x60] sm:$0xff] %v1517_v32  ;;  %v1260_v39 = vmul.f32 %v3836_v7, %v679_v35  ;;  %v1259_v40 = vmul.f32 %v3836_v7, %v674_v36  ;;  %988 = vperm.xlu1 %3267, %v549_v29   ;;  %983 = vperm.xlu0 %3266, %v548_v30   ;;  %v558_v29 = vld [vmem:[%s3751_s17 + $0x2b0] sm:$0xff]  ;;  %v371_v36 = vld [vmem:[%s3824_s22 + $0xd8] sm:$0xff] }
  0xb4   : > { %v1402_v32 = vadd.f32 %v3829_v4, %v369_v24  ;;  %v378_v24 = vld [vmem:[%s3824_s22 + $0x110] sm:$0xff] }
  0xb5   : > { %v1520_v43 = vadd.f32 %v1392_v33, %v1260_v39  ;;  %v1519_v44 = vadd.f32 %v1391_v34, %v1259_v40  ;;  %v1401_v33 = vadd.f32 %v3829_v4, %v368_v25  ;;  %v561_v40 = vld [vmem:[%s3751_s17 + $0x2c8] sm:$0xff] }
  0xb6   : > { %v689_v47 = vpop.permute.xlu1 %688  ;;  %v684_v48 = vpop.permute.xlu0 %683 }
  0xb7   : > { %1648 = vst [vmem:[%s3855_s9 + $0x78] sm:$0xff] %v1520_v43  ;;  %1647 = vst [vmem:[%s3855_s9 + $0x70] sm:$0xff] %v1519_v44  ;;  %v1262_v51 = vmul.f32 %v3836_v7, %v689_v47  ;;  %v1261_v52 = vmul.f32 %v3836_v7, %v684_v48  ;;  %998 = vperm.xlu1 %3267, %v551_v41   ;;  %993 = vperm.xlu0 %3266, %v550_v42   ;;  %v560_v41 = vld [vmem:[%s3751_s17 + $0x2c0] sm:$0xff]  ;;  %v373_v48 = vld [vmem:[%s3824_s22 + $0xe8] sm:$0xff] }
  0xb8   : > { %v1404_v44 = vadd.f32 %v3829_v4, %v371_v36  ;;  %v380_v36 = vld [vmem:[%s3824_s22 + $0x120] sm:$0xff] }
  0xb9   : > { %v1522_v55 = vadd.f32 %v1394_v45, %v1262_v51  ;;  %v1521_v56 = vadd.f32 %v1393_v46, %v1261_v52  ;;  %v1403_v45 = vadd.f32 %v3829_v4, %v370_v37  ;;  %v563_v52 = vld [vmem:[%s3751_s17 + $0x2d8] sm:$0xff] }
  0xba   : > { %v699_v59 = vpop.permute.xlu1 %698  ;;  %v694_v61 = vpop.permute.xlu0 %693 }
  0xbb   : > { %1650 = vst [vmem:[%s3855_s9 + $0x88] sm:$0xff] %v1522_v55  ;;  %1649 = vst [vmem:[%s3855_s9 + $0x80] sm:$0xff] %v1521_v56  ;;  %v1264_v0 = vmul.f32 %v3836_v7, %v699_v59  ;;  %v1263_v1 = vmul.f32 %v3836_v7, %v694_v61  ;;  %1008 = vperm.xlu1 %3267, %v553_v53   ;;  %1003 = vperm.xlu0 %3266, %v552_v54   ;;  %v562_v53 = vld [vmem:[%s3751_s17 + $0x2d0] sm:$0xff]  ;;  %v375_v61 = vld [vmem:[%s3824_s22 + $0xf8] sm:$0xff] }
  0xbc   : > { %v1406_v56 = vadd.f32 %v3829_v4, %v373_v48  ;;  %v382_v48 = vld [vmem:[%s3824_s22 + $0x130] sm:$0xff] }
  0xbd   : > { %v1524_v5 = vadd.f32 %v1396_v57, %v1264_v0  ;;  %v1523_v6 = vadd.f32 %v1395_v58, %v1263_v1  ;;  %v1405_v57 = vadd.f32 %v3829_v4, %v372_v49  ;;  %v565_v1 = vld [vmem:[%s3751_s17 + $0x2e8] sm:$0xff] }
  0xbe   : > { %v709_v10 = vpop.permute.xlu1 %708  ;;  %v704_v11 = vpop.permute.xlu0 %703 }
  0xbf   : > { %1652 = vst [vmem:[%s3855_s9 + $0x98] sm:$0xff] %v1524_v5  ;;  %1651 = vst [vmem:[%s3855_s9 + $0x90] sm:$0xff] %v1523_v6  ;;  %v1266_v14 = vmul.f32 %v3836_v7, %v709_v10  ;;  %v1265_v15 = vmul.f32 %v3836_v7, %v704_v11  ;;  %1018 = vperm.xlu1 %3267, %v555_v2   ;;  %1013 = vperm.xlu0 %3266, %v554_v3   ;;  %v564_v2 = vld [vmem:[%s3751_s17 + $0x2e0] sm:$0xff]  ;;  %v377_v11 = vld [vmem:[%s3824_s22 + $0x108] sm:$0xff] }
  0xc0   : > { %v1408_v6 = vadd.f32 %v3829_v4, %v375_v61  ;;  %v384_v61 = vld [vmem:[%s3824_s22 + $0x140] sm:$0xff] }
  0xc1   : > { %v1526_v18 = vadd.f32 %v1398_v8, %v1266_v14  ;;  %v1525_v19 = vadd.f32 %v1397_v9, %v1265_v15  ;;  %v1407_v8 = vadd.f32 %v3829_v4, %v374_v62  ;;  %v567_v15 = vld [vmem:[%s3751_s17 + $0x2f8] sm:$0xff] }
  0xc2   : > { %v719_v22 = vpop.permute.xlu1 %718  ;;  %v714_v23 = vpop.permute.xlu0 %713 }
  0xc3   : > { %1654 = vst [vmem:[%s3855_s9 + $0xa8] sm:$0xff] %v1526_v18  ;;  %1653 = vst [vmem:[%s3855_s9 + $0xa0] sm:$0xff] %v1525_v19  ;;  %v1268_v26 = vmul.f32 %v3836_v7, %v719_v22  ;;  %v1267_v27 = vmul.f32 %v3836_v7, %v714_v23  ;;  %1028 = vperm.xlu1 %3267, %v557_v16   ;;  %1023 = vperm.xlu0 %3266, %v556_v17   ;;  %v566_v16 = vld [vmem:[%s3751_s17 + $0x2f0] sm:$0xff]  ;;  %v379_v23 = vld [vmem:[%s3824_s22 + $0x118] sm:$0xff] }
  0xc4   : > { %v1410_v19 = vadd.f32 %v3829_v4, %v377_v11  ;;  %v386_v11 = vld [vmem:[%s3824_s22 + $0x150] sm:$0xff] }
  0xc5   : > { %v1528_v30 = vadd.f32 %v1400_v20, %v1268_v26  ;;  %v1527_v31 = vadd.f32 %v1399_v21, %v1267_v27  ;;  %v1409_v20 = vadd.f32 %v3829_v4, %v376_v12  ;;  %v569_v27 = vld [vmem:[%s3751_s17 + $0x308] sm:$0xff] }
  0xc6   : > { %v729_v34 = vpop.permute.xlu1 %728  ;;  %v724_v35 = vpop.permute.xlu0 %723 }
  0xc7   : > { %1656 = vst [vmem:[%s3855_s9 + $0xb8] sm:$0xff] %v1528_v30  ;;  %1655 = vst [vmem:[%s3855_s9 + $0xb0] sm:$0xff] %v1527_v31  ;;  %v1270_v38 = vmul.f32 %v3836_v7, %v729_v34  ;;  %v1269_v39 = vmul.f32 %v3836_v7, %v724_v35  ;;  %1038 = vperm.xlu1 %3267, %v559_v28   ;;  %1033 = vperm.xlu0 %3266, %v558_v29   ;;  %v568_v28 = vld [vmem:[%s3751_s17 + $0x300] sm:$0xff]  ;;  %v381_v35 = vld [vmem:[%s3824_s22 + $0x128] sm:$0xff] }
  0xc8   : > { %v1412_v31 = vadd.f32 %v3829_v4, %v379_v23  ;;  %v388_v23 = vld [vmem:[%s3824_s22 + $0x160] sm:$0xff] }
  0xc9   : > { %v1530_v42 = vadd.f32 %v1402_v32, %v1270_v38  ;;  %v1529_v43 = vadd.f32 %v1401_v33, %v1269_v39  ;;  %v1411_v32 = vadd.f32 %v3829_v4, %v378_v24  ;;  %v571_v39 = vld [vmem:[%s3751_s17 + $0x318] sm:$0xff] }
  0xca   : > { %v739_v46 = vpop.permute.xlu1 %738  ;;  %v734_v47 = vpop.permute.xlu0 %733 }
  0xcb   : > { %1658 = vst [vmem:[%s3855_s9 + $0xc8] sm:$0xff] %v1530_v42  ;;  %1657 = vst [vmem:[%s3855_s9 + $0xc0] sm:$0xff] %v1529_v43  ;;  %v1272_v50 = vmul.f32 %v3836_v7, %v739_v46  ;;  %v1271_v51 = vmul.f32 %v3836_v7, %v734_v47  ;;  %1048 = vperm.xlu1 %3267, %v561_v40   ;;  %1043 = vperm.xlu0 %3266, %v560_v41   ;;  %v570_v40 = vld [vmem:[%s3751_s17 + $0x310] sm:$0xff]  ;;  %v383_v47 = vld [vmem:[%s3824_s22 + $0x138] sm:$0xff] }
  0xcc   : > { %v1414_v43 = vadd.f32 %v3829_v4, %v381_v35  ;;  %v390_v35 = vld [vmem:[%s3824_s22 + $0x170] sm:$0xff] }
  0xcd   : > { %v1532_v54 = vadd.f32 %v1404_v44, %v1272_v50  ;;  %v1531_v55 = vadd.f32 %v1403_v45, %v1271_v51  ;;  %v1413_v44 = vadd.f32 %v3829_v4, %v380_v36  ;;  %v573_v51 = vld [vmem:[%s3751_s17 + $0x328] sm:$0xff] }
  0xce   : > { %v749_v58 = vpop.permute.xlu1 %748  ;;  %v744_v59 = vpop.permute.xlu0 %743 }
  0xcf   : > { %1660 = vst [vmem:[%s3855_s9 + $0xd8] sm:$0xff] %v1532_v54  ;;  %1659 = vst [vmem:[%s3855_s9 + $0xd0] sm:$0xff] %v1531_v55  ;;  %v1274_v63 = vmul.f32 %v3836_v7, %v749_v58  ;;  %v1273_v0 = vmul.f32 %v3836_v7, %v744_v59  ;;  %1058 = vperm.xlu1 %3267, %v563_v52   ;;  %1053 = vperm.xlu0 %3266, %v562_v53   ;;  %v572_v52 = vld [vmem:[%s3751_s17 + $0x320] sm:$0xff]  ;;  %v385_v59 = vld [vmem:[%s3824_s22 + $0x148] sm:$0xff] }
  0xd0   : > { %v1416_v55 = vadd.f32 %v3829_v4, %v383_v47  ;;  %v392_v47 = vld [vmem:[%s3824_s22 + $0x180] sm:$0xff] }
  0xd1   : > { %v1534_v3 = vadd.f32 %v1406_v56, %v1274_v63  ;;  %v1533_v5 = vadd.f32 %v1405_v57, %v1273_v0  ;;  %v1415_v56 = vadd.f32 %v3829_v4, %v382_v48  ;;  %v575_v0 = vld [vmem:[%s3751_s17 + $0x338] sm:$0xff] }
  0xd2   : > { %v759_v9 = vpop.permute.xlu1 %758  ;;  %v754_v10 = vpop.permute.xlu0 %753 }
  0xd3   : > { %1662 = vst [vmem:[%s3855_s9 + $0xe8] sm:$0xff] %v1534_v3  ;;  %1661 = vst [vmem:[%s3855_s9 + $0xe0] sm:$0xff] %v1533_v5  ;;  %v1276_v13 = vmul.f32 %v3836_v7, %v759_v9  ;;  %v1275_v14 = vmul.f32 %v3836_v7, %v754_v10  ;;  %1068 = vperm.xlu1 %3267, %v565_v1   ;;  %1063 = vperm.xlu0 %3266, %v564_v2   ;;  %v574_v1 = vld [vmem:[%s3751_s17 + $0x330] sm:$0xff]  ;;  %v387_v10 = vld [vmem:[%s3824_s22 + $0x158] sm:$0xff] }
  0xd4   : > { %v1418_v5 = vadd.f32 %v3829_v4, %v385_v59  ;;  %v394_v59 = vld [vmem:[%s3824_s22 + $0x190] sm:$0xff] }
  0xd5   : > { %v1536_v17 = vadd.f32 %v1408_v6, %v1276_v13  ;;  %v1535_v18 = vadd.f32 %v1407_v8, %v1275_v14  ;;  %v1417_v6 = vadd.f32 %v3829_v4, %v384_v61  ;;  %v577_v14 = vld [vmem:[%s3751_s17 + $0x348] sm:$0xff] }
  0xd6   : > { %v769_v21 = vpop.permute.xlu1 %768  ;;  %v764_v22 = vpop.permute.xlu0 %763 }
  0xd7   : > { %1664 = vst [vmem:[%s3855_s9 + $0xf8] sm:$0xff] %v1536_v17  ;;  %1663 = vst [vmem:[%s3855_s9 + $0xf0] sm:$0xff] %v1535_v18  ;;  %v1278_v25 = vmul.f32 %v3836_v7, %v769_v21  ;;  %v1277_v26 = vmul.f32 %v3836_v7, %v764_v22  ;;  %1078 = vperm.xlu1 %3267, %v567_v15   ;;  %1073 = vperm.xlu0 %3266, %v566_v16   ;;  %v576_v15 = vld [vmem:[%s3751_s17 + $0x340] sm:$0xff]  ;;  %v389_v22 = vld [vmem:[%s3824_s22 + $0x168] sm:$0xff] }
  0xd8   : > { %v1420_v18 = vadd.f32 %v3829_v4, %v387_v10  ;;  %v396_v10 = vld [vmem:[%s3824_s22 + $0x1a0] sm:$0xff] }
  0xd9   : > { %v1538_v29 = vadd.f32 %v1410_v19, %v1278_v25  ;;  %v1537_v30 = vadd.f32 %v1409_v20, %v1277_v26  ;;  %v1419_v19 = vadd.f32 %v3829_v4, %v386_v11  ;;  %v579_v26 = vld [vmem:[%s3751_s17 + $0x358] sm:$0xff] }
  0xda   : > { %v779_v33 = vpop.permute.xlu1 %778  ;;  %v774_v34 = vpop.permute.xlu0 %773 }
  0xdb   : > { %1666 = vst [vmem:[%s3855_s9 + $0x108] sm:$0xff] %v1538_v29  ;;  %1665 = vst [vmem:[%s3855_s9 + $0x100] sm:$0xff] %v1537_v30  ;;  %v1280_v37 = vmul.f32 %v3836_v7, %v779_v33  ;;  %v1279_v38 = vmul.f32 %v3836_v7, %v774_v34  ;;  %1088 = vperm.xlu1 %3267, %v569_v27   ;;  %1083 = vperm.xlu0 %3266, %v568_v28   ;;  %v578_v27 = vld [vmem:[%s3751_s17 + $0x350] sm:$0xff]  ;;  %v391_v34 = vld [vmem:[%s3824_s22 + $0x178] sm:$0xff] }
  0xdc   : > { %v1422_v30 = vadd.f32 %v3829_v4, %v389_v22  ;;  %v398_v22 = vld [vmem:[%s3824_s22 + $0x1b0] sm:$0xff] }
  0xdd   : > { %v1540_v41 = vadd.f32 %v1412_v31, %v1280_v37  ;;  %v1539_v42 = vadd.f32 %v1411_v32, %v1279_v38  ;;  %v1421_v31 = vadd.f32 %v3829_v4, %v388_v23  ;;  %v581_v38 = vld [vmem:[%s3751_s17 + $0x368] sm:$0xff] }
  0xde   : > { %v789_v45 = vpop.permute.xlu1 %788  ;;  %v784_v46 = vpop.permute.xlu0 %783 }
  0xdf   : > { %1668 = vst [vmem:[%s3855_s9 + $0x118] sm:$0xff] %v1540_v41  ;;  %1667 = vst [vmem:[%s3855_s9 + $0x110] sm:$0xff] %v1539_v42  ;;  %v1282_v49 = vmul.f32 %v3836_v7, %v789_v45  ;;  %v1281_v50 = vmul.f32 %v3836_v7, %v784_v46  ;;  %1098 = vperm.xlu1 %3267, %v571_v39   ;;  %1093 = vperm.xlu0 %3266, %v570_v40   ;;  %v580_v39 = vld [vmem:[%s3751_s17 + $0x360] sm:$0xff]  ;;  %v393_v46 = vld [vmem:[%s3824_s22 + $0x188] sm:$0xff] }
  0xe0   : > { %v1424_v42 = vadd.f32 %v3829_v4, %v391_v34  ;;  %v400_v34 = vld [vmem:[%s3824_s22 + $0x1c0] sm:$0xff] }
  0xe1   : > { %v1542_v53 = vadd.f32 %v1414_v43, %v1282_v49  ;;  %v1541_v54 = vadd.f32 %v1413_v44, %v1281_v50  ;;  %v1423_v43 = vadd.f32 %v3829_v4, %v390_v35  ;;  %v583_v50 = vld [vmem:[%s3751_s17 + $0x378] sm:$0xff] }
  0xe2   : > { %v799_v57 = vpop.permute.xlu1 %798  ;;  %v794_v58 = vpop.permute.xlu0 %793 }
  0xe3   : > { %1670 = vst [vmem:[%s3855_s9 + $0x128] sm:$0xff] %v1542_v53  ;;  %1669 = vst [vmem:[%s3855_s9 + $0x120] sm:$0xff] %v1541_v54  ;;  %v1284_v62 = vmul.f32 %v3836_v7, %v799_v57  ;;  %v1283_v63 = vmul.f32 %v3836_v7, %v794_v58  ;;  %1108 = vperm.xlu1 %3267, %v573_v51   ;;  %1103 = vperm.xlu0 %3266, %v572_v52   ;;  %v582_v51 = vld [vmem:[%s3751_s17 + $0x370] sm:$0xff]  ;;  %v395_v58 = vld [vmem:[%s3824_s22 + $0x198] sm:$0xff] }
  0xe4   : > { %v1426_v54 = vadd.f32 %v3829_v4, %v393_v46  ;;  %v402_v46 = vld [vmem:[%s3824_s22 + $0x1d0] sm:$0xff] }
  0xe5   : > { %v1544_v2 = vadd.f32 %v1416_v55, %v1284_v62  ;;  %v1543_v3 = vadd.f32 %v1415_v56, %v1283_v63  ;;  %v1425_v55 = vadd.f32 %v3829_v4, %v392_v47  ;;  %v585_v63 = vld [vmem:[%s3751_s17 + $0x388] sm:$0xff] }
  0xe6   : > { %v809_v8 = vpop.permute.xlu1 %808  ;;  %v804_v9 = vpop.permute.xlu0 %803 }
  0xe7   : > { %1672 = vst [vmem:[%s3855_s9 + $0x138] sm:$0xff] %v1544_v2  ;;  %1671 = vst [vmem:[%s3855_s9 + $0x130] sm:$0xff] %v1543_v3  ;;  %v1286_v12 = vmul.f32 %v3836_v7, %v809_v8  ;;  %v1285_v13 = vmul.f32 %v3836_v7, %v804_v9  ;;  %1118 = vperm.xlu1 %3267, %v575_v0   ;;  %1113 = vperm.xlu0 %3266, %v574_v1   ;;  %v584_v0 = vld [vmem:[%s3751_s17 + $0x380] sm:$0xff]  ;;  %v397_v9 = vld [vmem:[%s3824_s22 + $0x1a8] sm:$0xff] }
  0xe8   : > { %v1428_v3 = vadd.f32 %v3829_v4, %v395_v58  ;;  %v404_v58 = vld [vmem:[%s3824_s22 + $0x1e0] sm:$0xff] }
  0xe9   : > { %v1546_v16 = vadd.f32 %v1418_v5, %v1286_v12  ;;  %v1545_v17 = vadd.f32 %v1417_v6, %v1285_v13  ;;  %v1427_v5 = vadd.f32 %v3829_v4, %v394_v59  ;;  %v587_v13 = vld [vmem:[%s3751_s17 + $0x398] sm:$0xff] }
  0xea   : > { %v819_v20 = vpop.permute.xlu1 %818  ;;  %v814_v21 = vpop.permute.xlu0 %813 }
  0xeb   : > { %1674 = vst [vmem:[%s3855_s9 + $0x148] sm:$0xff] %v1546_v16  ;;  %1673 = vst [vmem:[%s3855_s9 + $0x140] sm:$0xff] %v1545_v17  ;;  %v1288_v24 = vmul.f32 %v3836_v7, %v819_v20  ;;  %v1287_v25 = vmul.f32 %v3836_v7, %v814_v21  ;;  %1128 = vperm.xlu1 %3267, %v577_v14   ;;  %1123 = vperm.xlu0 %3266, %v576_v15   ;;  %v586_v14 = vld [vmem:[%s3751_s17 + $0x390] sm:$0xff]  ;;  %v399_v21 = vld [vmem:[%s3824_s22 + $0x1b8] sm:$0xff] }
  0xec   : > { %v1430_v17 = vadd.f32 %v3829_v4, %v397_v9  ;;  %v406_v9 = vld [vmem:[%s3824_s22 + $0x1f0] sm:$0xff] }
  0xed   : > { %v1548_v28 = vadd.f32 %v1420_v18, %v1288_v24  ;;  %v1547_v29 = vadd.f32 %v1419_v19, %v1287_v25  ;;  %v1429_v18 = vadd.f32 %v3829_v4, %v396_v10  ;;  %v589_v25 = vld [vmem:[%s3751_s17 + $0x3a8] sm:$0xff] }
  0xee   : > { %v829_v32 = vpop.permute.xlu1 %828  ;;  %v824_v33 = vpop.permute.xlu0 %823 }
  0xef   : > { %1676 = vst [vmem:[%s3855_s9 + $0x158] sm:$0xff] %v1548_v28  ;;  %1675 = vst [vmem:[%s3855_s9 + $0x150] sm:$0xff] %v1547_v29  ;;  %v1290_v36 = vmul.f32 %v3836_v7, %v829_v32  ;;  %v1289_v37 = vmul.f32 %v3836_v7, %v824_v33  ;;  %1138 = vperm.xlu1 %3267, %v579_v26   ;;  %1133 = vperm.xlu0 %3266, %v578_v27   ;;  %v588_v26 = vld [vmem:[%s3751_s17 + $0x3a0] sm:$0xff]  ;;  %v401_v33 = vld [vmem:[%s3824_s22 + $0x1c8] sm:$0xff] }
  0xf0   : > { %v1432_v29 = vadd.f32 %v3829_v4, %v399_v21  ;;  %v408_v21 = vld [vmem:[%s3824_s22 + $0x200] sm:$0xff] }
  0xf1   : > { %v1550_v40 = vadd.f32 %v1422_v30, %v1290_v36  ;;  %v1549_v41 = vadd.f32 %v1421_v31, %v1289_v37  ;;  %v1431_v30 = vadd.f32 %v3829_v4, %v398_v22  ;;  %v591_v37 = vld [vmem:[%s3751_s17 + $0x3b8] sm:$0xff] }
  0xf2   : > { %v839_v44 = vpop.permute.xlu1 %838  ;;  %v834_v45 = vpop.permute.xlu0 %833 }
  0xf3   : > { %1678 = vst [vmem:[%s3855_s9 + $0x168] sm:$0xff] %v1550_v40  ;;  %1677 = vst [vmem:[%s3855_s9 + $0x160] sm:$0xff] %v1549_v41  ;;  %v1292_v48 = vmul.f32 %v3836_v7, %v839_v44  ;;  %v1291_v49 = vmul.f32 %v3836_v7, %v834_v45  ;;  %1148 = vperm.xlu1 %3267, %v581_v38   ;;  %1143 = vperm.xlu0 %3266, %v580_v39   ;;  %v590_v38 = vld [vmem:[%s3751_s17 + $0x3b0] sm:$0xff]  ;;  %v403_v45 = vld [vmem:[%s3824_s22 + $0x1d8] sm:$0xff] }
  0xf4   : > { %v1434_v41 = vadd.f32 %v3829_v4, %v401_v33  ;;  %v410_v33 = vld [vmem:[%s3824_s22 + $0x210] sm:$0xff] }
  0xf5   : > { %v1552_v52 = vadd.f32 %v1424_v42, %v1292_v48  ;;  %v1551_v53 = vadd.f32 %v1423_v43, %v1291_v49  ;;  %v1433_v42 = vadd.f32 %v3829_v4, %v400_v34  ;;  %v593_v49 = vld [vmem:[%s3751_s17 + $0x3c8] sm:$0xff] }
  0xf6   : > { %v849_v56 = vpop.permute.xlu1 %848  ;;  %v844_v57 = vpop.permute.xlu0 %843 }
  0xf7   : > { %1680 = vst [vmem:[%s3855_s9 + $0x178] sm:$0xff] %v1552_v52  ;;  %1679 = vst [vmem:[%s3855_s9 + $0x170] sm:$0xff] %v1551_v53  ;;  %v1294_v61 = vmul.f32 %v3836_v7, %v849_v56  ;;  %v1293_v62 = vmul.f32 %v3836_v7, %v844_v57  ;;  %1158 = vperm.xlu1 %3267, %v583_v50   ;;  %1153 = vperm.xlu0 %3266, %v582_v51   ;;  %v592_v50 = vld [vmem:[%s3751_s17 + $0x3c0] sm:$0xff]  ;;  %v405_v57 = vld [vmem:[%s3824_s22 + $0x1e8] sm:$0xff] }
  0xf8   : > { %v1436_v53 = vadd.f32 %v3829_v4, %v403_v45 }
  0xf9   : > { %v1554_v1 = vadd.f32 %v1426_v54, %v1294_v61  ;;  %v1553_v2 = vadd.f32 %v1425_v55, %v1293_v62  ;;  %v1435_v54 = vadd.f32 %v3829_v4, %v402_v46  ;;  %v595_v62 = vld [vmem:[%s3751_s17 + $0x3d8] sm:$0xff]  ;;  %v3646_v46 = vmov 1  }
  0xfa   : > { %v859_v6 = vpop.permute.xlu1 %858  ;;  %v854_v8 = vpop.permute.xlu0 %853 }
  0xfb   : > { %1682 = vst [vmem:[%s3855_s9 + $0x188] sm:$0xff] %v1554_v1  ;;  %1681 = vst [vmem:[%s3855_s9 + $0x180] sm:$0xff] %v1553_v2  ;;  %v1296_v11 = vmul.f32 %v3836_v7, %v859_v6  ;;  %v1295_v12 = vmul.f32 %v3836_v7, %v854_v8  ;;  %1168 = vperm.xlu1 %3267, %v585_v63   ;;  %1163 = vperm.xlu0 %3266, %v584_v0   ;;  %v594_v63 = vld [vmem:[%s3751_s17 + $0x3d0] sm:$0xff]  ;;  %v407_v8 = vld [vmem:[%s3824_s22 + $0x1f8] sm:$0xff] }
  0xfc   : > { %v1438_v2 = vadd.f32 %v3829_v4, %v405_v57 }
  0xfd   : > { %v1556_v15 = vadd.f32 %v1428_v3, %v1296_v11  ;;  %v1555_v16 = vadd.f32 %v1427_v5, %v1295_v12  ;;  %v1437_v3 = vadd.f32 %v3829_v4, %v404_v58  ;;  %v597_v12 = vld [vmem:[%s3751_s17 + $0x3e8] sm:$0xff] }
  0xfe   : > { %v869_v19 = vpop.permute.xlu1 %868  ;;  %v864_v20 = vpop.permute.xlu0 %863 }
  0xff   : > { %1684 = vst [vmem:[%s3855_s9 + $0x198] sm:$0xff] %v1556_v15  ;;  %1683 = vst [vmem:[%s3855_s9 + $0x190] sm:$0xff] %v1555_v16  ;;  %v1298_v23 = vmul.f32 %v3836_v7, %v869_v19  ;;  %v1297_v24 = vmul.f32 %v3836_v7, %v864_v20  ;;  %1178 = vperm.xlu1 %3267, %v587_v13   ;;  %1173 = vperm.xlu0 %3266, %v586_v14   ;;  %v596_v13 = vld [vmem:[%s3751_s17 + $0x3e0] sm:$0xff]  ;;  %v409_v20 = vld [vmem:[%s3824_s22 + $0x208] sm:$0xff] }
 0x100   : > { %v1440_v16 = vadd.f32 %v3829_v4, %v407_v8 }
 0x101   : > { %v1558_v27 = vadd.f32 %v1430_v17, %v1298_v23  ;;  %v1557_v28 = vadd.f32 %v1429_v18, %v1297_v24  ;;  %v1439_v17 = vadd.f32 %v3829_v4, %v406_v9  ;;  %v599_v24 = vld [vmem:[%s3751_s17 + $0x3f8] sm:$0xff] }
 0x102   : > { %v879_v31 = vpop.permute.xlu1 %878  ;;  %v874_v32 = vpop.permute.xlu0 %873 }
 0x103   : > { %1686 = vst [vmem:[%s3855_s9 + $0x1a8] sm:$0xff] %v1558_v27  ;;  %1685 = vst [vmem:[%s3855_s9 + $0x1a0] sm:$0xff] %v1557_v28  ;;  %v1300_v35 = vmul.f32 %v3836_v7, %v879_v31  ;;  %v1299_v36 = vmul.f32 %v3836_v7, %v874_v32  ;;  %1188 = vperm.xlu1 %3267, %v589_v25   ;;  %1183 = vperm.xlu0 %3266, %v588_v26   ;;  %v598_v25 = vld [vmem:[%s3751_s17 + $0x3f0] sm:$0xff]  ;;  %v411_v32 = vld [vmem:[%s3824_s22 + $0x218] sm:$0xff] }
 0x104   : > { %v1442_v28 = vadd.f32 %v3829_v4, %v409_v20 }
 0x105   : > { %v1560_v39 = vadd.f32 %v1432_v29, %v1300_v35  ;;  %v1559_v40 = vadd.f32 %v1431_v30, %v1299_v36  ;;  %v1441_v29 = vadd.f32 %v3829_v4, %v408_v21 }
 0x106   : > { %v889_v43 = vpop.permute.xlu1 %888  ;;  %v884_v44 = vpop.permute.xlu0 %883 }
 0x107   : > { %1688 = vst [vmem:[%s3855_s9 + $0x1b8] sm:$0xff] %v1560_v39  ;;  %1687 = vst [vmem:[%s3855_s9 + $0x1b0] sm:$0xff] %v1559_v40  ;;  %v1302_v47 = vmul.f32 %v3836_v7, %v889_v43  ;;  %v1301_v48 = vmul.f32 %v3836_v7, %v884_v44  ;;  %1198 = vperm.xlu1 %3267, %v591_v37   ;;  %1193 = vperm.xlu0 %3266, %v590_v38   ;;  %v412_v43 = vld [vmem:[%s3824_s22 + $0x220] sm:$0xff] }
 0x108   : > { %v1444_v38 = vadd.f32 %v3829_v4, %v411_v32  ;;  %v1443_v39 = vadd.f32 %v3829_v4, %v410_v33 }
 0x109   : > { %v1562_v51 = vadd.f32 %v1434_v41, %v1302_v47  ;;  %v1561_v52 = vadd.f32 %v1433_v42, %v1301_v48  ;;  %v413_v42 = vld [vmem:[%s3824_s22 + $0x228] sm:$0xff]  ;;  %v3271_v48 = vld [vmem:[%s3751_s17] sm:$0xff] }
 0x10a   : > { %v899_v55 = vpop.permute.xlu1 %898  ;;  %v894_v56 = vpop.permute.xlu0 %893  ;;  %v3270_v47 = vld [vmem:[%s3751_s17 + $0x8] sm:$0xff] }
 0x10b   : > { %1690 = vst [vmem:[%s3855_s9 + $0x1c8] sm:$0xff] %v1562_v51  ;;  %1689 = vst [vmem:[%s3855_s9 + $0x1c0] sm:$0xff] %v1561_v52  ;;  %v1304_v59 = vmul.f32 %v3836_v7, %v899_v55  ;;  %v1303_v61 = vmul.f32 %v3836_v7, %v894_v56  ;;  %1208 = vperm.xlu1 %3267, %v593_v49   ;;  %1203 = vperm.xlu0 %3266, %v592_v50   ;;  %v415_v55 = vld [vmem:[%s3824_s22 + $0x238] sm:$0xff]  ;;  %v414_v56 = vld [vmem:[%s3824_s22 + $0x230] sm:$0xff] }
 0x10c   : > { %v1446_v51 = vadd.f32 %v3829_v4, %v413_v42  ;;  %v1445_v52 = vadd.f32 %v3829_v4, %v412_v43  ;;  %v423_v42 = vld [vmem:[%s3824_s22 + $0x278] sm:$0xff]  ;;  %v422_v43 = vld [vmem:[%s3824_s22 + $0x270] sm:$0xff] }
 0x10d   : > { %v1564_v0 = vadd.f32 %v1436_v53, %v1304_v59  ;;  %v1563_v1 = vadd.f32 %v1435_v54, %v1303_v61  ;;  %v3272_v59 = vld [vmem:[%s3751_s17 + $0x10] sm:$0xff]  ;;  %v3273_v61 = vld [vmem:[%s3751_s17 + $0x18] sm:$0xff] }
 0x10e   : > { %v909_v5 = vpop.permute.xlu1 %908  ;;  %v904_v6 = vpop.permute.xlu0 %903 }
 0x10f   : > { %1692 = vst [vmem:[%s3855_s9 + $0x1d8] sm:$0xff] %v1564_v0  ;;  %1691 = vst [vmem:[%s3855_s9 + $0x1d0] sm:$0xff] %v1563_v1  ;;  %v1306_v10 = vmul.f32 %v3836_v7, %v909_v5  ;;  %v1305_v11 = vmul.f32 %v3836_v7, %v904_v6  ;;  %1218 = vperm.xlu1 %3267, %v595_v62   ;;  %1213 = vperm.xlu0 %3266, %v594_v63   ;;  %v417_v5 = vld [vmem:[%s3824_s22 + $0x248] sm:$0xff]  ;;  %v416_v6 = vld [vmem:[%s3824_s22 + $0x240] sm:$0xff] }
 0x110   : > { %v1448_v0 = vadd.f32 %v3829_v4, %v415_v55  ;;  %v1447_v1 = vadd.f32 %v3829_v4, %v414_v56  ;;  %v424_v55 = vld [vmem:[%s3824_s22 + $0x280] sm:$0xff] }
 0x111   : > { %v1566_v14 = vadd.f32 %v1438_v2, %v1306_v10  ;;  %v1565_v15 = vadd.f32 %v1437_v3, %v1305_v11  ;;  %v3274_v10 = vld [vmem:[%s3751_s17 + $0x20] sm:$0xff]  ;;  %v3275_v11 = vld [vmem:[%s3751_s17 + $0x28] sm:$0xff] }
 0x112   : > { %v919_v18 = vpop.permute.xlu1 %918  ;;  %v914_v19 = vpop.permute.xlu0 %913 }
 0x113   : > { %1694 = vst [vmem:[%s3855_s9 + $0x1e8] sm:$0xff] %v1566_v14  ;;  %1693 = vst [vmem:[%s3855_s9 + $0x1e0] sm:$0xff] %v1565_v15  ;;  %v1308_v22 = vmul.f32 %v3836_v7, %v919_v18  ;;  %v1307_v23 = vmul.f32 %v3836_v7, %v914_v19  ;;  %1228 = vperm.xlu1 %3267, %v597_v12   ;;  %1223 = vperm.xlu0 %3266, %v596_v13   ;;  %v419_v18 = vld [vmem:[%s3824_s22 + $0x258] sm:$0xff]  ;;  %v418_v19 = vld [vmem:[%s3824_s22 + $0x250] sm:$0xff] }
 0x114   : > { %v1450_v14 = vadd.f32 %v3829_v4, %v417_v5  ;;  %v1449_v15 = vadd.f32 %v3829_v4, %v416_v6  ;;  %v426_v5 = vld [vmem:[%s3824_s22 + $0x290] sm:$0xff] }
 0x115   : > { %v1568_v26 = vadd.f32 %v1440_v16, %v1308_v22  ;;  %v1567_v27 = vadd.f32 %v1439_v17, %v1307_v23  ;;  %v3276_v22 = vld [vmem:[%s3751_s17 + $0x30] sm:$0xff]  ;;  %v3277_v23 = vld [vmem:[%s3751_s17 + $0x38] sm:$0xff] }
 0x116   : > { %v929_v30 = vpop.permute.xlu1 %928  ;;  %v924_v31 = vpop.permute.xlu0 %923 }
 0x117   : > { %1696 = vst [vmem:[%s3855_s9 + $0x1f8] sm:$0xff] %v1568_v26  ;;  %1695 = vst [vmem:[%s3855_s9 + $0x1f0] sm:$0xff] %v1567_v27  ;;  %v1310_v34 = vmul.f32 %v3836_v7, %v929_v30  ;;  %v1309_v35 = vmul.f32 %v3836_v7, %v924_v31  ;;  %1238 = vperm.xlu1 %3267, %v599_v24   ;;  %1233 = vperm.xlu0 %3266, %v598_v25   ;;  %v421_v30 = vld [vmem:[%s3824_s22 + $0x268] sm:$0xff]  ;;  %v420_v31 = vld [vmem:[%s3824_s22 + $0x260] sm:$0xff] }
 0x118   : > { %v1452_v26 = vadd.f32 %v3829_v4, %v419_v18  ;;  %v1451_v27 = vadd.f32 %v3829_v4, %v418_v19  ;;  %v428_v18 = vld [vmem:[%s3824_s22 + $0x2a0] sm:$0xff] }
 0x119   : > { %v1570_v36 = vadd.f32 %v1442_v28, %v1310_v34  ;;  %v1569_v37 = vadd.f32 %v1441_v29, %v1309_v35  ;;  %v3278_v34 = vld [vmem:[%s3751_s17 + $0x40] sm:$0xff]  ;;  %v3279_v35 = vld [vmem:[%s3751_s17 + $0x48] sm:$0xff] }
 0x11a   : > { %v939_v40 = vpop.permute.xlu1 %938  ;;  %v934_v41 = vpop.permute.xlu0 %933 }
 0x11b   : > { %1698 = vst [vmem:[%s3855_s9 + $0x208] sm:$0xff] %v1570_v36  ;;  %1697 = vst [vmem:[%s3855_s9 + $0x200] sm:$0xff] %v1569_v37  ;;  %v1312_v44 = vmul.f32 %v3836_v7, %v939_v40  ;;  %v1311_v45 = vmul.f32 %v3836_v7, %v934_v41  ;;  %3269 = vset.pattern.permute.xlu1 %v3646_v46  ;;  %3268 = vset.pattern.permute.xlu0 %v3646_v46  ;;  %v3280_v46 = vld [vmem:[%s3751_s17 + $0x50] sm:$0xff] }
 0x11c   : > { %1766 = vperm.xlu1 %3269, %v3270_v47   ;;  %1762 = vperm.xlu0 %3268, %v3271_v48   ;;  %v3281_v47 = vld [vmem:[%s3751_s17 + $0x58] sm:$0xff] }
 0x11d   : > { %v1572_v49 = vadd.f32 %v1444_v38, %v1312_v44  ;;  %v1571_v50 = vadd.f32 %v1443_v39, %v1311_v45  ;;  %v1454_v38 = vadd.f32 %v3829_v4, %v421_v30  ;;  %v1453_v39 = vadd.f32 %v3829_v4, %v420_v31  ;;  %v430_v30 = vld [vmem:[%s3824_s22 + $0x2b0] sm:$0xff] }
 0x11e   : > { %v949_v53 = vpop.permute.xlu1 %948  ;;  %v944_v54 = vpop.permute.xlu0 %943 }
 0x11f   : > { %1700 = vst [vmem:[%s3855_s9 + $0x218] sm:$0xff] %v1572_v49  ;;  %1699 = vst [vmem:[%s3855_s9 + $0x210] sm:$0xff] %v1571_v50  ;;  %v1314_v57 = vmul.f32 %v3836_v7, %v949_v53  ;;  %v1313_v58 = vmul.f32 %v3836_v7, %v944_v54  ;;  %v1456_v50 = vadd.f32 %v3829_v4, %v423_v42  ;;  %v425_v54 = vld [vmem:[%s3824_s22 + $0x288] sm:$0xff]  ;;  %v432_v42 = vld [vmem:[%s3824_s22 + $0x2c0] sm:$0xff] }
 0x120   : > { %1770 = vperm.xlu1 %3269, %v3272_v59   ;;  %1774 = vperm.xlu0 %3268, %v3273_v61   ;;  %v3283_v59 = vld [vmem:[%s3751_s17 + $0x68] sm:$0xff] }
 0x121   : > { %v1574_v62 = vadd.f32 %v1446_v51, %v1314_v57  ;;  %v1573_v63 = vadd.f32 %v1445_v52, %v1313_v58  ;;  %v1455_v51 = vadd.f32 %v3829_v4, %v422_v43  ;;  %v3282_v58 = vld [vmem:[%s3751_s17 + $0x60] sm:$0xff] }
 0x122   : > { %v959_v2 = vpop.permute.xlu1 %958  ;;  %v954_v3 = vpop.permute.xlu0 %953 }
 0x123   : > { %1702 = vst [vmem:[%s3855_s9 + $0x228] sm:$0xff] %v1574_v62  ;;  %1701 = vst [vmem:[%s3855_s9 + $0x220] sm:$0xff] %v1573_v63  ;;  %v1316_v8 = vmul.f32 %v3836_v7, %v959_v2  ;;  %v1315_v9 = vmul.f32 %v3836_v7, %v954_v3  ;;  %v1458_v63 = vadd.f32 %v3829_v4, %v425_v54  ;;  %v427_v3 = vld [vmem:[%s3824_s22 + $0x298] sm:$0xff]  ;;  %v434_v54 = vld [vmem:[%s3824_s22 + $0x2d0] sm:$0xff] }
 0x124   : > { %1778 = vperm.xlu1 %3269, %v3274_v10   ;;  %1782 = vperm.xlu0 %3268, %v3275_v11   ;;  %v3285_v10 = vld [vmem:[%s3751_s17 + $0x78] sm:$0xff] }
 0x125   : > { %v1576_v12 = vadd.f32 %v1448_v0, %v1316_v8  ;;  %v1575_v13 = vadd.f32 %v1447_v1, %v1315_v9  ;;  %v1457_v0 = vadd.f32 %v3829_v4, %v424_v55  ;;  %v3284_v9 = vld [vmem:[%s3751_s17 + $0x70] sm:$0xff] }
 0x126   : > { %v969_v16 = vpop.permute.xlu1 %968  ;;  %v964_v17 = vpop.permute.xlu0 %963 }
 0x127   : > { %1704 = vst [vmem:[%s3855_s9 + $0x238] sm:$0xff] %v1576_v12  ;;  %1703 = vst [vmem:[%s3855_s9 + $0x230] sm:$0xff] %v1575_v13  ;;  %v1318_v20 = vmul.f32 %v3836_v7, %v969_v16  ;;  %v1317_v21 = vmul.f32 %v3836_v7, %v964_v17  ;;  %v1460_v13 = vadd.f32 %v3829_v4, %v427_v3  ;;  %v429_v17 = vld [vmem:[%s3824_s22 + $0x2a8] sm:$0xff] }
 0x128   : > { %1786 = vperm.xlu1 %3269, %v3276_v22   ;;  %1790 = vperm.xlu0 %3268, %v3277_v23   ;;  %v3287_v22 = vld [vmem:[%s3751_s17 + $0x88] sm:$0xff] }
 0x129   : > { %v1578_v24 = vadd.f32 %v1450_v14, %v1318_v20  ;;  %v1577_v25 = vadd.f32 %v1449_v15, %v1317_v21  ;;  %v1459_v14 = vadd.f32 %v3829_v4, %v426_v5  ;;  %v3286_v21 = vld [vmem:[%s3751_s17 + $0x80] sm:$0xff] }
 0x12a   : > { %v979_v28 = vpop.permute.xlu1 %978  ;;  %v974_v29 = vpop.permute.xlu0 %973  ;;  %v436_v5 = vld [vmem:[%s3824_s22 + $0x2e0] sm:$0xff] }
 0x12b   : > { %1706 = vst [vmem:[%s3855_s9 + $0x248] sm:$0xff] %v1578_v24  ;;  %1705 = vst [vmem:[%s3855_s9 + $0x240] sm:$0xff] %v1577_v25  ;;  %v1320_v32 = vmul.f32 %v3836_v7, %v979_v28  ;;  %v1319_v33 = vmul.f32 %v3836_v7, %v974_v29  ;;  %v1462_v25 = vadd.f32 %v3829_v4, %v429_v17  ;;  %v431_v29 = vld [vmem:[%s3824_s22 + $0x2b8] sm:$0xff] }
 0x12c   : > { %1794 = vperm.xlu1 %3269, %v3278_v34   ;;  %1798 = vperm.xlu0 %3268, %v3279_v35   ;;  %v3289_v34 = vld [vmem:[%s3751_s17 + $0x98] sm:$0xff]  ;;  %v1469_v17 = vadd.f32 %v3829_v4, %v436_v5  ;;  %v3303_v5 = vld [vmem:[%s3751_s17 + $0x108] sm:$0xff] }
 0x12d   : > { %v1580_v36 = vadd.f32 %v1452_v26, %v1320_v32  ;;  %v1579_v37 = vadd.f32 %v1451_v27, %v1319_v33  ;;  %v1461_v26 = vadd.f32 %v3829_v4, %v428_v18  ;;  %v3288_v33 = vld [vmem:[%s3751_s17 + $0x90] sm:$0xff]  ;;  %v439_v18 = vld [vmem:[%s3824_s22 + $0x2f8] sm:$0xff] }
 0x12e   : > { %v989_v40 = vpop.permute.xlu1 %988  ;;  %v984_v41 = vpop.permute.xlu0 %983 }
 0x12f   : > { %1708 = vst [vmem:[%s3855_s9 + $0x258] sm:$0xff] %v1580_v36  ;;  %1707 = vst [vmem:[%s3855_s9 + $0x250] sm:$0xff] %v1579_v37  ;;  %v1322_v44 = vmul.f32 %v3836_v7, %v989_v40  ;;  %v1321_v45 = vmul.f32 %v3836_v7, %v984_v41  ;;  %v1464_v37 = vadd.f32 %v3829_v4, %v431_v29  ;;  %v433_v41 = vld [vmem:[%s3824_s22 + $0x2c8] sm:$0xff]  ;;  %v2795_v29 = vld [vmem:[%s4309_s14 + $0x10] sm:$0xff] }
 0x130   : > { %1802 = vperm.xlu1 %3269, %v3280_v46   ;;  %1806 = vperm.xlu0 %3268, %v3281_v47   ;;  %v3291_v46 = vld [vmem:[%s3751_s17 + $0xa8] sm:$0xff] }
 0x131   : > { %v1582_v48 = vadd.f32 %v1454_v38, %v1322_v44  ;;  %v1581_v49 = vadd.f32 %v1453_v39, %v1321_v45  ;;  %v1463_v38 = vadd.f32 %v3829_v4, %v430_v30  ;;  %v3290_v45 = vld [vmem:[%s3751_s17 + $0xa0] sm:$0xff]  ;;  %v2799_v30 = vld [vmem:[%s4309_s14 + $0x30] sm:$0xff] }
 0x132   : > { %v999_v52 = vpop.permute.xlu1 %998  ;;  %v994_v53 = vpop.permute.xlu0 %993 }
 0x133   : > { %1710 = vst [vmem:[%s3855_s9 + $0x268] sm:$0xff] %v1582_v48  ;;  %1709 = vst [vmem:[%s3855_s9 + $0x260] sm:$0xff] %v1581_v49  ;;  %v1324_v56 = vmul.f32 %v3836_v7, %v999_v52  ;;  %v1323_v57 = vmul.f32 %v3836_v7, %v994_v53  ;;  %v1466_v49 = vadd.f32 %v3829_v4, %v433_v41  ;;  %v435_v53 = vld [vmem:[%s3824_s22 + $0x2d8] sm:$0xff] }
 0x134   : > { %1810 = vperm.xlu1 %3269, %v3282_v58   ;;  %1814 = vperm.xlu0 %3268, %v3283_v59   ;;  %v3293_v58 = vld [vmem:[%s3751_s17 + $0xb8] sm:$0xff] }
 0x135   : > { %v1584_v61 = vadd.f32 %v1456_v50, %v1324_v56  ;;  %v1583_v62 = vadd.f32 %v1455_v51, %v1323_v57  ;;  %v1465_v50 = vadd.f32 %v3829_v4, %v432_v42  ;;  %v3292_v57 = vld [vmem:[%s3751_s17 + $0xb0] sm:$0xff]  ;;  %v3298_v42 = vld [vmem:[%s3751_s17 + $0xe0] sm:$0xff] }
 0x136   : > { %v1009_v1 = vpop.permute.xlu1 %1008  ;;  %v1004_v2 = vpop.permute.xlu0 %1003 }
 0x137   : > { %1712 = vst [vmem:[%s3855_s9 + $0x278] sm:$0xff] %v1584_v61  ;;  %1711 = vst [vmem:[%s3855_s9 + $0x270] sm:$0xff] %v1583_v62  ;;  %v1326_v6 = vmul.f32 %v3836_v7, %v1009_v1  ;;  %v1325_v8 = vmul.f32 %v3836_v7, %v1004_v2  ;;  %v1468_v62 = vadd.f32 %v3829_v4, %v435_v53  ;;  %v2802_v1 = vld [vmem:[%s5257_s4 + $0x8] sm:$0xff] }
 0x138   : > { %1818 = vperm.xlu1 %3269, %v3284_v9   ;;  %1822 = vperm.xlu0 %3268, %v3285_v10   ;;  %v2801_v9 = vld [vmem:[%s5257_s4] sm:$0xff] }
 0x139   : > { %v1586_v11 = vadd.f32 %v1458_v63, %v1326_v6  ;;  %v1585_v12 = vadd.f32 %v1457_v0, %v1325_v8  ;;  %v1467_v63 = vadd.f32 %v3829_v4, %v434_v54  ;;  %v437_v0 = vld [vmem:[%s3824_s22 + $0x2e8] sm:$0xff]  ;;  %3193 = vmatprep.subr.mxu0 %v2802_v1  ;;  %3209 = vmatprep.subr.mxu1 %v2802_v1  ;;  %v3294_v10 = vld [vmem:[%s3751_s17 + $0xc0] sm:$0xff]  ;;  %v3300_v54 = vld [vmem:[%s3751_s17 + $0xf0] sm:$0xff] }
 0x13a   : > { %v1019_v15 = vpop.permute.xlu1 %1018  ;;  %v1014_v16 = vpop.permute.xlu0 %1013  ;;  %3194 = vmatpush3.msra.mxu0 %v2802_v1  ;;  %3211 = vmatpush3.msra.mxu1 %v2802_v1 }
 0x13b   : > { %1714 = vst [vmem:[%s3855_s9 + $0x288] sm:$0xff] %v1586_v11  ;;  %1713 = vst [vmem:[%s3855_s9 + $0x280] sm:$0xff] %v1585_v12  ;;  %v1328_v19 = vmul.f32 %v3836_v7, %v1019_v15  ;;  %v1327_v20 = vmul.f32 %v3836_v7, %v1014_v16  ;;  %v3295_v11 = vld [vmem:[%s3751_s17 + $0xc8] sm:$0xff]  ;;  %v1470_v12 = vadd.f32 %v3829_v4, %v437_v0  ;;  %3195 = vmatprep.subr.mxu0 %v2801_v9  ;;  %v444_v0 = vld [vmem:[%s3824_s22 + $0x320] sm:$0xff] }
 0x13c   : > { %1826 = vperm.xlu1 %3269, %v3286_v21   ;;  %1830 = vperm.xlu0 %3268, %v3287_v22   ;;  %v438_v21 = vld [vmem:[%s3824_s22 + $0x2f0] sm:$0xff]  ;;  %v2794_v22 = vld [vmem:[%s4309_s14 + $0x8] sm:$0xff] }
 0x13d   : > { %v1588_v23 = vadd.f32 %v1460_v13, %v1328_v19  ;;  %v1587_v24 = vadd.f32 %v1459_v14, %v1327_v20  ;;  %v2793_v13 = vld [vmem:[%s4309_s14] sm:$0xff]  ;;  %3210 = vmatprep.subr.mxu1 %v2801_v9  ;;  %3196 = vmatpush3.msra.mxu0 %v2801_v9 }
 0x13e   : > { %v1029_v27 = vpop.permute.xlu1 %1028  ;;  %v1024_v28 = vpop.permute.xlu0 %1023  ;;  %v2797_v14 = vld [vmem:[%s4309_s14 + $0x20] sm:$0xff]  ;;  %3212 = vmatpush3.msra.mxu1 %v2801_v9  ;;  %3197 = vmatprep.mubr.msk.f32.mxu0 %vm2807_vm0, %v2793_v13  ;;  %v447_v13 = vld [vmem:[%s3824_s22 + $0x338] sm:$0xff] }
 0x13f   : > { %1716 = vst [vmem:[%s3855_s9 + $0x298] sm:$0xff] %v1588_v23  ;;  %1715 = vst [vmem:[%s3855_s9 + $0x290] sm:$0xff] %v1587_v24  ;;  %v1330_v31 = vmul.f32 %v3836_v7, %v1029_v27  ;;  %v1329_v32 = vmul.f32 %v3836_v7, %v1024_v28  ;;  %v2798_v23 = vld [vmem:[%s4309_s14 + $0x28] sm:$0xff]  ;;  %3203 = vmatprep.mubr.msk.f32.mxu1 %vm2807_vm0, %v2797_v14  ;;  %v3297_v27 = vld [vmem:[%s3751_s17 + $0xd8] sm:$0xff]  ;;  %v1472_v28 = vadd.f32 %v3829_v4, %v439_v18 }
 0x140   : > { %1834 = vperm.xlu1 %3269, %v3288_v33   ;;  %1838 = vperm.xlu0 %3268, %v3289_v34   ;;  %v1471_v33 = vadd.f32 %v3829_v4, %v438_v21  ;;  %v441_v34 = vld [vmem:[%s3824_s22 + $0x308] sm:$0xff]  ;;  %v446_v14 = vld [vmem:[%s3824_s22 + $0x330] sm:$0xff]  ;;  %v3305_v18 = vld [vmem:[%s3751_s17 + $0x118] sm:$0xff]  ;;  %v1480_v21 = vadd.f32 %v3829_v4, %v447_v13 }
 0x141   : > { %v1590_v35 = vadd.f32 %v1462_v25, %v1330_v31  ;;  %v1589_v36 = vadd.f32 %v1461_v26, %v1329_v32  ;;  %v3296_v26 = vld [vmem:[%s3751_s17 + $0xd0] sm:$0xff]  ;;  %3198 = vmatmul.mubr.msk.f32.vlgmr.msra.gmra.mxu0 %vm2807_vm0, %v2794_v22  ;;  %3204 = vmatmul.mubr.msk.f32.vlgmr.msra.gmra.mxu1 %vm2807_vm0, %v2798_v23  ;;  %v1479_v22 = vadd.f32 %v3829_v4, %v446_v14  ;;  %v456_v13 = vld [vmem:[%s3824_s22 + $0x380] sm:$0xff] }
 0x142   : > { %v1039_v39 = vpop.permute.xlu1 %1038  ;;  %v1034_v40 = vpop.permute.xlu0 %1033  ;;  %3200 = vmatprep.mubr.msk.f32.mxu0 %vm2807_vm0, %v2795_v29  ;;  %3206 = vmatprep.mubr.msk.f32.mxu1 %vm2807_vm0, %v2799_v30  ;;  %v3306_v29 = vld [vmem:[%s3751_s17 + $0x120] sm:$0xff]  ;;  %v3307_v30 = vld [vmem:[%s3751_s17 + $0x128] sm:$0xff] }
 0x143   : > { %1718 = vst [vmem:[%s3855_s9 + $0x2a8] sm:$0xff] %v1590_v35  ;;  %1717 = vst [vmem:[%s3855_s9 + $0x2a0] sm:$0xff] %v1589_v36  ;;  %v1332_v43 = vmul.f32 %v3836_v7, %v1039_v39  ;;  %v1331_v44 = vmul.f32 %v3836_v7, %v1034_v40  ;;  %v2800_v39 = vld [vmem:[%s4309_s14 + $0x38] sm:$0xff] }
 0x144   : > { %1842 = vperm.xlu1 %3269, %v3290_v45   ;;  %1846 = vperm.xlu0 %3268, %v3291_v46  }
 0x145   : > { %v1592_v47 = vadd.f32 %v1464_v37, %v1332_v43  ;;  %v1591_v48 = vadd.f32 %v1463_v38, %v1331_v44  ;;  %v440_v37 = vld [vmem:[%s3824_s22 + $0x300] sm:$0xff]  ;;  %v2796_v38 = vld [vmem:[%s4309_s14 + $0x18] sm:$0xff]  ;;  %v3299_v43 = vld [vmem:[%s3751_s17 + $0xe8] sm:$0xff]  ;;  %v1474_v44 = vadd.f32 %v3829_v4, %v441_v34  ;;  %3207 = vmatmul.mubr.msk.f32.gmra.mxu1 %vm2807_vm0, %v2800_v39  ;;  %s2969_s14 = sshll.u32 %s3855_s9, 4  ;;  %s4894_s14 = int_to_ptr.vmem [resolvable:$true] %s2969_s14 }
 0x146   : > { %v1049_v51 = vpop.permute.xlu1 %1048  ;;  %v1044_v52 = vpop.permute.xlu0 %1043  ;;  %3201 = vmatmul.mubr.msk.f32.gmra.mxu0 %vm2807_vm0, %v2796_v38  ;;  %v450_v38 = vld [vmem:[%s3824_s22 + $0x350] sm:$0xff]  ;;  %s3527_s15 = scalar_lea.vmem %s4894_s14, 16384 }
 0x147   : > { %1720 = vst [vmem:[%s3855_s9 + $0x2b8] sm:$0xff] %v1592_v47  ;;  %1719 = vst [vmem:[%s3855_s9 + $0x2b0] sm:$0xff] %v1591_v48  ;;  %v1334_v55 = vmul.f32 %v3836_v7, %v1049_v51  ;;  %v1333_v56 = vmul.f32 %v3836_v7, %v1044_v52  ;;  %v1473_v47 = vadd.f32 %v3829_v4, %v440_v37  ;;  %v442_v51 = vld [vmem:[%s3824_s22 + $0x310] sm:$0xff]  ;;  %v451_v37 = vld [vmem:[%s3824_s22 + $0x358] sm:$0xff]  ;;  %p3528_p12 = scmp.ne.s32.totalorder %s4894_s14, %s3527_s15 }
 0x148   : > { %1850 = vperm.xlu1 %3269, %v3292_v57   ;;  %1854 = vperm.xlu0 %3268, %v3293_v58  }
 0x149   : > { %v1594_v59 = vadd.f32 %v1466_v49, %v1334_v55  ;;  %v1593_v61 = vadd.f32 %v1465_v50, %v1333_v56  ;;  %v443_v50 = vld [vmem:[%s3824_s22 + $0x318] sm:$0xff]  ;;  %p3529_p13 = pnand %p3528_p12, %p3732_p5 }
 0x14a   : > { %v1059_v2 = vpop.permute.xlu1 %1058  ;;  %v1054_v3 = vpop.permute.xlu0 %1053  ;;  %v3301_v55 = vld [vmem:[%s3751_s17 + $0xf8] sm:$0xff]  ;;  %v1476_v58 = vadd.f32 %v3829_v4, %v443_v50  ;;  %v452_v50 = vld [vmem:[%s3824_s22 + $0x360] sm:$0xff] }
 0x14b   : > { %1722 = vst [vmem:[%s3855_s9 + $0x2c8] sm:$0xff] %v1594_v59  ;;  %1721 = vst [vmem:[%s3855_s9 + $0x2c0] sm:$0xff] %v1593_v61  ;;  %v1336_v6 = vmul.f32 %v3836_v7, %v1059_v2  ;;  %v1335_v8 = vmul.f32 %v3836_v7, %v1054_v3  ;;  %v1475_v59 = vadd.f32 %v3829_v4, %v442_v51  ;;  %v3302_v3 = vld [vmem:[%s3751_s17 + $0x100] sm:$0xff]  ;;  %p3530_p0 = pneg %p3529_p13 }
 0x14c   : > { %1858 = vperm.xlu1 %3269, %v3294_v10   ;;  %1862 = vperm.xlu0 %3268, %v3295_v11   ;;  %v1477_v10 = vadd.f32 %v3829_v4, %v444_v0 }
 0x14d   : > { %v1596_v15 = vadd.f32 %v1468_v62, %v1336_v6  ;;  %v1595_v16 = vadd.f32 %v1467_v63, %v1335_v8  ;;  %v445_v63 = vld [vmem:[%s3824_s22 + $0x328] sm:$0xff] }
 0x14e   : > { %v1069_v19 = vpop.permute.xlu1 %1068  ;;  %v1064_v20 = vpop.permute.xlu0 %1063  ;;  %v1478_v9 = vadd.f32 %v3829_v4, %v445_v63  ;;  %v454_v63 = vld [vmem:[%s3824_s22 + $0x370] sm:$0xff] }
 0x14f   : > { %1724 = vst [vmem:[%s3855_s9 + $0x2d8] sm:$0xff] %v1596_v15  ;;  %1723 = vst [vmem:[%s3855_s9 + $0x2d0] sm:$0xff] %v1595_v16  ;;  %v1338_v24 = vmul.f32 %v3836_v7, %v1069_v19  ;;  %v1337_v25 = vmul.f32 %v3836_v7, %v1064_v20 }
 0x150   : > { %1866 = vperm.xlu1 %3269, %v3296_v26   ;;  %1870 = vperm.xlu0 %3268, %v3297_v27   ;;  %v448_v26 = vld [vmem:[%s3824_s22 + $0x340] sm:$0xff] }
 0x151   : > { %v1598_v31 = vadd.f32 %v1470_v12, %v1338_v24  ;;  %v1597_v32 = vadd.f32 %v1469_v17, %v1337_v25  ;;  %v3304_v17 = vld [vmem:[%s3751_s17 + $0x110] sm:$0xff]  ;;  %v449_v25 = vld [vmem:[%s3824_s22 + $0x348] sm:$0xff]  ;;  %v1481_v34 = vadd.f32 %v3829_v4, %v448_v26 }
 0x152   : > { %v1079_v35 = vpop.permute.xlu1 %1078  ;;  %v1074_v36 = vpop.permute.xlu0 %1073 }
 0x153   : > { %1726 = vst [vmem:[%s3855_s9 + $0x2e8] sm:$0xff] %v1598_v31  ;;  %1725 = vst [vmem:[%s3855_s9 + $0x2e0] sm:$0xff] %v1597_v32  ;;  %v1340_v40 = vmul.f32 %v3836_v7, %v1079_v35  ;;  %v1339_v41 = vmul.f32 %v3836_v7, %v1074_v36 }
 0x154   : > { %1874 = vperm.xlu1 %3269, %v3298_v42   ;;  %1878 = vperm.xlu0 %3268, %v3299_v43   ;;  %v3309_v42 = vld [vmem:[%s3751_s17 + $0x138] sm:$0xff] }
 0x155   : > { %v1600_v45 = vadd.f32 %v1472_v28, %v1340_v40  ;;  %v1599_v46 = vadd.f32 %v1471_v33, %v1339_v41  ;;  %v1482_v33 = vadd.f32 %v3829_v4, %v449_v25  ;;  %v3308_v41 = vld [vmem:[%s3751_s17 + $0x130] sm:$0xff] }
 0x156   : > { %v1089_v48 = vpop.permute.xlu1 %1088  ;;  %v1084_v49 = vpop.permute.xlu0 %1083  ;;  %v458_v25 = vld [vmem:[%s3824_s22 + $0x390] sm:$0xff] }
 0x157   : > { %1728 = vst [vmem:[%s3855_s9 + $0x2f8] sm:$0xff] %v1600_v45  ;;  %1727 = vst [vmem:[%s3855_s9 + $0x2f0] sm:$0xff] %v1599_v46  ;;  %v1342_v52 = vmul.f32 %v3836_v7, %v1089_v48  ;;  %v1341_v53 = vmul.f32 %v3836_v7, %v1084_v49  ;;  %v1484_v45 = vadd.f32 %v3829_v4, %v451_v37  ;;  %v453_v49 = vld [vmem:[%s3824_s22 + $0x368] sm:$0xff]  ;;  %v460_v37 = vld [vmem:[%s3824_s22 + $0x3a0] sm:$0xff] }
 0x158   : > { %1882 = vperm.xlu1 %3269, %v3300_v54   ;;  %1886 = vperm.xlu0 %3268, %v3301_v55   ;;  %v1483_v46 = vadd.f32 %v3829_v4, %v450_v38  ;;  %v3311_v54 = vld [vmem:[%s3751_s17 + $0x148] sm:$0xff] }
 0x159   : > { %v1602_v56 = vadd.f32 %v1474_v44, %v1342_v52  ;;  %v1601_v57 = vadd.f32 %v1473_v47, %v1341_v53  ;;  %v3310_v53 = vld [vmem:[%s3751_s17 + $0x140] sm:$0xff] }
 0x15a   : > { %v1099_v61 = vpop.permute.xlu1 %1098  ;;  %v1094_v62 = vpop.permute.xlu0 %1093 }
 0x15b   : > { %1730 = vst [vmem:[%s3855_s9 + $0x308] sm:$0xff] %v1602_v56  ;;  %1729 = vst [vmem:[%s3855_s9 + $0x300] sm:$0xff] %v1601_v57  ;;  %v1344_v1 = vmul.f32 %v3836_v7, %v1099_v61  ;;  %v1343_v2 = vmul.f32 %v3836_v7, %v1094_v62  ;;  %v1486_v57 = vadd.f32 %v3829_v4, %v453_v49  ;;  %v455_v62 = vld [vmem:[%s3824_s22 + $0x378] sm:$0xff]  ;;  %v462_v49 = vld [vmem:[%s3824_s22 + $0x3b0] sm:$0xff] }
 0x15c   : > { %1890 = vperm.xlu1 %3269, %v3302_v3   ;;  %1894 = vperm.xlu0 %3268, %v3303_v5   ;;  %v3313_v3 = vld [vmem:[%s3751_s17 + $0x158] sm:$0xff] }
 0x15d   : > { %v1604_v6 = vadd.f32 %v1476_v58, %v1344_v1  ;;  %v1603_v8 = vadd.f32 %v1475_v59, %v1343_v2  ;;  %v1485_v58 = vadd.f32 %v3829_v4, %v452_v50  ;;  %v3312_v2 = vld [vmem:[%s3751_s17 + $0x150] sm:$0xff] }
 0x15e   : > { %v1109_v11 = vpop.permute.xlu1 %1108  ;;  %v1104_v12 = vpop.permute.xlu0 %1103 }
 0x15f   : > { %1732 = vst [vmem:[%s3855_s9 + $0x318] sm:$0xff] %v1604_v6  ;;  %1731 = vst [vmem:[%s3855_s9 + $0x310] sm:$0xff] %v1603_v8  ;;  %v1346_v15 = vmul.f32 %v3836_v7, %v1109_v11  ;;  %v1345_v16 = vmul.f32 %v3836_v7, %v1104_v12  ;;  %v1488_v8 = vadd.f32 %v3829_v4, %v455_v62  ;;  %v457_v12 = vld [vmem:[%s3824_s22 + $0x388] sm:$0xff]  ;;  %v464_v62 = vld [vmem:[%s3824_s22 + $0x3c0] sm:$0xff] }
 0x160   : > { %1898 = vperm.xlu1 %3269, %v3304_v17   ;;  %1902 = vperm.xlu0 %3268, %v3305_v18   ;;  %v3315_v17 = vld [vmem:[%s3751_s17 + $0x168] sm:$0xff] }
 0x161   : > { %v1606_v19 = vadd.f32 %v1478_v9, %v1346_v15  ;;  %v1605_v20 = vadd.f32 %v1477_v10, %v1345_v16  ;;  %v1487_v9 = vadd.f32 %v3829_v4, %v454_v63  ;;  %v3314_v16 = vld [vmem:[%s3751_s17 + $0x160] sm:$0xff] }
 0x162   : > { %v1119_v23 = vpop.permute.xlu1 %1118  ;;  %v1114_v24 = vpop.permute.xlu0 %1113 }
 0x163   : > { %1734 = vst [vmem:[%s3855_s9 + $0x328] sm:$0xff] %v1606_v19  ;;  %1733 = vst [vmem:[%s3855_s9 + $0x320] sm:$0xff] %v1605_v20  ;;  %v1348_v27 = vmul.f32 %v3836_v7, %v1119_v23  ;;  %v1347_v28 = vmul.f32 %v3836_v7, %v1114_v24  ;;  %v1490_v20 = vadd.f32 %v3829_v4, %v457_v12  ;;  %v459_v24 = vld [vmem:[%s3824_s22 + $0x398] sm:$0xff]  ;;  %v466_v12 = vld [vmem:[%s3824_s22 + $0x3d0] sm:$0xff] }
 0x164   : > { %1906 = vperm.xlu1 %3269, %v3306_v29   ;;  %1910 = vperm.xlu0 %3268, %v3307_v30   ;;  %v3317_v29 = vld [vmem:[%s3751_s17 + $0x178] sm:$0xff] }
 0x165   : > { %v1608_v31 = vadd.f32 %v1480_v21, %v1348_v27  ;;  %v1607_v32 = vadd.f32 %v1479_v22, %v1347_v28  ;;  %v1489_v21 = vadd.f32 %v3829_v4, %v456_v13  ;;  %v3316_v28 = vld [vmem:[%s3751_s17 + $0x170] sm:$0xff] }
 0x166   : > { %v1129_v35 = vpop.permute.xlu1 %1128  ;;  %v1124_v36 = vpop.permute.xlu0 %1123 }
 0x167   : > { %1736 = vst [vmem:[%s3855_s9 + $0x338] sm:$0xff] %v1608_v31  ;;  %1735 = vst [vmem:[%s3855_s9 + $0x330] sm:$0xff] %v1607_v32  ;;  %v1350_v39 = vmul.f32 %v3836_v7, %v1129_v35  ;;  %v1349_v40 = vmul.f32 %v3836_v7, %v1124_v36  ;;  %v1492_v32 = vadd.f32 %v3829_v4, %v459_v24  ;;  %v461_v36 = vld [vmem:[%s3824_s22 + $0x3a8] sm:$0xff]  ;;  %v468_v24 = vld [vmem:[%s3824_s22 + $0x3e0] sm:$0xff] }
 0x168   : > { %1914 = vperm.xlu1 %3269, %v3308_v41   ;;  %1918 = vperm.xlu0 %3268, %v3309_v42   ;;  %v3319_v41 = vld [vmem:[%s3751_s17 + $0x188] sm:$0xff] }
 0x169   : > { %v1610_v43 = vadd.f32 %v1482_v33, %v1350_v39  ;;  %v1609_v44 = vadd.f32 %v1481_v34, %v1349_v40  ;;  %v1491_v33 = vadd.f32 %v3829_v4, %v458_v25  ;;  %v3318_v40 = vld [vmem:[%s3751_s17 + $0x180] sm:$0xff] }
 0x16a   : > { %v1139_v47 = vpop.permute.xlu1 %1138  ;;  %v1134_v48 = vpop.permute.xlu0 %1133 }
 0x16b   : > { %1738 = vst [vmem:[%s3855_s9 + $0x348] sm:$0xff] %v1610_v43  ;;  %1737 = vst [vmem:[%s3855_s9 + $0x340] sm:$0xff] %v1609_v44  ;;  %v1352_v51 = vmul.f32 %v3836_v7, %v1139_v47  ;;  %v1351_v52 = vmul.f32 %v3836_v7, %v1134_v48  ;;  %v1494_v44 = vadd.f32 %v3829_v4, %v461_v36  ;;  %v463_v48 = vld [vmem:[%s3824_s22 + $0x3b8] sm:$0xff]  ;;  %v470_v36 = vld [vmem:[%s3824_s22 + $0x3f0] sm:$0xff] }
 0x16c   : > { %1922 = vperm.xlu1 %3269, %v3310_v53   ;;  %1926 = vperm.xlu0 %3268, %v3311_v54   ;;  %v3321_v53 = vld [vmem:[%s3751_s17 + $0x198] sm:$0xff] }
 0x16d   : > { %v1612_v55 = vadd.f32 %v1484_v45, %v1352_v51  ;;  %v1611_v56 = vadd.f32 %v1483_v46, %v1351_v52  ;;  %v1493_v45 = vadd.f32 %v3829_v4, %v460_v37  ;;  %v3320_v52 = vld [vmem:[%s3751_s17 + $0x190] sm:$0xff]  ;;  %v2407_v37 = vsub.s32 3, %v3811_v60 }
 0x16e   : > { %v1149_v59 = vpop.permute.xlu1 %1148  ;;  %v1144_v61 = vpop.permute.xlu0 %1143 }
 0x16f   : > { %1740 = vst [vmem:[%s3855_s9 + $0x358] sm:$0xff] %v1612_v55  ;;  %1739 = vst [vmem:[%s3855_s9 + $0x350] sm:$0xff] %v1611_v56  ;;  %v1354_v0 = vmul.f32 %v3836_v7, %v1149_v59  ;;  %v1353_v1 = vmul.f32 %v3836_v7, %v1144_v61  ;;  %v1496_v56 = vadd.f32 %v3829_v4, %v463_v48  ;;  %v465_v61 = vld [vmem:[%s3824_s22 + $0x3c8] sm:$0xff] }
 0x170   : > { %1930 = vperm.xlu1 %3269, %v3312_v2   ;;  %1934 = vperm.xlu0 %3268, %v3313_v3   ;;  %v3323_v2 = vld [vmem:[%s3751_s17 + $0x1a8] sm:$0xff] }
 0x171   : > { %v1614_v5 = vadd.f32 %v1486_v57, %v1354_v0  ;;  %v1613_v6 = vadd.f32 %v1485_v58, %v1353_v1  ;;  %v1495_v57 = vadd.f32 %v3829_v4, %v462_v49  ;;  %v3322_v1 = vld [vmem:[%s3751_s17 + $0x1a0] sm:$0xff] }
 0x172   : > { %v1159_v10 = vpop.permute.xlu1 %1158  ;;  %v1154_v11 = vpop.permute.xlu0 %1153  ;;  %v4506_v49 = vld [vmem:[%s5256_s3] sm:$0xff] }
 0x173   : > { %1742 = vst [vmem:[%s3855_s9 + $0x368] sm:$0xff] %v1614_v5  ;;  %1741 = vst [vmem:[%s3855_s9 + $0x360] sm:$0xff] %v1613_v6  ;;  %v1356_v14 = vmul.f32 %v3836_v7, %v1159_v10  ;;  %v1355_v15 = vmul.f32 %v3836_v7, %v1154_v11  ;;  %v1498_v6 = vadd.f32 %v3829_v4, %v465_v61  ;;  %v467_v11 = vld [vmem:[%s3824_s22 + $0x3d8] sm:$0xff] }
 0x174   : > { %1938 = vperm.xlu1 %3269, %v3314_v16   ;;  %1942 = vperm.xlu0 %3268, %v3315_v17   ;;  %v3325_v16 = vld [vmem:[%s3751_s17 + $0x1b8] sm:$0xff] }
 0x175   : > { %v1616_v18 = vadd.f32 %v1488_v8, %v1356_v14  ;;  %v1615_v19 = vadd.f32 %v1487_v9, %v1355_v15  ;;  %v1497_v8 = vadd.f32 %v3829_v4, %v464_v62  ;;  %v3324_v15 = vld [vmem:[%s3751_s17 + $0x1b0] sm:$0xff] }
 0x176   : > { %v1169_v22 = vpop.permute.xlu1 %1168  ;;  %v1164_v23 = vpop.permute.xlu0 %1163 }
 0x177   : > { %1744 = vst [vmem:[%s3855_s9 + $0x378] sm:$0xff] %v1616_v18  ;;  %1743 = vst [vmem:[%s3855_s9 + $0x370] sm:$0xff] %v1615_v19  ;;  %v1358_v26 = vmul.f32 %v3836_v7, %v1169_v22  ;;  %v1357_v27 = vmul.f32 %v3836_v7, %v1164_v23  ;;  %v1500_v19 = vadd.f32 %v3829_v4, %v467_v11  ;;  %v469_v23 = vld [vmem:[%s3824_s22 + $0x3e8] sm:$0xff] }
 0x178   : > { %1946 = vperm.xlu1 %3269, %v3316_v28   ;;  %1950 = vperm.xlu0 %3268, %v3317_v29   ;;  %v3327_v28 = vld [vmem:[%s3751_s17 + $0x1c8] sm:$0xff] }
 0x179   : > { %v1618_v30 = vadd.f32 %v1490_v20, %v1358_v26  ;;  %v1617_v31 = vadd.f32 %v1489_v21, %v1357_v27  ;;  %v1499_v20 = vadd.f32 %v3829_v4, %v466_v12  ;;  %v3326_v27 = vld [vmem:[%s3751_s17 + $0x1c0] sm:$0xff] }
 0x17a   : > { %v1179_v34 = vpop.permute.xlu1 %1178  ;;  %v1174_v35 = vpop.permute.xlu0 %1173 }
 0x17b   : > { %1746 = vst [vmem:[%s3855_s9 + $0x388] sm:$0xff] %v1618_v30  ;;  %1745 = vst [vmem:[%s3855_s9 + $0x380] sm:$0xff] %v1617_v31  ;;  %v1360_v38 = vmul.f32 %v3836_v7, %v1179_v34  ;;  %v1359_v39 = vmul.f32 %v3836_v7, %v1174_v35  ;;  %v1502_v31 = vadd.f32 %v3829_v4, %v469_v23  ;;  %v471_v35 = vld [vmem:[%s3824_s22 + $0x3f8] sm:$0xff] }
 0x17c   : > { %1954 = vperm.xlu1 %3269, %v3318_v40   ;;  %1958 = vperm.xlu0 %3268, %v3319_v41   ;;  %v3328_v40 = vld [vmem:[%s3751_s17 + $0x1d0] sm:$0xff]  ;;  %v3329_v41 = vld [vmem:[%s3751_s17 + $0x1d8] sm:$0xff] }
 0x17d   : > { %v1620_v42 = vadd.f32 %v1492_v32, %v1360_v38  ;;  %v1619_v43 = vadd.f32 %v1491_v33, %v1359_v39  ;;  %v1501_v32 = vadd.f32 %v3829_v4, %v468_v24 }
 0x17e   : > { %v1189_v46 = vpop.permute.xlu1 %1188  ;;  %v1184_v47 = vpop.permute.xlu0 %1183 }
 0x17f   : > { %1748 = vst [vmem:[%s3855_s9 + $0x398] sm:$0xff] %v1620_v42  ;;  %1747 = vst [vmem:[%s3855_s9 + $0x390] sm:$0xff] %v1619_v43  ;;  %v1362_v50 = vmul.f32 %v3836_v7, %v1189_v46  ;;  %v1361_v51 = vmul.f32 %v3836_v7, %v1184_v47  ;;  %v2275_v42 = vsub.s32 2, %v3811_v60  ;;  %v1503_v46 = vadd.f32 %v3829_v4, %v470_v36 }
 0x180   : > { %1962 = vperm.xlu1 %3269, %v3320_v52   ;;  %1966 = vperm.xlu0 %3268, %v3321_v53   ;;  %v3331_v52 = vld [vmem:[%s3751_s17 + $0x1e0] sm:$0xff]  ;;  %v3332_v53 = vld [vmem:[%s3751_s17 + $0x1e8] sm:$0xff] }
 0x181   : > { %v1622_v54 = vadd.f32 %v1494_v44, %v1362_v50  ;;  %v1621_v55 = vadd.f32 %v1493_v45, %v1361_v51  ;;  %v1504_v45 = vadd.f32 %v3829_v4, %v471_v35  ;;  %v4509_v50 = vrot.slane %v4506_v49, %v2407_v37 }
 0x182   : > { %v1199_v58 = vpop.permute.xlu1 %1198  ;;  %v1194_v59 = vpop.permute.xlu0 %1193 }
 0x183   : > { %1750 = vst [vmem:[%s3855_s9 + $0x3a8] sm:$0xff] %v1622_v54  ;;  %1749 = vst [vmem:[%s3855_s9 + $0x3a0] sm:$0xff] %v1621_v55  ;;  %v1364_v63 = vmul.f32 %v3836_v7, %v1199_v58  ;;  %v1363_v0 = vmul.f32 %v3836_v7, %v1194_v59  ;;  %v4518_v54 = vrot.slane %v4506_v49, %v2275_v42  ;;  %v3334_v59 = vld [vmem:[%s3824_s22] sm:$0xff] }
 0x184   : > { %1970 = vperm.xlu1 %3269, %v3322_v1   ;;  %1974 = vperm.xlu0 %3268, %v3323_v2   ;;  %v2409_v61 = vadd.f32 %v3334_v59, %v4509_v50  ;;  %v3335_v1 = vld [vmem:[%s3751_s17 + $0x1f0] sm:$0xff]  ;;  %v3336_v2 = vld [vmem:[%s3751_s17 + $0x1f8] sm:$0xff] }
 0x185   : > { %v1624_v3 = vadd.f32 %v1496_v56, %v1364_v63  ;;  %v1623_v5 = vadd.f32 %v1495_v57, %v1363_v0  ;;  %v3333_v57 = vld [vmem:[%s3824_s22 + $0x8] sm:$0xff]  ;;  %v3354_v59 = vld [vmem:[%s3824_s22 + $0x58] sm:$0xff] }
 0x186   : > { %v1209_v9 = vpop.permute.xlu1 %1208  ;;  %v1204_v10 = vpop.permute.xlu0 %1203  ;;  %v2410_v58 = vadd.f32 %v3333_v57, %v4509_v50  ;;  %v3353_v57 = vld [vmem:[%s3824_s22 + $0x50] sm:$0xff] }
 0x187   : > { %1752 = vst [vmem:[%s3855_s9 + $0x3b8] sm:$0xff] %v1624_v3  ;;  %1751 = vst [vmem:[%s3855_s9 + $0x3b0] sm:$0xff] %v1623_v5  ;;  %v1366_v13 = vmul.f32 %v3836_v7, %v1209_v9  ;;  %v1365_v14 = vmul.f32 %v3836_v7, %v1204_v10  ;;  %v3338_v9 = vld [vmem:[%s3824_s22 + $0x18] sm:$0xff] }
 0x188   : > { %1978 = vperm.xlu1 %3269, %v3324_v15   ;;  %1982 = vperm.xlu0 %3268, %v3325_v16   ;;  %v2412_v10 = vadd.f32 %v3338_v9, %v4509_v50  ;;  %v3339_v15 = vld [vmem:[%s3751_s17 + $0x200] sm:$0xff]  ;;  %v3340_v16 = vld [vmem:[%s3751_s17 + $0x208] sm:$0xff] }
 0x189   : > { %v1626_v17 = vadd.f32 %v1498_v6, %v1366_v13  ;;  %v1625_v18 = vadd.f32 %v1497_v8, %v1365_v14  ;;  %v3337_v6 = vld [vmem:[%s3824_s22 + $0x10] sm:$0xff]  ;;  %v3358_v9 = vld [vmem:[%s3824_s22 + $0x68] sm:$0xff] }
 0x18a   : > { %v1219_v21 = vpop.permute.xlu1 %1218  ;;  %v1214_v22 = vpop.permute.xlu0 %1213  ;;  %v2411_v8 = vadd.f32 %v3337_v6, %v4509_v50  ;;  %v3357_v6 = vld [vmem:[%s3824_s22 + $0x60] sm:$0xff] }
 0x18b   : > { %1754 = vst [vmem:[%s3855_s9 + $0x3c8] sm:$0xff] %v1626_v17  ;;  %1753 = vst [vmem:[%s3855_s9 + $0x3c0] sm:$0xff] %v1625_v18  ;;  %v1368_v25 = vmul.f32 %v3836_v7, %v1219_v21  ;;  %v1367_v26 = vmul.f32 %v3836_v7, %v1214_v22  ;;  %v3342_v21 = vld [vmem:[%s3824_s22 + $0x28] sm:$0xff] }
 0x18c   : > { %1986 = vperm.xlu1 %3269, %v3326_v27   ;;  %1990 = vperm.xlu0 %3268, %v3327_v28   ;;  %v2414_v22 = vadd.f32 %v3342_v21, %v4509_v50  ;;  %v3343_v27 = vld [vmem:[%s3751_s17 + $0x210] sm:$0xff]  ;;  %v3344_v28 = vld [vmem:[%s3751_s17 + $0x218] sm:$0xff] }
 0x18d   : > { %v1628_v29 = vadd.f32 %v1500_v19, %v1368_v25  ;;  %v1627_v30 = vadd.f32 %v1499_v20, %v1367_v26  ;;  %v3341_v19 = vld [vmem:[%s3824_s22 + $0x20] sm:$0xff]  ;;  %v3362_v21 = vld [vmem:[%s3824_s22 + $0x78] sm:$0xff] }
 0x18e   : > { %v1229_v33 = vpop.permute.xlu1 %1228  ;;  %v1224_v34 = vpop.permute.xlu0 %1223  ;;  %v2413_v20 = vadd.f32 %v3341_v19, %v4509_v50  ;;  %v3361_v19 = vld [vmem:[%s3824_s22 + $0x70] sm:$0xff] }
 0x18f   : > { %1756 = vst [vmem:[%s3855_s9 + $0x3d8] sm:$0xff] %v1628_v29  ;;  %1755 = vst [vmem:[%s3855_s9 + $0x3d0] sm:$0xff] %v1627_v30  ;;  %v1370_v38 = vmul.f32 %v3836_v7, %v1229_v33  ;;  %v1369_v39 = vmul.f32 %v3836_v7, %v1224_v34  ;;  %v3346_v33 = vld [vmem:[%s3824_s22 + $0x38] sm:$0xff] }
 0x190   : > { %1994 = vperm.xlu1 %3269, %v3328_v40   ;;  %1998 = vperm.xlu0 %3268, %v3329_v41   ;;  %v2416_v34 = vadd.f32 %v3346_v33, %v4509_v50  ;;  %v3348_v40 = vld [vmem:[%s3751_s17 + $0x228] sm:$0xff] }
 0x191   : > { %v1630_v43 = vadd.f32 %v1502_v31, %v1370_v38  ;;  %v1629_v44 = vadd.f32 %v1501_v32, %v1369_v39  ;;  %v3345_v31 = vld [vmem:[%s3824_s22 + $0x30] sm:$0xff]  ;;  %v3347_v39 = vld [vmem:[%s3751_s17 + $0x220] sm:$0xff]  ;;  %v3366_v33 = vld [vmem:[%s3824_s22 + $0x88] sm:$0xff] }
 0x192   : > { %v1239_v47 = vpop.permute.xlu1 %1238  ;;  %v1234_v48 = vpop.permute.xlu0 %1233  ;;  %v2415_v32 = vadd.f32 %v3345_v31, %v4509_v50  ;;  %v3365_v31 = vld [vmem:[%s3824_s22 + $0x80] sm:$0xff] }
 0x193   : > { %1758 = vst [vmem:[%s3855_s9 + $0x3e8] sm:$0xff] %v1630_v43  ;;  %1757 = vst [vmem:[%s3855_s9 + $0x3e0] sm:$0xff] %v1629_v44  ;;  %v1372_v51 = vmul.f32 %v3836_v7, %v1239_v47  ;;  %v1371_v4 = vmul.f32 %v3836_v7, %v1234_v48  ;;  %v3349_v43 = vld [vmem:[%s3824_s22 + $0x40] sm:$0xff] }
 0x194   : > { %2002 = vperm.xlu1 %3269, %v3331_v52   ;;  %2006 = vperm.xlu0 %3268, %v3332_v53   ;;  %v2417_v44 = vadd.f32 %v3349_v43, %v4509_v50  ;;  %v3351_v52 = vld [vmem:[%s3751_s17 + $0x230] sm:$0xff]  ;;  %v3352_v53 = vld [vmem:[%s3751_s17 + $0x238] sm:$0xff] }
 0x195   : > { %v1632_v55 = vadd.f32 %v1504_v45, %v1372_v51  ;;  %v1631_v56 = vadd.f32 %v1503_v46, %v1371_v4  ;;  %v3350_v45 = vld [vmem:[%s3824_s22 + $0x48] sm:$0xff]  ;;  %v3369_v43 = vld [vmem:[%s3824_s22 + $0x90] sm:$0xff] }
 0x196   : > { %v2418_v46 = vadd.f32 %v3350_v45, %v4509_v50  ;;  %v3370_v45 = vld [vmem:[%s3824_s22 + $0x98] sm:$0xff] }
 0x197   : > { %1760 = vst [vmem:[%s3855_s9 + $0x3f8] sm:$0xff] %v1632_v55  ;;  %1759 = vst [vmem:[%s3855_s9 + $0x3f0] sm:$0xff] %v1631_v56  ;;  %v1767_v7 = vpop.permute.xlu1 %1766  ;;  %v1763_v62 = vpop.permute.xlu0 %1762 }
 0x198   : > { %v2278_v63 = vmul.f32 %v4518_v54, %v1767_v7  ;;  %v2277_v0 = vmul.f32 %v4518_v54, %v1763_v62  ;;  %2010 = vperm.xlu1 %3269, %v3335_v1   ;;  %2014 = vperm.xlu0 %3268, %v3336_v2   ;;  %v3355_v1 = vld [vmem:[%s3751_s17 + $0x240] sm:$0xff]  ;;  %v3356_v2 = vld [vmem:[%s3751_s17 + $0x248] sm:$0xff] }
 0x19a   : > { %v2538_v3 = vadd.f32 %v2410_v58, %v2278_v63  ;;  %v2537_v5 = vadd.f32 %v2409_v61, %v2277_v0  ;;  %v2419_v58 = vadd.f32 %v3353_v57, %v4509_v50  ;;  %v2420_v61 = vadd.f32 %v3354_v59, %v4509_v50  ;;  %v3373_v57 = vld [vmem:[%s3824_s22 + $0xa0] sm:$0xff]  ;;  %v3374_v59 = vld [vmem:[%s3824_s22 + $0xa8] sm:$0xff] }
 0x19b   : > { %v1771_v11 = vpop.permute.xlu1 %1770  ;;  %v1775_v12 = vpop.permute.xlu0 %1774 }
 0x19c   : > { %2666 = vst [vmem:[%s4536_s16 + $0x8] sm:$0xff] %v2538_v3  ;;  %2665 = vst [vmem:[%s4536_s16] sm:$0xff] %v2537_v5  ;;  %v2279_v13 = vmul.f32 %v4518_v54, %v1771_v11  ;;  %v2280_v14 = vmul.f32 %v4518_v54, %v1775_v12  ;;  %2018 = vperm.xlu1 %3269, %v3339_v15   ;;  %2022 = vperm.xlu0 %3268, %v3340_v16   ;;  %v3359_v15 = vld [vmem:[%s3751_s17 + $0x250] sm:$0xff]  ;;  %v3360_v16 = vld [vmem:[%s3751_s17 + $0x258] sm:$0xff] }
 0x19e   : > { %v2539_v17 = vadd.f32 %v2411_v8, %v2279_v13  ;;  %v2540_v18 = vadd.f32 %v2412_v10, %v2280_v14  ;;  %v2421_v8 = vadd.f32 %v3357_v6, %v4509_v50  ;;  %v2422_v10 = vadd.f32 %v3358_v9, %v4509_v50  ;;  %v3377_v6 = vld [vmem:[%s3824_s22 + $0xb0] sm:$0xff]  ;;  %v3378_v9 = vld [vmem:[%s3824_s22 + $0xb8] sm:$0xff] }
 0x19f   : > { %v1779_v23 = vpop.permute.xlu1 %1778  ;;  %v1783_v24 = vpop.permute.xlu0 %1782 }
 0x1a0   : > { %2667 = vst [vmem:[%s4536_s16 + $0x10] sm:$0xff] %v2539_v17  ;;  %2668 = vst [vmem:[%s4536_s16 + $0x18] sm:$0xff] %v2540_v18  ;;  %v2281_v25 = vmul.f32 %v4518_v54, %v1779_v23  ;;  %v2282_v26 = vmul.f32 %v4518_v54, %v1783_v24  ;;  %2026 = vperm.xlu1 %3269, %v3343_v27   ;;  %2030 = vperm.xlu0 %3268, %v3344_v28   ;;  %v3363_v27 = vld [vmem:[%s3751_s17 + $0x260] sm:$0xff]  ;;  %v3364_v28 = vld [vmem:[%s3751_s17 + $0x268] sm:$0xff] }
 0x1a2   : > { %v2541_v29 = vadd.f32 %v2413_v20, %v2281_v25  ;;  %v2542_v30 = vadd.f32 %v2414_v22, %v2282_v26  ;;  %v2423_v20 = vadd.f32 %v3361_v19, %v4509_v50  ;;  %v2424_v22 = vadd.f32 %v3362_v21, %v4509_v50  ;;  %v3381_v19 = vld [vmem:[%s3824_s22 + $0xc0] sm:$0xff]  ;;  %v3382_v21 = vld [vmem:[%s3824_s22 + $0xc8] sm:$0xff] }
 0x1a3   : > { %v1787_v35 = vpop.permute.xlu1 %1786  ;;  %v1791_v36 = vpop.permute.xlu0 %1790 }
 0x1a4   : > { %2669 = vst [vmem:[%s4536_s16 + $0x20] sm:$0xff] %v2541_v29  ;;  %2670 = vst [vmem:[%s4536_s16 + $0x28] sm:$0xff] %v2542_v30  ;;  %v2283_v37 = vmul.f32 %v4518_v54, %v1787_v35  ;;  %v2284_v38 = vmul.f32 %v4518_v54, %v1791_v36  ;;  %2034 = vperm.xlu1 %3269, %v3347_v39   ;;  %2038 = vperm.xlu0 %3268, %v3348_v40   ;;  %v3367_v39 = vld [vmem:[%s3751_s17 + $0x270] sm:$0xff]  ;;  %v3368_v40 = vld [vmem:[%s3751_s17 + $0x278] sm:$0xff] }
 0x1a6   : > { %v2543_v41 = vadd.f32 %v2415_v32, %v2283_v37  ;;  %v2544_v42 = vadd.f32 %v2416_v34, %v2284_v38  ;;  %v2425_v32 = vadd.f32 %v3365_v31, %v4509_v50  ;;  %v2426_v34 = vadd.f32 %v3366_v33, %v4509_v50  ;;  %v3385_v31 = vld [vmem:[%s3824_s22 + $0xd0] sm:$0xff]  ;;  %v3386_v33 = vld [vmem:[%s3824_s22 + $0xd8] sm:$0xff] }
 0x1a7   : > { %v1795_v47 = vpop.permute.xlu1 %1794  ;;  %v1799_v48 = vpop.permute.xlu0 %1798 }
 0x1a8   : > { %2671 = vst [vmem:[%s4536_s16 + $0x30] sm:$0xff] %v2543_v41  ;;  %2672 = vst [vmem:[%s4536_s16 + $0x38] sm:$0xff] %v2544_v42  ;;  %v2285_v51 = vmul.f32 %v4518_v54, %v1795_v47  ;;  %v2286_v4 = vmul.f32 %v4518_v54, %v1799_v48  ;;  %2042 = vperm.xlu1 %3269, %v3351_v52   ;;  %2046 = vperm.xlu0 %3268, %v3352_v53   ;;  %v3371_v52 = vld [vmem:[%s3751_s17 + $0x280] sm:$0xff]  ;;  %v3372_v53 = vld [vmem:[%s3751_s17 + $0x288] sm:$0xff] }
 0x1aa   : > { %v2545_v55 = vadd.f32 %v2417_v44, %v2285_v51  ;;  %v2546_v56 = vadd.f32 %v2418_v46, %v2286_v4  ;;  %v2427_v44 = vadd.f32 %v3369_v43, %v4509_v50  ;;  %v2428_v46 = vadd.f32 %v3370_v45, %v4509_v50  ;;  %v3389_v43 = vld [vmem:[%s3824_s22 + $0xe0] sm:$0xff]  ;;  %v3390_v45 = vld [vmem:[%s3824_s22 + $0xe8] sm:$0xff] }
 0x1ab   : > { %v1803_v7 = vpop.permute.xlu1 %1802  ;;  %v1807_v62 = vpop.permute.xlu0 %1806 }
 0x1ac   : > { %2673 = vst [vmem:[%s4536_s16 + $0x40] sm:$0xff] %v2545_v55  ;;  %2674 = vst [vmem:[%s4536_s16 + $0x48] sm:$0xff] %v2546_v56  ;;  %v2287_v63 = vmul.f32 %v4518_v54, %v1803_v7  ;;  %v2288_v0 = vmul.f32 %v4518_v54, %v1807_v62  ;;  %2050 = vperm.xlu1 %3269, %v3355_v1   ;;  %2054 = vperm.xlu0 %3268, %v3356_v2   ;;  %v3375_v1 = vld [vmem:[%s3751_s17 + $0x290] sm:$0xff]  ;;  %v3376_v2 = vld [vmem:[%s3751_s17 + $0x298] sm:$0xff] }
 0x1ae   : > { %v2547_v3 = vadd.f32 %v2419_v58, %v2287_v63  ;;  %v2548_v5 = vadd.f32 %v2420_v61, %v2288_v0  ;;  %v2429_v58 = vadd.f32 %v3373_v57, %v4509_v50  ;;  %v2430_v61 = vadd.f32 %v3374_v59, %v4509_v50  ;;  %v3393_v57 = vld [vmem:[%s3824_s22 + $0xf0] sm:$0xff]  ;;  %v3394_v59 = vld [vmem:[%s3824_s22 + $0xf8] sm:$0xff] }
 0x1af   : > { %v1811_v11 = vpop.permute.xlu1 %1810  ;;  %v1815_v12 = vpop.permute.xlu0 %1814 }
 0x1b0   : > { %2675 = vst [vmem:[%s4536_s16 + $0x50] sm:$0xff] %v2547_v3  ;;  %2676 = vst [vmem:[%s4536_s16 + $0x58] sm:$0xff] %v2548_v5  ;;  %v2289_v13 = vmul.f32 %v4518_v54, %v1811_v11  ;;  %v2290_v14 = vmul.f32 %v4518_v54, %v1815_v12  ;;  %2058 = vperm.xlu1 %3269, %v3359_v15   ;;  %2062 = vperm.xlu0 %3268, %v3360_v16   ;;  %v3379_v15 = vld [vmem:[%s3751_s17 + $0x2a0] sm:$0xff]  ;;  %v3380_v16 = vld [vmem:[%s3751_s17 + $0x2a8] sm:$0xff] }
 0x1b2   : > { %v2549_v17 = vadd.f32 %v2421_v8, %v2289_v13  ;;  %v2550_v18 = vadd.f32 %v2422_v10, %v2290_v14  ;;  %v2431_v8 = vadd.f32 %v3377_v6, %v4509_v50  ;;  %v2432_v10 = vadd.f32 %v3378_v9, %v4509_v50  ;;  %v3397_v6 = vld [vmem:[%s3824_s22 + $0x100] sm:$0xff]  ;;  %v3398_v9 = vld [vmem:[%s3824_s22 + $0x108] sm:$0xff] }
 0x1b3   : > { %v1819_v23 = vpop.permute.xlu1 %1818  ;;  %v1823_v24 = vpop.permute.xlu0 %1822 }
 0x1b4   : > { %2677 = vst [vmem:[%s4536_s16 + $0x60] sm:$0xff] %v2549_v17  ;;  %2678 = vst [vmem:[%s4536_s16 + $0x68] sm:$0xff] %v2550_v18  ;;  %v2291_v25 = vmul.f32 %v4518_v54, %v1819_v23  ;;  %v2292_v26 = vmul.f32 %v4518_v54, %v1823_v24  ;;  %2066 = vperm.xlu1 %3269, %v3363_v27   ;;  %2070 = vperm.xlu0 %3268, %v3364_v28   ;;  %v3383_v27 = vld [vmem:[%s3751_s17 + $0x2b0] sm:$0xff]  ;;  %v3384_v28 = vld [vmem:[%s3751_s17 + $0x2b8] sm:$0xff] }
 0x1b6   : > { %v2551_v29 = vadd.f32 %v2423_v20, %v2291_v25  ;;  %v2552_v30 = vadd.f32 %v2424_v22, %v2292_v26  ;;  %v2433_v20 = vadd.f32 %v3381_v19, %v4509_v50  ;;  %v2434_v22 = vadd.f32 %v3382_v21, %v4509_v50  ;;  %v3401_v19 = vld [vmem:[%s3824_s22 + $0x110] sm:$0xff]  ;;  %v3402_v21 = vld [vmem:[%s3824_s22 + $0x118] sm:$0xff] }
 0x1b7   : > { %v1827_v35 = vpop.permute.xlu1 %1826  ;;  %v1831_v36 = vpop.permute.xlu0 %1830 }
 0x1b8   : > { %2679 = vst [vmem:[%s4536_s16 + $0x70] sm:$0xff] %v2551_v29  ;;  %2680 = vst [vmem:[%s4536_s16 + $0x78] sm:$0xff] %v2552_v30  ;;  %v2293_v37 = vmul.f32 %v4518_v54, %v1827_v35  ;;  %v2294_v38 = vmul.f32 %v4518_v54, %v1831_v36  ;;  %2074 = vperm.xlu1 %3269, %v3367_v39   ;;  %2078 = vperm.xlu0 %3268, %v3368_v40   ;;  %v3387_v39 = vld [vmem:[%s3751_s17 + $0x2c0] sm:$0xff]  ;;  %v3388_v40 = vld [vmem:[%s3751_s17 + $0x2c8] sm:$0xff] }
 0x1ba   : > { %v2553_v41 = vadd.f32 %v2425_v32, %v2293_v37  ;;  %v2554_v42 = vadd.f32 %v2426_v34, %v2294_v38  ;;  %v2435_v32 = vadd.f32 %v3385_v31, %v4509_v50  ;;  %v2436_v34 = vadd.f32 %v3386_v33, %v4509_v50  ;;  %v3405_v31 = vld [vmem:[%s3824_s22 + $0x120] sm:$0xff]  ;;  %v3406_v33 = vld [vmem:[%s3824_s22 + $0x128] sm:$0xff] }
 0x1bb   : > { %v1835_v47 = vpop.permute.xlu1 %1834  ;;  %v1839_v48 = vpop.permute.xlu0 %1838 }
 0x1bc   : > { %2681 = vst [vmem:[%s4536_s16 + $0x80] sm:$0xff] %v2553_v41  ;;  %2682 = vst [vmem:[%s4536_s16 + $0x88] sm:$0xff] %v2554_v42  ;;  %v2295_v51 = vmul.f32 %v4518_v54, %v1835_v47  ;;  %v2296_v4 = vmul.f32 %v4518_v54, %v1839_v48  ;;  %2082 = vperm.xlu1 %3269, %v3371_v52   ;;  %2086 = vperm.xlu0 %3268, %v3372_v53   ;;  %v3391_v52 = vld [vmem:[%s3751_s17 + $0x2d0] sm:$0xff]  ;;  %v3392_v53 = vld [vmem:[%s3751_s17 + $0x2d8] sm:$0xff] }
 0x1be   : > { %v2555_v55 = vadd.f32 %v2427_v44, %v2295_v51  ;;  %v2556_v56 = vadd.f32 %v2428_v46, %v2296_v4  ;;  %v2437_v44 = vadd.f32 %v3389_v43, %v4509_v50  ;;  %v2438_v46 = vadd.f32 %v3390_v45, %v4509_v50  ;;  %v3409_v43 = vld [vmem:[%s3824_s22 + $0x130] sm:$0xff]  ;;  %v3410_v45 = vld [vmem:[%s3824_s22 + $0x138] sm:$0xff] }
 0x1bf   : > { %v1843_v7 = vpop.permute.xlu1 %1842  ;;  %v1847_v62 = vpop.permute.xlu0 %1846 }
 0x1c0   : > { %2683 = vst [vmem:[%s4536_s16 + $0x90] sm:$0xff] %v2555_v55  ;;  %2684 = vst [vmem:[%s4536_s16 + $0x98] sm:$0xff] %v2556_v56  ;;  %v2297_v63 = vmul.f32 %v4518_v54, %v1843_v7  ;;  %v2298_v0 = vmul.f32 %v4518_v54, %v1847_v62  ;;  %2090 = vperm.xlu1 %3269, %v3375_v1   ;;  %2094 = vperm.xlu0 %3268, %v3376_v2   ;;  %v3395_v1 = vld [vmem:[%s3751_s17 + $0x2e0] sm:$0xff]  ;;  %v3396_v2 = vld [vmem:[%s3751_s17 + $0x2e8] sm:$0xff] }
 0x1c2   : > { %v2557_v3 = vadd.f32 %v2429_v58, %v2297_v63  ;;  %v2558_v5 = vadd.f32 %v2430_v61, %v2298_v0  ;;  %v2439_v58 = vadd.f32 %v3393_v57, %v4509_v50  ;;  %v2440_v61 = vadd.f32 %v3394_v59, %v4509_v50  ;;  %v3413_v57 = vld [vmem:[%s3824_s22 + $0x140] sm:$0xff]  ;;  %v3414_v59 = vld [vmem:[%s3824_s22 + $0x148] sm:$0xff] }
 0x1c3   : > { %v1851_v11 = vpop.permute.xlu1 %1850  ;;  %v1855_v12 = vpop.permute.xlu0 %1854 }
 0x1c4   : > { %2685 = vst [vmem:[%s4536_s16 + $0xa0] sm:$0xff] %v2557_v3  ;;  %2686 = vst [vmem:[%s4536_s16 + $0xa8] sm:$0xff] %v2558_v5  ;;  %v2299_v13 = vmul.f32 %v4518_v54, %v1851_v11  ;;  %v2300_v14 = vmul.f32 %v4518_v54, %v1855_v12  ;;  %2098 = vperm.xlu1 %3269, %v3379_v15   ;;  %2102 = vperm.xlu0 %3268, %v3380_v16   ;;  %v3399_v15 = vld [vmem:[%s3751_s17 + $0x2f0] sm:$0xff]  ;;  %v3400_v16 = vld [vmem:[%s3751_s17 + $0x2f8] sm:$0xff] }
 0x1c6   : > { %v2559_v17 = vadd.f32 %v2431_v8, %v2299_v13  ;;  %v2560_v18 = vadd.f32 %v2432_v10, %v2300_v14  ;;  %v2441_v8 = vadd.f32 %v3397_v6, %v4509_v50  ;;  %v2442_v10 = vadd.f32 %v3398_v9, %v4509_v50  ;;  %v3417_v6 = vld [vmem:[%s3824_s22 + $0x150] sm:$0xff]  ;;  %v3418_v9 = vld [vmem:[%s3824_s22 + $0x158] sm:$0xff] }
 0x1c7   : > { %v1859_v23 = vpop.permute.xlu1 %1858  ;;  %v1863_v24 = vpop.permute.xlu0 %1862 }
 0x1c8   : > { %2687 = vst [vmem:[%s4536_s16 + $0xb0] sm:$0xff] %v2559_v17  ;;  %2688 = vst [vmem:[%s4536_s16 + $0xb8] sm:$0xff] %v2560_v18  ;;  %v2301_v25 = vmul.f32 %v4518_v54, %v1859_v23  ;;  %v2302_v26 = vmul.f32 %v4518_v54, %v1863_v24  ;;  %2106 = vperm.xlu1 %3269, %v3383_v27   ;;  %2110 = vperm.xlu0 %3268, %v3384_v28   ;;  %v3403_v27 = vld [vmem:[%s3751_s17 + $0x300] sm:$0xff]  ;;  %v3404_v28 = vld [vmem:[%s3751_s17 + $0x308] sm:$0xff] }
 0x1ca   : > { %v2561_v29 = vadd.f32 %v2433_v20, %v2301_v25  ;;  %v2562_v30 = vadd.f32 %v2434_v22, %v2302_v26  ;;  %v2443_v20 = vadd.f32 %v3401_v19, %v4509_v50  ;;  %v2444_v22 = vadd.f32 %v3402_v21, %v4509_v50  ;;  %v3421_v19 = vld [vmem:[%s3824_s22 + $0x160] sm:$0xff]  ;;  %v3422_v21 = vld [vmem:[%s3824_s22 + $0x168] sm:$0xff] }
 0x1cb   : > { %v1867_v35 = vpop.permute.xlu1 %1866  ;;  %v1871_v36 = vpop.permute.xlu0 %1870 }
 0x1cc   : > { %2689 = vst [vmem:[%s4536_s16 + $0xc0] sm:$0xff] %v2561_v29  ;;  %2690 = vst [vmem:[%s4536_s16 + $0xc8] sm:$0xff] %v2562_v30  ;;  %v2303_v37 = vmul.f32 %v4518_v54, %v1867_v35  ;;  %v2304_v38 = vmul.f32 %v4518_v54, %v1871_v36  ;;  %2114 = vperm.xlu1 %3269, %v3387_v39   ;;  %2118 = vperm.xlu0 %3268, %v3388_v40   ;;  %v3407_v39 = vld [vmem:[%s3751_s17 + $0x310] sm:$0xff]  ;;  %v3408_v40 = vld [vmem:[%s3751_s17 + $0x318] sm:$0xff] }
 0x1ce   : > { %v2563_v41 = vadd.f32 %v2435_v32, %v2303_v37  ;;  %v2564_v42 = vadd.f32 %v2436_v34, %v2304_v38  ;;  %v2445_v32 = vadd.f32 %v3405_v31, %v4509_v50  ;;  %v2446_v34 = vadd.f32 %v3406_v33, %v4509_v50  ;;  %v3425_v31 = vld [vmem:[%s3824_s22 + $0x170] sm:$0xff]  ;;  %v3426_v33 = vld [vmem:[%s3824_s22 + $0x178] sm:$0xff] }
 0x1cf   : > { %v1875_v47 = vpop.permute.xlu1 %1874  ;;  %v1879_v48 = vpop.permute.xlu0 %1878 }
 0x1d0   : > { %2691 = vst [vmem:[%s4536_s16 + $0xd0] sm:$0xff] %v2563_v41  ;;  %2692 = vst [vmem:[%s4536_s16 + $0xd8] sm:$0xff] %v2564_v42  ;;  %v2305_v51 = vmul.f32 %v4518_v54, %v1875_v47  ;;  %v2306_v4 = vmul.f32 %v4518_v54, %v1879_v48  ;;  %2122 = vperm.xlu1 %3269, %v3391_v52   ;;  %2126 = vperm.xlu0 %3268, %v3392_v53   ;;  %v3411_v52 = vld [vmem:[%s3751_s17 + $0x320] sm:$0xff]  ;;  %v3412_v53 = vld [vmem:[%s3751_s17 + $0x328] sm:$0xff] }
 0x1d2   : > { %v2565_v55 = vadd.f32 %v2437_v44, %v2305_v51  ;;  %v2566_v56 = vadd.f32 %v2438_v46, %v2306_v4  ;;  %v2447_v44 = vadd.f32 %v3409_v43, %v4509_v50  ;;  %v2448_v46 = vadd.f32 %v3410_v45, %v4509_v50  ;;  %v3429_v43 = vld [vmem:[%s3824_s22 + $0x180] sm:$0xff]  ;;  %v3430_v45 = vld [vmem:[%s3824_s22 + $0x188] sm:$0xff] }
 0x1d3   : > { %v1883_v7 = vpop.permute.xlu1 %1882  ;;  %v1887_v62 = vpop.permute.xlu0 %1886 }
 0x1d4   : > { %2693 = vst [vmem:[%s4536_s16 + $0xe0] sm:$0xff] %v2565_v55  ;;  %2694 = vst [vmem:[%s4536_s16 + $0xe8] sm:$0xff] %v2566_v56  ;;  %v2307_v63 = vmul.f32 %v4518_v54, %v1883_v7  ;;  %v2308_v0 = vmul.f32 %v4518_v54, %v1887_v62  ;;  %2130 = vperm.xlu1 %3269, %v3395_v1   ;;  %2134 = vperm.xlu0 %3268, %v3396_v2   ;;  %v3415_v1 = vld [vmem:[%s3751_s17 + $0x330] sm:$0xff]  ;;  %v3416_v2 = vld [vmem:[%s3751_s17 + $0x338] sm:$0xff] }
 0x1d6   : > { %v2567_v3 = vadd.f32 %v2439_v58, %v2307_v63  ;;  %v2568_v5 = vadd.f32 %v2440_v61, %v2308_v0  ;;  %v2449_v58 = vadd.f32 %v3413_v57, %v4509_v50  ;;  %v2450_v61 = vadd.f32 %v3414_v59, %v4509_v50  ;;  %v3433_v57 = vld [vmem:[%s3824_s22 + $0x190] sm:$0xff]  ;;  %v3434_v59 = vld [vmem:[%s3824_s22 + $0x198] sm:$0xff] }
 0x1d7   : > { %v1891_v11 = vpop.permute.xlu1 %1890  ;;  %v1895_v12 = vpop.permute.xlu0 %1894 }
 0x1d8   : > { %2695 = vst [vmem:[%s4536_s16 + $0xf0] sm:$0xff] %v2567_v3  ;;  %2696 = vst [vmem:[%s4536_s16 + $0xf8] sm:$0xff] %v2568_v5  ;;  %v2309_v13 = vmul.f32 %v4518_v54, %v1891_v11  ;;  %v2310_v14 = vmul.f32 %v4518_v54, %v1895_v12  ;;  %2138 = vperm.xlu1 %3269, %v3399_v15   ;;  %2142 = vperm.xlu0 %3268, %v3400_v16   ;;  %v3419_v15 = vld [vmem:[%s3751_s17 + $0x340] sm:$0xff]  ;;  %v3420_v16 = vld [vmem:[%s3751_s17 + $0x348] sm:$0xff] }
 0x1da   : > { %v2569_v17 = vadd.f32 %v2441_v8, %v2309_v13  ;;  %v2570_v18 = vadd.f32 %v2442_v10, %v2310_v14  ;;  %v2451_v8 = vadd.f32 %v3417_v6, %v4509_v50  ;;  %v2452_v10 = vadd.f32 %v3418_v9, %v4509_v50  ;;  %v3437_v6 = vld [vmem:[%s3824_s22 + $0x1a0] sm:$0xff]  ;;  %v3438_v9 = vld [vmem:[%s3824_s22 + $0x1a8] sm:$0xff] }
 0x1db   : > { %v1899_v23 = vpop.permute.xlu1 %1898  ;;  %v1903_v24 = vpop.permute.xlu0 %1902 }
 0x1dc   : > { %2697 = vst [vmem:[%s4536_s16 + $0x100] sm:$0xff] %v2569_v17  ;;  %2698 = vst [vmem:[%s4536_s16 + $0x108] sm:$0xff] %v2570_v18  ;;  %v2311_v25 = vmul.f32 %v4518_v54, %v1899_v23  ;;  %v2312_v26 = vmul.f32 %v4518_v54, %v1903_v24  ;;  %2146 = vperm.xlu1 %3269, %v3403_v27   ;;  %2150 = vperm.xlu0 %3268, %v3404_v28   ;;  %v3423_v27 = vld [vmem:[%s3751_s17 + $0x350] sm:$0xff]  ;;  %v3424_v28 = vld [vmem:[%s3751_s17 + $0x358] sm:$0xff] }
 0x1de   : > { %v2571_v29 = vadd.f32 %v2443_v20, %v2311_v25  ;;  %v2572_v30 = vadd.f32 %v2444_v22, %v2312_v26  ;;  %v2453_v20 = vadd.f32 %v3421_v19, %v4509_v50  ;;  %v2454_v22 = vadd.f32 %v3422_v21, %v4509_v50  ;;  %v3441_v19 = vld [vmem:[%s3824_s22 + $0x1b0] sm:$0xff]  ;;  %v3442_v21 = vld [vmem:[%s3824_s22 + $0x1b8] sm:$0xff] }
 0x1df   : > { %v1907_v35 = vpop.permute.xlu1 %1906  ;;  %v1911_v36 = vpop.permute.xlu0 %1910 }
 0x1e0   : > { %2699 = vst [vmem:[%s4536_s16 + $0x110] sm:$0xff] %v2571_v29  ;;  %2700 = vst [vmem:[%s4536_s16 + $0x118] sm:$0xff] %v2572_v30  ;;  %v2313_v37 = vmul.f32 %v4518_v54, %v1907_v35  ;;  %v2314_v38 = vmul.f32 %v4518_v54, %v1911_v36  ;;  %2154 = vperm.xlu1 %3269, %v3407_v39   ;;  %2158 = vperm.xlu0 %3268, %v3408_v40   ;;  %v3427_v39 = vld [vmem:[%s3751_s17 + $0x360] sm:$0xff]  ;;  %v3428_v40 = vld [vmem:[%s3751_s17 + $0x368] sm:$0xff] }
 0x1e2   : > { %v2573_v41 = vadd.f32 %v2445_v32, %v2313_v37  ;;  %v2574_v42 = vadd.f32 %v2446_v34, %v2314_v38  ;;  %v2455_v32 = vadd.f32 %v3425_v31, %v4509_v50  ;;  %v2456_v34 = vadd.f32 %v3426_v33, %v4509_v50  ;;  %v3445_v31 = vld [vmem:[%s3824_s22 + $0x1c0] sm:$0xff]  ;;  %v3446_v33 = vld [vmem:[%s3824_s22 + $0x1c8] sm:$0xff] }
 0x1e3   : > { %v1915_v47 = vpop.permute.xlu1 %1914  ;;  %v1919_v48 = vpop.permute.xlu0 %1918 }
 0x1e4   : > { %2701 = vst [vmem:[%s4536_s16 + $0x120] sm:$0xff] %v2573_v41  ;;  %2702 = vst [vmem:[%s4536_s16 + $0x128] sm:$0xff] %v2574_v42  ;;  %v2315_v51 = vmul.f32 %v4518_v54, %v1915_v47  ;;  %v2316_v4 = vmul.f32 %v4518_v54, %v1919_v48  ;;  %2162 = vperm.xlu1 %3269, %v3411_v52   ;;  %2166 = vperm.xlu0 %3268, %v3412_v53   ;;  %v3431_v52 = vld [vmem:[%s3751_s17 + $0x370] sm:$0xff]  ;;  %v3432_v53 = vld [vmem:[%s3751_s17 + $0x378] sm:$0xff] }
 0x1e6   : > { %v2575_v55 = vadd.f32 %v2447_v44, %v2315_v51  ;;  %v2576_v56 = vadd.f32 %v2448_v46, %v2316_v4  ;;  %v2457_v44 = vadd.f32 %v3429_v43, %v4509_v50  ;;  %v2458_v46 = vadd.f32 %v3430_v45, %v4509_v50  ;;  %v3449_v43 = vld [vmem:[%s3824_s22 + $0x1d0] sm:$0xff]  ;;  %v3450_v45 = vld [vmem:[%s3824_s22 + $0x1d8] sm:$0xff] }
 0x1e7   : > { %v1923_v7 = vpop.permute.xlu1 %1922  ;;  %v1927_v62 = vpop.permute.xlu0 %1926 }
 0x1e8   : > { %2703 = vst [vmem:[%s4536_s16 + $0x130] sm:$0xff] %v2575_v55  ;;  %2704 = vst [vmem:[%s4536_s16 + $0x138] sm:$0xff] %v2576_v56  ;;  %v2317_v63 = vmul.f32 %v4518_v54, %v1923_v7  ;;  %v2318_v0 = vmul.f32 %v4518_v54, %v1927_v62  ;;  %2170 = vperm.xlu1 %3269, %v3415_v1   ;;  %2174 = vperm.xlu0 %3268, %v3416_v2   ;;  %v3435_v1 = vld [vmem:[%s3751_s17 + $0x380] sm:$0xff]  ;;  %v3436_v2 = vld [vmem:[%s3751_s17 + $0x388] sm:$0xff] }
 0x1ea   : > { %v2577_v3 = vadd.f32 %v2449_v58, %v2317_v63  ;;  %v2578_v5 = vadd.f32 %v2450_v61, %v2318_v0  ;;  %v2459_v58 = vadd.f32 %v3433_v57, %v4509_v50  ;;  %v2460_v61 = vadd.f32 %v3434_v59, %v4509_v50 }
 0x1eb   : > { %v1931_v11 = vpop.permute.xlu1 %1930  ;;  %v1935_v12 = vpop.permute.xlu0 %1934 }
 0x1ec   : > { %2705 = vst [vmem:[%s4536_s16 + $0x140] sm:$0xff] %v2577_v3  ;;  %2706 = vst [vmem:[%s4536_s16 + $0x148] sm:$0xff] %v2578_v5  ;;  %v2319_v13 = vmul.f32 %v4518_v54, %v1931_v11  ;;  %v2320_v14 = vmul.f32 %v4518_v54, %v1935_v12  ;;  %2178 = vperm.xlu1 %3269, %v3419_v15   ;;  %2182 = vperm.xlu0 %3268, %v3420_v16   ;;  %v3439_v15 = vld [vmem:[%s3751_s17 + $0x390] sm:$0xff]  ;;  %v3440_v16 = vld [vmem:[%s3751_s17 + $0x398] sm:$0xff] }
 0x1ee   : > { %v2579_v17 = vadd.f32 %v2451_v8, %v2319_v13  ;;  %v2580_v18 = vadd.f32 %v2452_v10, %v2320_v14  ;;  %v2461_v8 = vadd.f32 %v3437_v6, %v4509_v50  ;;  %v2462_v10 = vadd.f32 %v3438_v9, %v4509_v50 }
 0x1ef   : > { %v1939_v23 = vpop.permute.xlu1 %1938  ;;  %v1943_v24 = vpop.permute.xlu0 %1942 }
 0x1f0   : > { %2707 = vst [vmem:[%s4536_s16 + $0x150] sm:$0xff] %v2579_v17  ;;  %2708 = vst [vmem:[%s4536_s16 + $0x158] sm:$0xff] %v2580_v18  ;;  %v2321_v25 = vmul.f32 %v4518_v54, %v1939_v23  ;;  %v2322_v26 = vmul.f32 %v4518_v54, %v1943_v24  ;;  %2186 = vperm.xlu1 %3269, %v3423_v27   ;;  %2190 = vperm.xlu0 %3268, %v3424_v28   ;;  %v3443_v27 = vld [vmem:[%s3751_s17 + $0x3a0] sm:$0xff]  ;;  %v3444_v28 = vld [vmem:[%s3751_s17 + $0x3a8] sm:$0xff] }
 0x1f2   : > { %v2581_v29 = vadd.f32 %v2453_v20, %v2321_v25  ;;  %v2582_v30 = vadd.f32 %v2454_v22, %v2322_v26  ;;  %v2463_v20 = vadd.f32 %v3441_v19, %v4509_v50  ;;  %v2464_v22 = vadd.f32 %v3442_v21, %v4509_v50  ;;  %v3459_v19 = vld [vmem:[%s3751_s17 + $0x3e0] sm:$0xff] }
 0x1f3   : > { %v1947_v35 = vpop.permute.xlu1 %1946  ;;  %v1951_v36 = vpop.permute.xlu0 %1950 }
 0x1f4   : > { %2709 = vst [vmem:[%s4536_s16 + $0x160] sm:$0xff] %v2581_v29  ;;  %2710 = vst [vmem:[%s4536_s16 + $0x168] sm:$0xff] %v2582_v30  ;;  %v2323_v37 = vmul.f32 %v4518_v54, %v1947_v35  ;;  %v2324_v38 = vmul.f32 %v4518_v54, %v1951_v36  ;;  %2194 = vperm.xlu1 %3269, %v3427_v39   ;;  %2198 = vperm.xlu0 %3268, %v3428_v40   ;;  %v3447_v39 = vld [vmem:[%s3751_s17 + $0x3b0] sm:$0xff]  ;;  %v3448_v40 = vld [vmem:[%s3751_s17 + $0x3b8] sm:$0xff] }
 0x1f6   : > { %v2583_v41 = vadd.f32 %v2455_v32, %v2323_v37  ;;  %v2584_v42 = vadd.f32 %v2456_v34, %v2324_v38  ;;  %v2465_v32 = vadd.f32 %v3445_v31, %v4509_v50  ;;  %v2466_v34 = vadd.f32 %v3446_v33, %v4509_v50 }
 0x1f7   : > { %v1955_v47 = vpop.permute.xlu1 %1954  ;;  %v1959_v48 = vpop.permute.xlu0 %1958 }
 0x1f8   : > { %2711 = vst [vmem:[%s4536_s16 + $0x170] sm:$0xff] %v2583_v41  ;;  %2712 = vst [vmem:[%s4536_s16 + $0x178] sm:$0xff] %v2584_v42  ;;  %v2325_v51 = vmul.f32 %v4518_v54, %v1955_v47  ;;  %v2326_v4 = vmul.f32 %v4518_v54, %v1959_v48  ;;  %2202 = vperm.xlu1 %3269, %v3431_v52   ;;  %2206 = vperm.xlu0 %3268, %v3432_v53   ;;  %v3451_v52 = vld [vmem:[%s3751_s17 + $0x3c0] sm:$0xff]  ;;  %v3452_v53 = vld [vmem:[%s3751_s17 + $0x3c8] sm:$0xff] }
 0x1fa   : > { %v2585_v55 = vadd.f32 %v2457_v44, %v2325_v51  ;;  %v2586_v56 = vadd.f32 %v2458_v46, %v2326_v4  ;;  %v2467_v44 = vadd.f32 %v3449_v43, %v4509_v50  ;;  %v2468_v46 = vadd.f32 %v3450_v45, %v4509_v50 }
 0x1fb   : > { %v1963_v7 = vpop.permute.xlu1 %1962  ;;  %v1967_v62 = vpop.permute.xlu0 %1966 }
 0x1fc   : > { %2713 = vst [vmem:[%s4536_s16 + $0x180] sm:$0xff] %v2585_v55  ;;  %2714 = vst [vmem:[%s4536_s16 + $0x188] sm:$0xff] %v2586_v56  ;;  %v2327_v63 = vmul.f32 %v4518_v54, %v1963_v7  ;;  %v2328_v0 = vmul.f32 %v4518_v54, %v1967_v62  ;;  %2210 = vperm.xlu1 %3269, %v3435_v1   ;;  %2214 = vperm.xlu0 %3268, %v3436_v2   ;;  %v2805_v55 = vsub.s32 4, %v3811_v60  ;;  %v3455_v2 = vld [vmem:[%s3751_s17 + $0x3d0] sm:$0xff] }
 0x1fe   : > { %v2587_v3 = vadd.f32 %v2459_v58, %v2327_v63  ;;  %v2588_v5 = vadd.f32 %v2460_v61, %v2328_v0  ;;  %v3453_v58 = vld [vmem:[%s3824_s22 + $0x1e0] sm:$0xff]  ;;  %v3454_v61 = vld [vmem:[%s3824_s22 + $0x1e8] sm:$0xff]  ;;  %v4830_v0 = vrot.slane %v4506_v49, %v2805_v55 }
 0x1ff   : > { %v1971_v11 = vpop.permute.xlu1 %1970  ;;  %v1975_v12 = vpop.permute.xlu0 %1974  ;;  %v2469_v59 = vadd.f32 %v3453_v58, %v4509_v50  ;;  %v2470_v7 = vadd.f32 %v3454_v61, %v4509_v50 }
 0x200   : > { %2715 = vst [vmem:[%s4536_s16 + $0x190] sm:$0xff] %v2587_v3  ;;  %2716 = vst [vmem:[%s4536_s16 + $0x198] sm:$0xff] %v2588_v5  ;;  %v2329_v13 = vmul.f32 %v4518_v54, %v1971_v11  ;;  %v2330_v14 = vmul.f32 %v4518_v54, %v1975_v12  ;;  %2218 = vperm.xlu1 %3269, %v3439_v15   ;;  %2222 = vperm.xlu0 %3268, %v3440_v16   ;;  %v3456_v3 = vld [vmem:[%s3751_s17 + $0x3d8] sm:$0xff]  ;;  %v3457_v5 = vld [vmem:[%s3824_s22 + $0x1f0] sm:$0xff] }
 0x201   : > { %v2471_v6 = vadd.f32 %v3457_v5, %v4509_v50  ;;  %v3199_v9 = vpop.f32.mrf.mxu0 }
 0x202   : > { %v2589_v17 = vadd.f32 %v2461_v8, %v2329_v13  ;;  %v2590_v18 = vadd.f32 %v2462_v10, %v2330_v14  ;;  %v3458_v8 = vld [vmem:[%s3824_s22 + $0x1f8] sm:$0xff]  ;;  %v3205_v10 = vpop.f32.mrf.mxu1  ;;  %v2904_v13 = vadd.f32 %v3199_v9, %v4830_v0 }
 0x203   : > { %v1979_v23 = vpop.permute.xlu1 %1978  ;;  %v1983_v24 = vpop.permute.xlu0 %1982  ;;  %v2472_v49 = vadd.f32 %v3458_v8, %v4509_v50  ;;  %v2924_v14 = vadd.f32 %v3205_v10, %v4830_v0 }
 0x204   : > { %2717 = vst [vmem:[%s4536_s16 + $0x1a0] sm:$0xff] %v2589_v17  ;;  %2718 = vst [vmem:[%s4536_s16 + $0x1a8] sm:$0xff] %v2590_v18  ;;  %v2331_v25 = vmul.f32 %v4518_v54, %v1979_v23  ;;  %v2332_v26 = vmul.f32 %v4518_v54, %v1983_v24  ;;  %2226 = vperm.xlu1 %3269, %v3443_v27   ;;  %2230 = vperm.xlu0 %3268, %v3444_v28   ;;  %v2898_v21 = vpop.f32.mrf.mxu0  ;;  %v3461_v27 = vld [vmem:[%s3824_s22 + $0x200] sm:$0xff] }
 0x205   : > { %2938 = vst [vmem:[%s4851_s18 + $0x8] sm:$0xff] %v2904_v13  ;;  %2942 = vst [vmem:[%s4851_s18 + $0x28] sm:$0xff] %v2924_v14  ;;  %v2899_v23 = vadd.f32 %v2898_v21, %v4830_v0  ;;  %v2473_v28 = vadd.f32 %v3461_v27, %v4509_v50 }
 0x206   : > { %v2591_v29 = vadd.f32 %v2463_v20, %v2331_v25  ;;  %v2592_v30 = vadd.f32 %v2464_v22, %v2332_v26  ;;  %v3460_v20 = vld [vmem:[%s3751_s17 + $0x3e8] sm:$0xff]  ;;  %v2918_v22 = vpop.f32.mrf.mxu1  ;;  %v3202_v31 = vpop.f32.mrf.mxu0 }
 0x207   : > { %v1987_v35 = vpop.permute.xlu1 %1986  ;;  %v1991_v36 = vpop.permute.xlu0 %1990  ;;  %v2919_v24 = vadd.f32 %v2918_v22, %v4830_v0  ;;  %2937 = vst [vmem:[%s4851_s18] sm:$0xff] %v2899_v23 }
 0x208   : > { %2719 = vst [vmem:[%s4536_s16 + $0x1b0] sm:$0xff] %v2591_v29  ;;  %2720 = vst [vmem:[%s4536_s16 + $0x1b8] sm:$0xff] %v2592_v30  ;;  %v2333_v37 = vmul.f32 %v4518_v54, %v1987_v35  ;;  %v2334_v38 = vmul.f32 %v4518_v54, %v1991_v36  ;;  %2234 = vperm.xlu1 %3269, %v3447_v39   ;;  %2238 = vperm.xlu0 %3268, %v3448_v40   ;;  %v3462_v29 = vld [vmem:[%s3824_s22 + $0x208] sm:$0xff]  ;;  %v3463_v39 = vld [vmem:[%s3751_s17 + $0x3f0] sm:$0xff] }
 0x209   : > { %v2474_v30 = vadd.f32 %v3462_v29, %v4509_v50  ;;  %2941 = vst [vmem:[%s4851_s18 + $0x20] sm:$0xff] %v2919_v24  ;;  %v2914_v35 = vadd.f32 %v3202_v31, %v4830_v0  ;;  %v3464_v40 = vld [vmem:[%s3751_s17 + $0x3f8] sm:$0xff]  ;;  %s3531_s17 = sshll.u32 %s3647_s8, 4  ;;  %s3532_s17 = int_to_ptr.vmem [resolvable:$false] %s3531_s17 }
 0x20a   : > { %v2593_v41 = vadd.f32 %v2465_v32, %v2333_v37  ;;  %v2594_v42 = vadd.f32 %v2466_v34, %v2334_v38  ;;  %v3208_v32 = vpop.f32.mrf.mxu1  ;;  %s3533_s9 = scalar_lea.vmem %s3532_s17, 32768  ;;  %p3534_p1 = scmp.lt.s32.totalorder %s4894_s14, %s3532_s17 }
 0x20b   : > { %v1995_v47 = vpop.permute.xlu1 %1994  ;;  %v1999_v48 = vpop.permute.xlu0 %1998  ;;  %v2934_v36 = vadd.f32 %v3208_v32, %v4830_v0  ;;  %2940 = vst [vmem:[%s4851_s18 + $0x18] sm:$0xff] %v2914_v35  ;;  %p3535_p2 = scmp.lt.s32.totalorder %s3533_s9, %s3527_s15 }
 0x20c   : > { %2721 = vst [vmem:[%s4536_s16 + $0x1c0] sm:$0xff] %v2593_v41  ;;  %2722 = vst [vmem:[%s4536_s16 + $0x1c8] sm:$0xff] %v2594_v42  ;;  %v2335_v51 = vmul.f32 %v4518_v54, %v1995_v47  ;;  %v2336_v4 = vmul.f32 %v4518_v54, %v1999_v48  ;;  %2242 = vperm.xlu1 %3269, %v3451_v52   ;;  %2246 = vperm.xlu0 %3268, %v3452_v53   ;;  %v2908_v41 = vpop.f32.mrf.mxu0  ;;  %v2928_v42 = vpop.f32.mrf.mxu1  ;;  %v3465_v47 = vld [vmem:[%s3824_s22 + $0x210] sm:$0xff] }
 0x20d   : > { %2944 = vst [vmem:[%s4851_s18 + $0x38] sm:$0xff] %v2934_v36  ;;  %v2909_v43 = vadd.f32 %v2908_v41, %v4830_v0  ;;  %v2475_v48 = vadd.f32 %v3465_v47, %v4509_v50  ;;  %p3536_p3 = por %p3535_p2, %p3534_p1 }
 0x20e   : > { %v2595_v56 = vadd.f32 %v2467_v44, %v2335_v51  ;;  %v2596_v57 = vadd.f32 %v2468_v46, %v2336_v4  ;;  %v2929_v44 = vadd.f32 %v2928_v42, %v4830_v0  ;;  %v3466_v51 = vld [vmem:[%s3824_s22 + $0x218] sm:$0xff] }
 0x20f   : > { %v2003_v62 = vpop.permute.xlu1 %2002  ;;  %v2007_v63 = vpop.permute.xlu0 %2006  ;;  %v2476_v4 = vadd.f32 %v3466_v51, %v4509_v50  ;;  %2939 = vst [vmem:[%s4851_s18 + $0x10] sm:$0xff] %v2909_v43  ;;  %p3537_p4 = pnand %p3536_p3, %p3530_p0 }
 0x210   : > { %2723 = vst [vmem:[%s4536_s16 + $0x1d0] sm:$0xff] %v2595_v56  ;;  %2724 = vst [vmem:[%s4536_s16 + $0x1d8] sm:$0xff] %v2596_v57  ;;  %v2337_v60 = vmul.f32 %v4518_v54, %v2003_v62  ;;  %v2338_v1 = vmul.f32 %v4518_v54, %v2007_v63  ;;  %2250 = vperm.xlu1 %3269, %v3455_v2   ;;  %2254 = vperm.xlu0 %3268, %v3456_v3  }
 0x211   : > { %2943 = vst [vmem:[%s4851_s18 + $0x30] sm:$0xff] %v2929_v44 }
 0x212   : > { %v2597_v11 = vadd.f32 %v2469_v59, %v2337_v60  ;;  %v2598_v12 = vadd.f32 %v2470_v7, %v2338_v1 }
 0x213   : > { %v2011_v15 = vpop.permute.xlu1 %2010  ;;  %v2015_v16 = vpop.permute.xlu0 %2014 }
 0x214   : > { %2725 = vst [vmem:[%s4536_s16 + $0x1e0] sm:$0xff] %v2597_v11  ;;  %2726 = vst [vmem:[%s4536_s16 + $0x1e8] sm:$0xff] %v2598_v12  ;;  %v2339_v17 = vmul.f32 %v4518_v54, %v2011_v15  ;;  %v2340_v18 = vmul.f32 %v4518_v54, %v2015_v16  ;;  %2258 = vperm.xlu1 %3269, %v3459_v19   ;;  %2262 = vperm.xlu0 %3268, %v3460_v20  }
 0x216   : > { %v2599_v25 = vadd.f32 %v2471_v6, %v2339_v17  ;;  %v2600_v26 = vadd.f32 %v2472_v49, %v2340_v18 }
 0x217   : > { %v2019_v33 = vpop.permute.xlu1 %2018  ;;  %v2023_v34 = vpop.permute.xlu0 %2022 }
 0x218   : > { %2727 = vst [vmem:[%s4536_s16 + $0x1f0] sm:$0xff] %v2599_v25  ;;  %2728 = vst [vmem:[%s4536_s16 + $0x1f8] sm:$0xff] %v2600_v26  ;;  %v2341_v37 = vmul.f32 %v4518_v54, %v2019_v33  ;;  %v2342_v38 = vmul.f32 %v4518_v54, %v2023_v34  ;;  %2266 = vperm.xlu1 %3269, %v3463_v39   ;;  %2270 = vperm.xlu0 %3268, %v3464_v40  }
 0x21a   : > { %v2601_v45 = vadd.f32 %v2473_v28, %v2341_v37  ;;  %v2602_v46 = vadd.f32 %v2474_v30, %v2342_v38 }
 0x21b   : > { %v2027_v52 = vpop.permute.xlu1 %2026  ;;  %v2031_v53 = vpop.permute.xlu0 %2030 }
 0x21c   : > { %2729 = vst [vmem:[%s4536_s16 + $0x200] sm:$0xff] %v2601_v45  ;;  %2730 = vst [vmem:[%s4536_s16 + $0x208] sm:$0xff] %v2602_v46  ;;  %v2343_v55 = vmul.f32 %v4518_v54, %v2027_v52  ;;  %v2344_v56 = vmul.f32 %v4518_v54, %v2031_v53 }
 0x21d   : > { %3540 = shalt.err (!%p3537_p4)
}
 0x21e   : > { %s3541_s20 = scalar_lea.hbm %s4885_s21, 16384  ;;  %s3545_s8 = scalar_lea.hbm %s5258_s5, 32768 }
 0x21f   : > { %p3542_p7 = scmp.ne.s32.totalorder %s4885_s21, %s3541_s20  ;;  %p3546_p10 = scmp.lt.s32.totalorder %s4885_s21, %s5258_s5 }
 0x220   : > { %p3547_p11 = scmp.lt.s32.totalorder %s3545_s8, %s3541_s20 }
 0x221   : > { %p3543_p8 = pnand %p3542_p7, %p3732_p5 }
 0x222   : > { %p3548_p12 = por %p3547_p11, %p3546_p10 }
 0x223   : > { %p3544_p9 = pneg %p3543_p8 }
 0x225   : > { %p3549_p13 = pnand %p3548_p12, %p3544_p9 }
 0x227   : > { %3552 = shalt.err (!%p3549_p13)
}
 0x228   : > { %s3648_s15 = smov 128   ;;  %s3649_s17 = smov 8   ;;  %v2603_v57 = vadd.f32 %v2475_v48, %v2343_v55  ;;  %v2604_v58 = vadd.f32 %v2476_v4, %v2344_v56  ;;  %v3467_v59 = vld [vmem:[%s3824_s22 + $0x220] sm:$0xff]  ;;  %v3468_v7 = vld [vmem:[%s3824_s22 + $0x228] sm:$0xff]  ;;  %v2035_v63 = vpop.permute.xlu1 %2034  ;;  %v2039_v0 = vpop.permute.xlu0 %2038  ;;  %v3469_v5 = vld [vmem:[%s3824_s22 + $0x230] sm:$0xff] }
 0x229   : > { %s5267_s0 = scalar_lea.sflag [#allocation3], %s3833_s23  ;;  %v2477_v61 = vadd.f32 %v3467_v59, %v4509_v50  ;;  %v2478_v62 = vadd.f32 %v3468_v7, %v4509_v50  ;;  %v2345_v60 = vmul.f32 %v4518_v54, %v2035_v63  ;;  %v2346_v1 = vmul.f32 %v4518_v54, %v2039_v0  ;;  %v3470_v8 = vld [vmem:[%s3824_s22 + $0x238] sm:$0xff]  ;;  %v3471_v15 = vld [vmem:[%s3824_s22 + $0x240] sm:$0xff]  ;;  %v3472_v17 = vld [vmem:[%s3824_s22 + $0x248] sm:$0xff]  ;;  %s2950_s29 = sand.u32 1, %s3713_s28  }
 0x22a   : > { %3213 = dma.vmem_to_hbm [thread:$0]  (%p3732_p5), %s4894_s14, 16384, %s4885_s21, %s5267_s0, %s3648_s15, %s3648_s15, %s3649_s17   ;;  %v2479_v6 = vadd.f32 %v3469_v5, %v4509_v50  ;;  %v2480_v49 = vadd.f32 %v3470_v8, %v4509_v50  ;;  %v2481_v16 = vadd.f32 %v3471_v15, %v4509_v50  ;;  %v2482_v18 = vadd.f32 %v3472_v17, %v4509_v50 }
 0x22b   : > { %2731 = vst [vmem:[%s4536_s16 + $0x210] sm:$0xff] %v2603_v57  ;;  %2732 = vst [vmem:[%s4536_s16 + $0x218] sm:$0xff] %v2604_v58  ;;  %v2605_v2 = vadd.f32 %v2477_v61, %v2345_v60  ;;  %v2606_v3 = vadd.f32 %v2478_v62, %v2346_v1  ;;  %v3473_v25 = vld [vmem:[%s3824_s22 + $0x250] sm:$0xff]  ;;  %v3474_v27 = vld [vmem:[%s3824_s22 + $0x258] sm:$0xff]  ;;  %s2985_s23 = sshll.u32 %s4536_s16, 4  ;;  %s3001_s19 = sshll.u32 %s4851_s18, 4  ;;  %s5173_s23 = int_to_ptr.vmem [resolvable:$true] %s2985_s23  ;;  %s5175_s19 = int_to_ptr.vmem [resolvable:$true] %s3001_s19 }
 0x22c   : > { %v2043_v9 = vpop.permute.xlu1 %2042  ;;  %v2047_v10 = vpop.permute.xlu0 %2046  ;;  %v2483_v26 = vadd.f32 %v3473_v25, %v4509_v50  ;;  %v2484_v28 = vadd.f32 %v3474_v27, %v4509_v50  ;;  %v3475_v35 = vld [vmem:[%s3824_s22 + $0x260] sm:$0xff]  ;;  %v3476_v37 = vld [vmem:[%s3824_s22 + $0x268] sm:$0xff]  ;;  %v3477_v45 = vld [vmem:[%s3824_s22 + $0x270] sm:$0xff]  ;;  %s3182_s21 = sshll.u32 %s3713_s28, 10  ;;  %s3553_s0 = scalar_lea.vmem %s5173_s23, 16384 }
 0x22d   : > { %2733 = vst [vmem:[%s4536_s16 + $0x220] sm:$0xff] %v2605_v2  ;;  %2734 = vst [vmem:[%s4536_s16 + $0x228] sm:$0xff] %v2606_v3  ;;  %v2347_v11 = vmul.f32 %v4518_v54, %v2043_v9  ;;  %v2348_v12 = vmul.f32 %v4518_v54, %v2047_v10  ;;  %v2485_v36 = vadd.f32 %v3475_v35, %v4509_v50  ;;  %v3478_v47 = vld [vmem:[%s3824_s22 + $0x278] sm:$0xff]  ;;  %v3479_v57 = vld [vmem:[%s3824_s22 + $0x280] sm:$0xff]  ;;  %s5180_s8 = scalar_lea.hbm %s5260_s7, %s3182_s21  ;;  %p3554_p0 = scmp.ne.s32.totalorder %s5173_s23, %s3553_s0 }
 0x22e   : > { %v2486_v38 = vadd.f32 %v3476_v37, %v4509_v50  ;;  %v2487_v46 = vadd.f32 %v3477_v45, %v4509_v50  ;;  %v2488_v48 = vadd.f32 %v3478_v47, %v4509_v50  ;;  %v2489_v58 = vadd.f32 %v3479_v57, %v4509_v50  ;;  %v3480_v59 = vld [vmem:[%s3824_s22 + $0x288] sm:$0xff]  ;;  %v3481_v2 = vld [vmem:[%s3824_s22 + $0x290] sm:$0xff]  ;;  %v3482_v5 = vld [vmem:[%s3824_s22 + $0x298] sm:$0xff] }
 0x22f   : > { %v2607_v13 = vadd.f32 %v2479_v6, %v2347_v11  ;;  %v2608_v14 = vadd.f32 %v2480_v49, %v2348_v12  ;;  %v2490_v61 = vadd.f32 %v3480_v59, %v4509_v50  ;;  %v2491_v3 = vadd.f32 %v3481_v2, %v4509_v50  ;;  %v3484_v15 = vld [vmem:[%s3824_s22 + $0x2a8] sm:$0xff]  ;;  %v3486_v25 = vld [vmem:[%s3824_s22 + $0x2b8] sm:$0xff]  ;;  %p3555_p1 = pnand %p3554_p0, %p3732_p5 }
 0x230   : > { %v2051_v19 = vpop.permute.xlu1 %2050  ;;  %v2055_v20 = vpop.permute.xlu0 %2054  ;;  %v2492_v6 = vadd.f32 %v3482_v5, %v4509_v50  ;;  %v3488_v35 = vld [vmem:[%s3824_s22 + $0x2c8] sm:$0xff]  ;;  %v3490_v45 = vld [vmem:[%s3824_s22 + $0x2d8] sm:$0xff] }
 0x231   : > { %2735 = vst [vmem:[%s4536_s16 + $0x230] sm:$0xff] %v2607_v13  ;;  %2736 = vst [vmem:[%s4536_s16 + $0x238] sm:$0xff] %v2608_v14  ;;  %v2349_v21 = vmul.f32 %v4518_v54, %v2051_v19  ;;  %v2350_v22 = vmul.f32 %v4518_v54, %v2055_v20  ;;  %v3483_v13 = vld [vmem:[%s3824_s22 + $0x2a0] sm:$0xff]  ;;  %v3492_v57 = vld [vmem:[%s3824_s22 + $0x2e8] sm:$0xff]  ;;  %p3556_p2 = pneg %p3555_p1 }
 0x232   : > { %v2493_v14 = vadd.f32 %v3483_v13, %v4509_v50  ;;  %v3494_v2 = vld [vmem:[%s3824_s22 + $0x2f8] sm:$0xff]  ;;  %v3496_v13 = vld [vmem:[%s3824_s22 + $0x308] sm:$0xff] }
 0x233   : > { %v2609_v23 = vadd.f32 %v2481_v16, %v2349_v21  ;;  %v2610_v24 = vadd.f32 %v2482_v18, %v2350_v22  ;;  %v2494_v16 = vadd.f32 %v3484_v15, %v4509_v50 }
 0x234   : > { %v2059_v29 = vpop.permute.xlu1 %2058  ;;  %v2063_v30 = vpop.permute.xlu0 %2062 }
 0x235   : > { %2737 = vst [vmem:[%s4536_s16 + $0x240] sm:$0xff] %v2609_v23  ;;  %2738 = vst [vmem:[%s4536_s16 + $0x248] sm:$0xff] %v2610_v24  ;;  %v2351_v31 = vmul.f32 %v4518_v54, %v2059_v29  ;;  %v2352_v32 = vmul.f32 %v4518_v54, %v2063_v30  ;;  %v3485_v23 = vld [vmem:[%s3824_s22 + $0x2b0] sm:$0xff] }
 0x236   : > { %v2495_v24 = vadd.f32 %v3485_v23, %v4509_v50  ;;  %v3498_v23 = vld [vmem:[%s3824_s22 + $0x318] sm:$0xff] }
 0x237   : > { %v2611_v33 = vadd.f32 %v2483_v26, %v2351_v31  ;;  %v2612_v34 = vadd.f32 %v2484_v28, %v2352_v32  ;;  %v2496_v26 = vadd.f32 %v3486_v25, %v4509_v50 }
 0x238   : > { %v2067_v39 = vpop.permute.xlu1 %2066  ;;  %v2071_v40 = vpop.permute.xlu0 %2070 }
 0x239   : > { %2739 = vst [vmem:[%s4536_s16 + $0x250] sm:$0xff] %v2611_v33  ;;  %2740 = vst [vmem:[%s4536_s16 + $0x258] sm:$0xff] %v2612_v34  ;;  %v2353_v41 = vmul.f32 %v4518_v54, %v2067_v39  ;;  %v2354_v42 = vmul.f32 %v4518_v54, %v2071_v40  ;;  %v3487_v33 = vld [vmem:[%s3824_s22 + $0x2c0] sm:$0xff] }
 0x23a   : > { %v2497_v34 = vadd.f32 %v3487_v33, %v4509_v50  ;;  %v3500_v33 = vld [vmem:[%s3824_s22 + $0x328] sm:$0xff] }
 0x23b   : > { %v2613_v43 = vadd.f32 %v2485_v36, %v2353_v41  ;;  %v2614_v44 = vadd.f32 %v2486_v38, %v2354_v42  ;;  %v2498_v36 = vadd.f32 %v3488_v35, %v4509_v50 }
 0x23c   : > { %v2075_v51 = vpop.permute.xlu1 %2074  ;;  %v2079_v4 = vpop.permute.xlu0 %2078 }
 0x23d   : > { %2741 = vst [vmem:[%s4536_s16 + $0x260] sm:$0xff] %v2613_v43  ;;  %2742 = vst [vmem:[%s4536_s16 + $0x268] sm:$0xff] %v2614_v44  ;;  %v2355_v52 = vmul.f32 %v4518_v54, %v2075_v51  ;;  %v2356_v53 = vmul.f32 %v4518_v54, %v2079_v4  ;;  %v3489_v43 = vld [vmem:[%s3824_s22 + $0x2d0] sm:$0xff] }
 0x23e   : > { %v2499_v44 = vadd.f32 %v3489_v43, %v4509_v50  ;;  %v3502_v43 = vld [vmem:[%s3824_s22 + $0x338] sm:$0xff] }
 0x23f   : > { %v2615_v55 = vadd.f32 %v2487_v46, %v2355_v52  ;;  %v2616_v56 = vadd.f32 %v2488_v48, %v2356_v53  ;;  %v2500_v46 = vadd.f32 %v3490_v45, %v4509_v50 }
 0x240   : > { %v2083_v7 = vpop.permute.xlu1 %2082  ;;  %v2087_v62 = vpop.permute.xlu0 %2086 }
 0x241   : > { %2743 = vst [vmem:[%s4536_s16 + $0x270] sm:$0xff] %v2615_v55  ;;  %2744 = vst [vmem:[%s4536_s16 + $0x278] sm:$0xff] %v2616_v56  ;;  %v2357_v63 = vmul.f32 %v4518_v54, %v2083_v7  ;;  %v2358_v0 = vmul.f32 %v4518_v54, %v2087_v62  ;;  %v3491_v55 = vld [vmem:[%s3824_s22 + $0x2e0] sm:$0xff] }
 0x242   : > { %v2501_v56 = vadd.f32 %v3491_v55, %v4509_v50  ;;  %v3504_v55 = vld [vmem:[%s3824_s22 + $0x348] sm:$0xff] }
 0x243   : > { %v2617_v60 = vadd.f32 %v2489_v58, %v2357_v63  ;;  %v2618_v1 = vadd.f32 %v2490_v61, %v2358_v0  ;;  %v2502_v58 = vadd.f32 %v3492_v57, %v4509_v50 }
 0x244   : > { %v2091_v8 = vpop.permute.xlu1 %2090  ;;  %v2095_v49 = vpop.permute.xlu0 %2094 }
 0x245   : > { %2745 = vst [vmem:[%s4536_s16 + $0x280] sm:$0xff] %v2617_v60  ;;  %2746 = vst [vmem:[%s4536_s16 + $0x288] sm:$0xff] %v2618_v1  ;;  %v2359_v9 = vmul.f32 %v4518_v54, %v2091_v8  ;;  %v2360_v10 = vmul.f32 %v4518_v54, %v2095_v49  ;;  %v3493_v60 = vld [vmem:[%s3824_s22 + $0x2f0] sm:$0xff] }
 0x246   : > { %v2503_v1 = vadd.f32 %v3493_v60, %v4509_v50  ;;  %v3506_v60 = vld [vmem:[%s3824_s22 + $0x358] sm:$0xff] }
 0x247   : > { %v2619_v11 = vadd.f32 %v2491_v3, %v2359_v9  ;;  %v2620_v12 = vadd.f32 %v2492_v6, %v2360_v10  ;;  %v2504_v3 = vadd.f32 %v3494_v2, %v4509_v50 }
 0x248   : > { %v2099_v17 = vpop.permute.xlu1 %2098  ;;  %v2103_v18 = vpop.permute.xlu0 %2102 }
 0x249   : > { %2747 = vst [vmem:[%s4536_s16 + $0x290] sm:$0xff] %v2619_v11  ;;  %2748 = vst [vmem:[%s4536_s16 + $0x298] sm:$0xff] %v2620_v12  ;;  %v2361_v19 = vmul.f32 %v4518_v54, %v2099_v17  ;;  %v2362_v20 = vmul.f32 %v4518_v54, %v2103_v18  ;;  %v3495_v11 = vld [vmem:[%s3824_s22 + $0x300] sm:$0xff] }
 0x24a   : > { %v2505_v12 = vadd.f32 %v3495_v11, %v4509_v50  ;;  %v3508_v11 = vld [vmem:[%s3824_s22 + $0x368] sm:$0xff] }
 0x24b   : > { %v2621_v21 = vadd.f32 %v2493_v14, %v2361_v19  ;;  %v2622_v22 = vadd.f32 %v2494_v16, %v2362_v20  ;;  %v2506_v14 = vadd.f32 %v3496_v13, %v4509_v50 }
 0x24c   : > { %v2107_v27 = vpop.permute.xlu1 %2106  ;;  %v2111_v28 = vpop.permute.xlu0 %2110 }
 0x24d   : > { %2749 = vst [vmem:[%s4536_s16 + $0x2a0] sm:$0xff] %v2621_v21  ;;  %2750 = vst [vmem:[%s4536_s16 + $0x2a8] sm:$0xff] %v2622_v22  ;;  %v2363_v29 = vmul.f32 %v4518_v54, %v2107_v27  ;;  %v2364_v30 = vmul.f32 %v4518_v54, %v2111_v28  ;;  %v3497_v21 = vld [vmem:[%s3824_s22 + $0x310] sm:$0xff] }
 0x24e   : > { %v2507_v22 = vadd.f32 %v3497_v21, %v4509_v50  ;;  %v3510_v21 = vld [vmem:[%s3824_s22 + $0x378] sm:$0xff] }
 0x24f   : > { %v2623_v31 = vadd.f32 %v2495_v24, %v2363_v29  ;;  %v2624_v32 = vadd.f32 %v2496_v26, %v2364_v30  ;;  %v2508_v24 = vadd.f32 %v3498_v23, %v4509_v50 }
 0x250   : > { %v2115_v37 = vpop.permute.xlu1 %2114  ;;  %v2119_v38 = vpop.permute.xlu0 %2118 }
 0x251   : > { %2751 = vst [vmem:[%s4536_s16 + $0x2b0] sm:$0xff] %v2623_v31  ;;  %2752 = vst [vmem:[%s4536_s16 + $0x2b8] sm:$0xff] %v2624_v32  ;;  %v2365_v39 = vmul.f32 %v4518_v54, %v2115_v37  ;;  %v2366_v40 = vmul.f32 %v4518_v54, %v2119_v38  ;;  %v3499_v31 = vld [vmem:[%s3824_s22 + $0x320] sm:$0xff] }
 0x252   : > { %v2509_v32 = vadd.f32 %v3499_v31, %v4509_v50  ;;  %v3512_v31 = vld [vmem:[%s3824_s22 + $0x388] sm:$0xff] }
 0x253   : > { %v2625_v41 = vadd.f32 %v2497_v34, %v2365_v39  ;;  %v2626_v42 = vadd.f32 %v2498_v36, %v2366_v40  ;;  %v2510_v34 = vadd.f32 %v3500_v33, %v4509_v50 }
 0x254   : > { %v2123_v47 = vpop.permute.xlu1 %2122  ;;  %v2127_v48 = vpop.permute.xlu0 %2126 }
 0x255   : > { %2753 = vst [vmem:[%s4536_s16 + $0x2c0] sm:$0xff] %v2625_v41  ;;  %2754 = vst [vmem:[%s4536_s16 + $0x2c8] sm:$0xff] %v2626_v42  ;;  %v2367_v51 = vmul.f32 %v4518_v54, %v2123_v47  ;;  %v2368_v4 = vmul.f32 %v4518_v54, %v2127_v48  ;;  %v3501_v41 = vld [vmem:[%s3824_s22 + $0x330] sm:$0xff] }
 0x256   : > { %v2511_v42 = vadd.f32 %v3501_v41, %v4509_v50  ;;  %v3514_v41 = vld [vmem:[%s3824_s22 + $0x398] sm:$0xff] }
 0x257   : > { %v2627_v52 = vadd.f32 %v2499_v44, %v2367_v51  ;;  %v2628_v53 = vadd.f32 %v2500_v46, %v2368_v4  ;;  %v2512_v44 = vadd.f32 %v3502_v43, %v4509_v50 }
 0x258   : > { %v2131_v59 = vpop.permute.xlu1 %2130  ;;  %v2135_v61 = vpop.permute.xlu0 %2134 }
 0x259   : > { %2755 = vst [vmem:[%s4536_s16 + $0x2d0] sm:$0xff] %v2627_v52  ;;  %2756 = vst [vmem:[%s4536_s16 + $0x2d8] sm:$0xff] %v2628_v53  ;;  %v2369_v7 = vmul.f32 %v4518_v54, %v2131_v59  ;;  %v2370_v62 = vmul.f32 %v4518_v54, %v2135_v61  ;;  %v3503_v52 = vld [vmem:[%s3824_s22 + $0x340] sm:$0xff] }
 0x25a   : > { %v2513_v53 = vadd.f32 %v3503_v52, %v4509_v50  ;;  %v3516_v52 = vld [vmem:[%s3824_s22 + $0x3a8] sm:$0xff] }
 0x25b   : > { %v2629_v63 = vadd.f32 %v2501_v56, %v2369_v7  ;;  %v2630_v0 = vadd.f32 %v2502_v58, %v2370_v62  ;;  %v2514_v56 = vadd.f32 %v3504_v55, %v4509_v50 }
 0x25c   : > { %v2139_v5 = vpop.permute.xlu1 %2138  ;;  %v2143_v6 = vpop.permute.xlu0 %2142 }
 0x25d   : > { %2757 = vst [vmem:[%s4536_s16 + $0x2e0] sm:$0xff] %v2629_v63  ;;  %2758 = vst [vmem:[%s4536_s16 + $0x2e8] sm:$0xff] %v2630_v0  ;;  %v2371_v8 = vmul.f32 %v4518_v54, %v2139_v5  ;;  %v2372_v49 = vmul.f32 %v4518_v54, %v2143_v6  ;;  %v3505_v63 = vld [vmem:[%s3824_s22 + $0x350] sm:$0xff] }
 0x25e   : > { %v2515_v0 = vadd.f32 %v3505_v63, %v4509_v50  ;;  %v3518_v63 = vld [vmem:[%s3824_s22 + $0x3b8] sm:$0xff] }
 0x25f   : > { %v2631_v9 = vadd.f32 %v2503_v1, %v2371_v8  ;;  %v2632_v10 = vadd.f32 %v2504_v3, %v2372_v49  ;;  %v2516_v1 = vadd.f32 %v3506_v60, %v4509_v50 }
 0x260   : > { %v2147_v15 = vpop.permute.xlu1 %2146  ;;  %v2151_v16 = vpop.permute.xlu0 %2150 }
 0x261   : > { %2759 = vst [vmem:[%s4536_s16 + $0x2f0] sm:$0xff] %v2631_v9  ;;  %2760 = vst [vmem:[%s4536_s16 + $0x2f8] sm:$0xff] %v2632_v10  ;;  %v2373_v17 = vmul.f32 %v4518_v54, %v2147_v15  ;;  %v2374_v18 = vmul.f32 %v4518_v54, %v2151_v16  ;;  %v3507_v9 = vld [vmem:[%s3824_s22 + $0x360] sm:$0xff] }
 0x262   : > { %v2517_v10 = vadd.f32 %v3507_v9, %v4509_v50  ;;  %v3520_v9 = vld [vmem:[%s3824_s22 + $0x3c8] sm:$0xff] }
 0x263   : > { %v2633_v19 = vadd.f32 %v2505_v12, %v2373_v17  ;;  %v2634_v20 = vadd.f32 %v2506_v14, %v2374_v18  ;;  %v2518_v12 = vadd.f32 %v3508_v11, %v4509_v50 }
 0x264   : > { %v2155_v25 = vpop.permute.xlu1 %2154  ;;  %v2159_v26 = vpop.permute.xlu0 %2158 }
 0x265   : > { %2761 = vst [vmem:[%s4536_s16 + $0x300] sm:$0xff] %v2633_v19  ;;  %2762 = vst [vmem:[%s4536_s16 + $0x308] sm:$0xff] %v2634_v20  ;;  %v2375_v27 = vmul.f32 %v4518_v54, %v2155_v25  ;;  %v2376_v28 = vmul.f32 %v4518_v54, %v2159_v26  ;;  %v3509_v19 = vld [vmem:[%s3824_s22 + $0x370] sm:$0xff] }
 0x266   : > { %v2519_v20 = vadd.f32 %v3509_v19, %v4509_v50  ;;  %v3522_v19 = vld [vmem:[%s3824_s22 + $0x3d8] sm:$0xff] }
 0x267   : > { %v2635_v29 = vadd.f32 %v2507_v22, %v2375_v27  ;;  %v2636_v30 = vadd.f32 %v2508_v24, %v2376_v28  ;;  %v2520_v22 = vadd.f32 %v3510_v21, %v4509_v50 }
 0x268   : > { %v2163_v35 = vpop.permute.xlu1 %2162  ;;  %v2167_v36 = vpop.permute.xlu0 %2166 }
 0x269   : > { %2763 = vst [vmem:[%s4536_s16 + $0x310] sm:$0xff] %v2635_v29  ;;  %2764 = vst [vmem:[%s4536_s16 + $0x318] sm:$0xff] %v2636_v30  ;;  %v2377_v37 = vmul.f32 %v4518_v54, %v2163_v35  ;;  %v2378_v38 = vmul.f32 %v4518_v54, %v2167_v36  ;;  %v3511_v29 = vld [vmem:[%s3824_s22 + $0x380] sm:$0xff] }
 0x26a   : > { %v2521_v30 = vadd.f32 %v3511_v29, %v4509_v50  ;;  %v3524_v29 = vld [vmem:[%s3824_s22 + $0x3e8] sm:$0xff] }
 0x26b   : > { %v2637_v39 = vadd.f32 %v2509_v32, %v2377_v37  ;;  %v2638_v40 = vadd.f32 %v2510_v34, %v2378_v38  ;;  %v2522_v32 = vadd.f32 %v3512_v31, %v4509_v50 }
 0x26c   : > { %v2171_v45 = vpop.permute.xlu1 %2170  ;;  %v2175_v46 = vpop.permute.xlu0 %2174 }
 0x26d   : > { %2765 = vst [vmem:[%s4536_s16 + $0x320] sm:$0xff] %v2637_v39  ;;  %2766 = vst [vmem:[%s4536_s16 + $0x328] sm:$0xff] %v2638_v40  ;;  %v2379_v47 = vmul.f32 %v4518_v54, %v2171_v45  ;;  %v2380_v48 = vmul.f32 %v4518_v54, %v2175_v46  ;;  %v3513_v39 = vld [vmem:[%s3824_s22 + $0x390] sm:$0xff] }
 0x26e   : > { %v2523_v40 = vadd.f32 %v3513_v39, %v4509_v50  ;;  %v3526_v39 = vld [vmem:[%s3824_s22 + $0x3f8] sm:$0xff] }
 0x26f   : > { %v2639_v51 = vadd.f32 %v2511_v42, %v2379_v47  ;;  %v2640_v4 = vadd.f32 %v2512_v44, %v2380_v48  ;;  %v2524_v42 = vadd.f32 %v3514_v41, %v4509_v50 }
 0x270   : > { %v2179_v57 = vpop.permute.xlu1 %2178  ;;  %v2183_v58 = vpop.permute.xlu0 %2182 }
 0x271   : > { %2767 = vst [vmem:[%s4536_s16 + $0x330] sm:$0xff] %v2639_v51  ;;  %2768 = vst [vmem:[%s4536_s16 + $0x338] sm:$0xff] %v2640_v4  ;;  %v2381_v59 = vmul.f32 %v4518_v54, %v2179_v57  ;;  %v2382_v61 = vmul.f32 %v4518_v54, %v2183_v58  ;;  %v3515_v51 = vld [vmem:[%s3824_s22 + $0x3a0] sm:$0xff] }
 0x272   : > { %v2525_v4 = vadd.f32 %v3515_v51, %v4509_v50 }
 0x273   : > { %v2641_v7 = vadd.f32 %v2513_v53, %v2381_v59  ;;  %v2642_v62 = vadd.f32 %v2514_v56, %v2382_v61  ;;  %v2526_v53 = vadd.f32 %v3516_v52, %v4509_v50 }
 0x274   : > { %v2187_v2 = vpop.permute.xlu1 %2186  ;;  %v2191_v3 = vpop.permute.xlu0 %2190 }
 0x275   : > { %2769 = vst [vmem:[%s4536_s16 + $0x340] sm:$0xff] %v2641_v7  ;;  %2770 = vst [vmem:[%s4536_s16 + $0x348] sm:$0xff] %v2642_v62  ;;  %v2383_v5 = vmul.f32 %v4518_v54, %v2187_v2  ;;  %v2384_v6 = vmul.f32 %v4518_v54, %v2191_v3  ;;  %v3517_v7 = vld [vmem:[%s3824_s22 + $0x3b0] sm:$0xff] }
 0x276   : > { %v2527_v62 = vadd.f32 %v3517_v7, %v4509_v50 }
 0x277   : > { %v2643_v8 = vadd.f32 %v2515_v0, %v2383_v5  ;;  %v2644_v49 = vadd.f32 %v2516_v1, %v2384_v6  ;;  %v2528_v0 = vadd.f32 %v3518_v63, %v4509_v50 }
 0x278   : > { %v2195_v13 = vpop.permute.xlu1 %2194  ;;  %v2199_v14 = vpop.permute.xlu0 %2198 }
 0x279   : > { %2771 = vst [vmem:[%s4536_s16 + $0x350] sm:$0xff] %v2643_v8  ;;  %2772 = vst [vmem:[%s4536_s16 + $0x358] sm:$0xff] %v2644_v49  ;;  %v2385_v15 = vmul.f32 %v4518_v54, %v2195_v13  ;;  %v2386_v16 = vmul.f32 %v4518_v54, %v2199_v14  ;;  %v3519_v8 = vld [vmem:[%s3824_s22 + $0x3c0] sm:$0xff] }
 0x27a   : > { %v2529_v49 = vadd.f32 %v3519_v8, %v4509_v50 }
 0x27b   : > { %v2645_v17 = vadd.f32 %v2517_v10, %v2385_v15  ;;  %v2646_v18 = vadd.f32 %v2518_v12, %v2386_v16  ;;  %v2530_v10 = vadd.f32 %v3520_v9, %v4509_v50 }
 0x27c   : > { %v2203_v23 = vpop.permute.xlu1 %2202  ;;  %v2207_v24 = vpop.permute.xlu0 %2206 }
 0x27d   : > { %2773 = vst [vmem:[%s4536_s16 + $0x360] sm:$0xff] %v2645_v17  ;;  %2774 = vst [vmem:[%s4536_s16 + $0x368] sm:$0xff] %v2646_v18  ;;  %v2387_v25 = vmul.f32 %v4518_v54, %v2203_v23  ;;  %v2388_v26 = vmul.f32 %v4518_v54, %v2207_v24  ;;  %v3521_v17 = vld [vmem:[%s3824_s22 + $0x3d0] sm:$0xff] }
 0x27e   : > { %v2531_v18 = vadd.f32 %v3521_v17, %v4509_v50 }
 0x27f   : > { %v2647_v27 = vadd.f32 %v2519_v20, %v2387_v25  ;;  %v2648_v28 = vadd.f32 %v2520_v22, %v2388_v26  ;;  %v2532_v20 = vadd.f32 %v3522_v19, %v4509_v50 }
 0x280   : > { %v2211_v33 = vpop.permute.xlu1 %2210  ;;  %v2215_v34 = vpop.permute.xlu0 %2214 }
 0x281   : > { %2775 = vst [vmem:[%s4536_s16 + $0x370] sm:$0xff] %v2647_v27  ;;  %2776 = vst [vmem:[%s4536_s16 + $0x378] sm:$0xff] %v2648_v28  ;;  %v2389_v35 = vmul.f32 %v4518_v54, %v2211_v33  ;;  %v2390_v36 = vmul.f32 %v4518_v54, %v2215_v34  ;;  %v3523_v27 = vld [vmem:[%s3824_s22 + $0x3e0] sm:$0xff] }
 0x282   : > { %v2533_v28 = vadd.f32 %v3523_v27, %v4509_v50 }
 0x283   : > { %v2649_v37 = vadd.f32 %v2521_v30, %v2389_v35  ;;  %v2650_v38 = vadd.f32 %v2522_v32, %v2390_v36  ;;  %v2534_v30 = vadd.f32 %v3524_v29, %v4509_v50 }
 0x284   : > { %v2219_v43 = vpop.permute.xlu1 %2218  ;;  %v2223_v44 = vpop.permute.xlu0 %2222 }
 0x285   : > { %2777 = vst [vmem:[%s4536_s16 + $0x380] sm:$0xff] %v2649_v37  ;;  %2778 = vst [vmem:[%s4536_s16 + $0x388] sm:$0xff] %v2650_v38  ;;  %v2391_v45 = vmul.f32 %v4518_v54, %v2219_v43  ;;  %v2392_v46 = vmul.f32 %v4518_v54, %v2223_v44  ;;  %v3525_v37 = vld [vmem:[%s3824_s22 + $0x3f0] sm:$0xff]  ;;  %s5268_s22 = sshll.u32 %s3713_s28, 14  ;;  %s5184_s28 = scalar_lea.sflag [#allocation5], %s2950_s29 }
 0x286   : > { %v2535_v38 = vadd.f32 %v3525_v37, %v4509_v50  ;;  %s5171_s9 = scalar_lea.hbm %s5259_s6, %s5268_s22  ;;  %s3650_s22 = smov [#allocation4]  }
 0x287   : > { %v2651_v47 = vadd.f32 %v2523_v40, %v2391_v45  ;;  %v2652_v48 = vadd.f32 %v2524_v42, %v2392_v46  ;;  %v2536_v40 = vadd.f32 %v3526_v39, %v4509_v50  ;;  %s3557_s14 = sshll.u32 %s3650_s22, 4  ;;  %s3558_s14 = int_to_ptr.vmem [resolvable:$false] %s3557_s14 }
 0x288   : > { %v2227_v55 = vpop.permute.xlu1 %2226  ;;  %v2231_v56 = vpop.permute.xlu0 %2230  ;;  %s3559_s13 = scalar_lea.vmem %s3558_s14, 32768  ;;  %p3560_p3 = scmp.lt.s32.totalorder %s5173_s23, %s3558_s14 }
 0x289   : > { %2779 = vst [vmem:[%s4536_s16 + $0x390] sm:$0xff] %v2651_v47  ;;  %2780 = vst [vmem:[%s4536_s16 + $0x398] sm:$0xff] %v2652_v48  ;;  %v2393_v57 = vmul.f32 %v4518_v54, %v2227_v55  ;;  %v2394_v58 = vmul.f32 %v4518_v54, %v2231_v56  ;;  %p3561_p4 = scmp.lt.s32.totalorder %s3559_s13, %s3553_s0 }
 0x28b   : > { %v2653_v59 = vadd.f32 %v2525_v4, %v2393_v57  ;;  %v2654_v61 = vadd.f32 %v2526_v53, %v2394_v58  ;;  %p3562_p7 = por %p3561_p4, %p3560_p3 }
 0x28c   : > { %v2235_v60 = vpop.permute.xlu1 %2234  ;;  %v2239_v1 = vpop.permute.xlu0 %2238 }
 0x28d   : > { %2781 = vst [vmem:[%s4536_s16 + $0x3a0] sm:$0xff] %v2653_v59  ;;  %2782 = vst [vmem:[%s4536_s16 + $0x3a8] sm:$0xff] %v2654_v61  ;;  %v2395_v2 = vmul.f32 %v4518_v54, %v2235_v60  ;;  %v2396_v3 = vmul.f32 %v4518_v54, %v2239_v1  ;;  %p3563_p8 = pnand %p3562_p7, %p3556_p2 }
 0x28f   : > { %v2655_v5 = vadd.f32 %v2527_v62, %v2395_v2  ;;  %v2656_v6 = vadd.f32 %v2528_v0, %v2396_v3 }
 0x290   : > { %v2243_v11 = vpop.permute.xlu1 %2242  ;;  %v2247_v12 = vpop.permute.xlu0 %2246 }
 0x291   : > { %2783 = vst [vmem:[%s4536_s16 + $0x3b0] sm:$0xff] %v2655_v5  ;;  %2784 = vst [vmem:[%s4536_s16 + $0x3b8] sm:$0xff] %v2656_v6  ;;  %v2397_v13 = vmul.f32 %v4518_v54, %v2243_v11  ;;  %v2398_v14 = vmul.f32 %v4518_v54, %v2247_v12 }
 0x293   : > { %v2657_v15 = vadd.f32 %v2529_v49, %v2397_v13  ;;  %v2658_v16 = vadd.f32 %v2530_v10, %v2398_v14 }
 0x294   : > { %v2251_v21 = vpop.permute.xlu1 %2250  ;;  %v2255_v22 = vpop.permute.xlu0 %2254 }
 0x295   : > { %2785 = vst [vmem:[%s4536_s16 + $0x3c0] sm:$0xff] %v2657_v15  ;;  %2786 = vst [vmem:[%s4536_s16 + $0x3c8] sm:$0xff] %v2658_v16  ;;  %v2399_v23 = vmul.f32 %v4518_v54, %v2251_v21  ;;  %v2400_v24 = vmul.f32 %v4518_v54, %v2255_v22 }
 0x297   : > { %v2659_v25 = vadd.f32 %v2531_v18, %v2399_v23  ;;  %v2660_v26 = vadd.f32 %v2532_v20, %v2400_v24 }
 0x298   : > { %v2259_v31 = vpop.permute.xlu1 %2258  ;;  %v2263_v32 = vpop.permute.xlu0 %2262 }
 0x299   : > { %2787 = vst [vmem:[%s4536_s16 + $0x3d0] sm:$0xff] %v2659_v25  ;;  %2788 = vst [vmem:[%s4536_s16 + $0x3d8] sm:$0xff] %v2660_v26  ;;  %v2401_v33 = vmul.f32 %v4518_v54, %v2259_v31  ;;  %v2402_v34 = vmul.f32 %v4518_v54, %v2263_v32 }
 0x29b   : > { %v2661_v35 = vadd.f32 %v2533_v28, %v2401_v33  ;;  %v2662_v36 = vadd.f32 %v2534_v30, %v2402_v34 }
 0x29c   : > { %v2267_v41 = vpop.permute.xlu1 %2266  ;;  %v2271_v42 = vpop.permute.xlu0 %2270 }
 0x29d   : > { %2789 = vst [vmem:[%s4536_s16 + $0x3e0] sm:$0xff] %v2661_v35  ;;  %2790 = vst [vmem:[%s4536_s16 + $0x3e8] sm:$0xff] %v2662_v36  ;;  %v2403_v43 = vmul.f32 %v4518_v54, %v2267_v41  ;;  %v2404_v44 = vmul.f32 %v4518_v54, %v2271_v42 }
 0x29f   : > { %v2663_v45 = vadd.f32 %v2535_v38, %v2403_v43  ;;  %v2664_v46 = vadd.f32 %v2536_v40, %v2404_v44 }
 0x2a1   : > { %2791 = vst [vmem:[%s4536_s16 + $0x3f0] sm:$0xff] %v2663_v45  ;;  %2792 = vst [vmem:[%s4536_s16 + $0x3f8] sm:$0xff] %v2664_v46 }
 0x2a2   : > { %3566 = shalt.err (!%p3563_p8)
}
 0x2a3   : > { %s3567_s16 = scalar_lea.hbm %s5171_s9, 16384  ;;  %s3571_s18 = scalar_lea.hbm %s5259_s6, 32768 }
 0x2a4   : > { %p3568_p9 = scmp.ne.s32.totalorder %s5171_s9, %s3567_s16  ;;  %p3572_p12 = scmp.lt.s32.totalorder %s5171_s9, %s5259_s6 }
 0x2a5   : > { %p3573_p13 = scmp.lt.s32.totalorder %s3571_s18, %s3567_s16 }
 0x2a6   : > { %p3569_p10 = pnand %p3568_p9, %p3732_p5 }
 0x2a7   : > { %p3574_p0 = por %p3573_p13, %p3572_p12 }
 0x2a8   : > { %p3570_p11 = pneg %p3569_p10 }
 0x2aa   : > { %p3575_p1 = pnand %p3574_p0, %p3570_p11 }
 0x2ac   : > { %3578 = shalt.err (!%p3575_p1)
}
 0x2ad   : > { %3214 = dma.vmem_to_hbm [thread:$0]  (%p3732_p5), %s5173_s23, 16384, %s5171_s9, %s5184_s28, %s3648_s15, %s3648_s15, %s3649_s17  }
 0x2ae   : > { %s3579_s0 = scalar_lea.vmem %s5175_s19, 1024  ;;  %s3651_s14 = smov [#allocation6]  }
 0x2af   : > { %p3580_p2 = scmp.ne.s32.totalorder %s5175_s19, %s3579_s0  ;;  %s3583_s13 = sshll.u32 %s3651_s14, 4  ;;  %s3584_s13 = int_to_ptr.vmem [resolvable:$false] %s3583_s13 }
 0x2b0   : > { %s3585_s16 = scalar_lea.vmem %s3584_s13, 2048  ;;  %p3586_p7 = scmp.lt.s32.totalorder %s5175_s19, %s3584_s13 }
 0x2b1   : > { %p3581_p3 = pnand %p3580_p2, %p3732_p5  ;;  %p3587_p8 = scmp.lt.s32.totalorder %s3585_s16, %s3579_s0 }
 0x2b3   : > { %p3582_p4 = pneg %p3581_p3  ;;  %p3588_p9 = por %p3587_p8, %p3586_p7 }
 0x2b5   : > { %p3589_p10 = pnand %p3588_p9, %p3582_p4 }
 0x2b7   : > { %3592 = shalt.err (!%p3589_p10)
}
 0x2b8   : > { %s3593_s29 = scalar_lea.hbm %s5180_s8, 1024  ;;  %s3597_s21 = scalar_lea.hbm %s5260_s7, 2048 }
 0x2b9   : > { %p3594_p11 = scmp.ne.s32.totalorder %s5180_s8, %s3593_s29  ;;  %p3598_p0 = scmp.lt.s32.totalorder %s5180_s8, %s5260_s7 }
 0x2ba   : > { %p3599_p1 = scmp.lt.s32.totalorder %s3597_s21, %s3593_s29 }
 0x2bb   : > { %p3595_p12 = pnand %p3594_p11, %p3732_p5 }
 0x2bc   : > { %p3600_p2 = por %p3599_p1, %p3598_p0 }
 0x2bd   : > { %p3596_p13 = pneg %p3595_p12 }
 0x2bf   : > { %p3601_p3 = pnand %p3600_p2, %p3596_p13 }
 0x2c1   : > { %3604 = shalt.err (!%p3601_p3)
}
 0x2c2   : > { %3215 = dma.vmem_to_hbm [thread:$0]  (%p3732_p5), %s5175_s19, 1024, %s5180_s8, %s5184_s28, %s3648_s15, %s3648_s15, %s3649_s17  }
 0x2c3 PF: > { %p3229_p4 = scmp.ge.s32.totalorder %s3643_s27, 2  ;;  %s3016_s22 = sand.u32 1, %s3631_s24  }
 0x2c4   : > { %s3017_s0 = scalar_lea.sflag [#allocation3], %s3016_s22 }
 0x2c5   : > { %p3220_p7 = pnand %p3229_p4, %p3736_p6 }
 0x2c7   : > { %p3221_p8 = pneg %p3220_p7 }
 0x2c9   : > { %3622 = dma.done.wait (%p3221_p8), %s3017_s0, 16384  }
 0x2ca   : > { %3624 = vsyncadd (%p3221_p8), %s3017_s0, 4294950912  ;;  %s5269_s11 = sadd.s32 4294967294, %s3643_s27  }
 0x2cb   : > { %s3025_s14 = sand.u32 1, %s5269_s11  }
 0x2cc   : > { %s3026_s13 = scalar_lea.sflag [#allocation5], %s3025_s14 }
 0x2cd   : > { %3626 = dma.done.wait (%p3221_p8), %s3026_s13, 17408  }
 0x2ce   : > { %3628 = vsyncadd (%p3221_p8), %s3026_s13, 4294949888  ;;  %p21_p5 = scmp.ge.s32.totalorder %s3717_s30, 4   ;;  %s5270_s24 = smov %s3635_s25 }
 0x2cf   : > { %s5271_s25 = smov %s3639_s26  ;;  %s5272_s26 = smov %s3730_s10 }
 0x2d0   : > { %s5273_s27 = smov %s3717_s30  ;;  %23 = sbr.rel (!%p21_p5) target bundleno = 7 (0x7), region = 113 }
 0x2d5   :  { %3040 = vsyncpa [#allocation3], 1 }
 0x2d6   :  { %3042 = vsyncpa [#allocation3 + $0x1], 1 }
 0x2d7   :  { %3043 = vsyncpa [#allocation5], 1 }
 0x2d8   :  { %3045 = vsyncpa [#allocation5 + $0x1], 1 }

</bundles_post_ra>
